<compile_context>
chip_gen: v6e
topology: v6e:2x2x1
jax: 0.10.0
libtpu: 0.0.40
codegen_flags: <defaults>
</compile_context>

<pallas_src>
import functools

import jax
import jax.numpy as jnp
from jax.experimental import pallas as pl
from jax.experimental.pallas import tpu as pltpu


# -----------------------------------------------------------------------------------
# Fused kernel: logits[I, J] block = (pair[I, J] + pair[J, I]^T_residues) @ W^T + 2*b
# -----------------------------------------------------------------------------------
def _fused_distogram_kernel(a_ref, b_ref, w_ref, b2_ref, o_ref):
    # a_ref:  (TI, TJ, C)   pair[I, J]   (direct term, i-major)
    # b_ref:  (TJ, TI, C)   pair[J, I]   (transposed term, j-major)
    # w_ref:  (C, NB)       projection weight, (in, out) layout
    # b2_ref: (1, NB)       2 * bias, f32
    # o_ref:  (TI, TJ, NB)  logits[I, J]
    w = w_ref[...]
    b2 = b2_ref[...]
    ti = a_ref.shape[0]
    for a in range(ti):  # TI <= 8 -> static unroll
        # b_ref[:, a, :] gathers row a of every j -> pair[J, I_a, :] as a (TJ, C) tile
        # via a sublane-strided load; this *is* the residue transpose, done by the
        # memory system instead of a (1, 0, 2) vector transpose Mosaic cannot lower.
        x = a_ref[a] + b_ref[:, a, :]                                   # (TJ, C)
        y = jnp.dot(x, w, preferred_element_type=jnp.float32) + b2      # (TJ, NB) f32
        o_ref[a] = y.astype(o_ref.dtype)


def _default_tj(esz):
    # v5e: slower HBM + 16 MiB scoped-VMEM default -> ~5 MiB steps are near-optimal.
    # v6e / v7x: per-step overhead is a larger wall-clock fraction -> go ~2x bigger.
    try:
        kind = jax.devices()[0].device_kind.lower()
    except Exception:
        kind = ""
    base = 1024 if ("v6" in kind or "v7" in kind) else 512
    return base if esz >= 4 else 2 * base


def distogram_logits_pallas(pair, weight, bias, *, tj=None):
    """Fused logits[i, j, :] = (pair[i, j, :] + pair[j, i, :]) @ weight.T + 2 * bias.

    pair:   [N, N, c_z]        (c_z = 128 in the module)
    weight: [num_bins, c_z]    (PyTorch nn.Linear layout)
    bias:   [num_bins]
    returns [N, N, num_bins]
    """
    n, n_b, c = pair.shape
    assert n == n_b, "pair representation must be square over the residue axes"
    nb = weight.shape[0]
    esz = jnp.dtype(pair.dtype).itemsize

    ti = min(8, n)                        # one f32 sublane group of i-rows per step
    if tj is None:
        tj = _default_tj(esz)
    tj = n if n <= tj else max(8, (tj // 8) * 8)

    w_t = weight.T.astype(pair.dtype)                         # (C, NB)
    b2 = (2.0 * bias.astype(jnp.float32)).reshape(1, nb)      # folded 2x bias

    grid = (pl.cdiv(n, ti), pl.cdiv(n, tj))

    # Explicit scoped-VMEM budget: v5e's 16 MiB default must never bind, and we stay
    # well under v7x's 64 MiB physical VMEM.
    block_bytes = 2 * ti * tj * c * esz + ti * tj * nb * esz
    vmem_limit = int(min(48 << 20, max(32 << 20, 2 * block_bytes + (4 << 20))))

    cost = pl.CostEstimate(
        flops=2 * n * n * c * nb + n * n * c,       # true useful work only
        transcendentals=0,
        bytes_accessed=2 * n * n * c * esz + n * n * nb * esz + c * nb * esz + 4 * nb,
    )

    # TODO(synk): the 64-wide output rows are stored lane-masked; packing two j-rows
    # into one 128-lane store needs an in-kernel (TJ, 64)->(TJ//2, 128) relayout and
    # only touches ~1/5 of this kernel's HBM bytes, so it is intentionally left out.
    return pl.pallas_call(
        _fused_distogram_kernel,
        out_shape=jax.ShapeDtypeStruct((n, n, nb), pair.dtype),
        grid_spec=pltpu.PrefetchScalarGridSpec(
            num_scalar_prefetch=0,
            grid=grid,
            in_specs=[
                pl.BlockSpec((ti, tj, c), lambda i, j: (i, j, 0)),   # pair[I, J]
                pl.BlockSpec((tj, ti, c), lambda i, j: (j, i, 0)),   # pair[J, I]
                pl.BlockSpec((c, nb), lambda i, j: (0, 0)),          # weight: 1 fetch
                pl.BlockSpec((1, nb), lambda i, j: (0, 0)),          # 2*bias: 1 fetch
            ],
            out_specs=pl.BlockSpec((ti, tj, nb), lambda i, j: (i, j, 0)),
        ),
        compiler_params=pltpu.CompilerParams(
            dimension_semantics=("parallel", "parallel"),
            vmem_limit_bytes=vmem_limit,
        ),
        cost_estimate=cost,
    )(pair, pair, w_t, b2)


# -----------------------------------------------------------------------------------
# Fallback pipeline (previously validated): Pallas Linear + XLA symmetrize.  Only used
# if this Mosaic build rejects the fused kernel's sublane-strided reads.
# -----------------------------------------------------------------------------------
def _half_logits_kernel(x_ref, w_ref, b_ref, o_ref):
    acc = jnp.dot(x_ref[...], w_ref[...], preferred_element_type=jnp.float32)
    o_ref[...] = (acc + b_ref[...]).astype(o_ref.dtype)


def _half_logits_pallas(pair, weight, bias, *, tm=2048):
    n, _, c = pair.shape
    nb = weight.shape[0]
    m = n * n
    tm = m if m <= tm else max(8, (tm // 8) * 8)
    out = pl.pallas_call(
        _half_logits_kernel,
        out_shape=jax.ShapeDtypeStruct((m, nb), pair.dtype),
        grid_spec=pltpu.PrefetchScalarGridSpec(
            num_scalar_prefetch=0,
            grid=(pl.cdiv(m, tm),),
            in_specs=[
                pl.BlockSpec((tm, c), lambda i: (i, 0)),
                pl.BlockSpec((c, nb), lambda i: (0, 0)),
                pl.BlockSpec((1, nb), lambda i: (0, 0)),
            ],
            out_specs=pl.BlockSpec((tm, nb), lambda i: (i, 0)),
        ),
        compiler_params=pltpu.CompilerParams(dimension_semantics=("parallel",)),
    )(pair.reshape(m, c), weight.T.astype(pair.dtype),
      bias.astype(jnp.float32).reshape(1, nb))
    return out.reshape(n, n, nb)


# -----------------------------------------------------------------------------------
# Head forward (matches DistogramHead.forward)
# -----------------------------------------------------------------------------------
@functools.partial(jax.jit, static_argnames=("num_bins", "first_break", "last_break"))
def _forward_fused(pair, weight, bias, *, num_bins, first_break, last_break):
    logits = distogram_logits_pallas(pair, weight, bias)
    breaks = jnp.linspace(first_break, last_break, num_bins - 1, dtype=jnp.float32)
    return dict(logits=logits, bin_edges=breaks)


@functools.partial(jax.jit, static_argnames=("num_bins", "first_break", "last_break"))
def _forward_split(pair, weight, bias, *, num_bins, first_break, last_break):
    half = _half_logits_pallas(pair, weight, bias)
    # TODO(synk): in this fallback the transpose-add is left to XLA (the fused kernel
    # above is the preferred path and removes it entirely).
    logits = half + jnp.swapaxes(half, -2, -3)
    breaks = jnp.linspace(first_break, last_break, num_bins - 1, dtype=jnp.float32)
    return dict(logits=logits, bin_edges=breaks)


_FUSED_STATE = {"ok": None}


def distogram_head(representations, params, config):
    """Mirrors DistogramHead.forward: returns {'logits', 'bin_edges'}."""
    args = (representations["pair"], params["weights"], params["bias"])
    kw = dict(num_bins=config["num_bins"], first_break=config["first_break"],
              last_break=config["last_break"])
    if _FUSED_STATE["ok"] is not False:
        try:
            out = _forward_fused(*args, **kw)
            _FUSED_STATE["ok"] = True
            return out
        except Exception:
            _FUSED_STATE["ok"] = False
    return _forward_split(*args, **kw)


if __name__ == "__main__":
    config = {"num_bins": 64, "first_break": 2.3125, "last_break": 21.6875}
    n_res, c_z = 64, 128  # c_z fixed at 128 by the module's nn.Linear(128, num_bins)

    key = jax.random.PRNGKey(0)
    k_pair, k_w, k_b = jax.random.split(key, 3)

    pair = jax.random.normal(k_pair, (n_res, n_res, c_z), dtype=jnp.float32)
    # Deterministic synthetic params (PyTorch nn.Linear layout: W [out, in], b [out]).
    w = jax.random.normal(k_w, (config["num_bins"], c_z), dtype=jnp.float32) * 0.02
    b = jax.random.normal(k_b, (config["num_bins"],), dtype=jnp.float32) * 0.01

    out = distogram_head({"pair": pair}, {"weights": w, "bias": b}, config)
    jax.block_until_ready(out)

    # Correctness check against a plain-JAX reference of the PyTorch forward.
    ref_half = pair @ w.T + b
    ref_logits = ref_half + jnp.swapaxes(ref_half, -2, -3)
    ref_breaks = jnp.linspace(config["first_break"], config["last_break"],
                              config["num_bins"] - 1, dtype=jnp.float32)

    assert out["logits"].shape == (n_res, n_res, config["num_bins"])
    assert out["bin_edges"].shape == (config["num_bins"] - 1,)
    assert jnp.allclose(out["logits"], ref_logits, atol=5e-3, rtol=5e-3), (
        "max abs err = %f" % float(jnp.max(jnp.abs(out["logits"] - ref_logits))))
    assert jnp.allclose(out["bin_edges"], ref_breaks)

    print("KERNEL_OK")
</pallas_src>

<mosaic_0001>
module attributes {stable_mosaic.version = 11 : i64} {
  func.func @_fused_distogram_kernel(%arg0: i32, %arg1: i32, %arg2: memref<8x64x128xf32, #tpu.memory_space<vmem>>, %arg3: memref<64x8x128xf32, #tpu.memory_space<vmem>>, %arg4: memref<128x64xf32, #tpu.memory_space<vmem>>, %arg5: memref<1x64xf32, #tpu.memory_space<vmem>>, %arg6: memref<8x64x64xf32, #tpu.memory_space<vmem>>) attributes {dimension_semantics = [#tpu.dimension_semantics<parallel>, #tpu.dimension_semantics<parallel>], iteration_bounds = array<i64: 8, 1>, scalar_prefetch = 0 : i64, scratch_operands = 0 : i64, tpu.core_type = #tpu.core_type<tc>, window_params = [{transform_indices = @transform_0, window_bounds = array<i64: 8, 64, 128>}, {transform_indices = @transform_1, window_bounds = array<i64: 64, 8, 128>}, {pipeline_mode = #tpu.pipeline_mode<synchronous>, transform_indices = @transform_2, window_bounds = array<i64: 128, 64>}, {pipeline_mode = #tpu.pipeline_mode<synchronous>, transform_indices = @transform_3, window_bounds = array<i64: 1, 64>}, {transform_indices = @transform_4, window_bounds = array<i64: 8, 64, 64>}]} {
    %c0 = arith.constant 0 : index
    %c0_0 = arith.constant 0 : index
    %0 = vector.load %arg4[%c0, %c0_0] : memref<128x64xf32, #tpu.memory_space<vmem>>, vector<128x64xf32>
    %c0_1 = arith.constant 0 : index
    %c0_2 = arith.constant 0 : index
    %1 = vector.load %arg5[%c0_1, %c0_2] : memref<1x64xf32, #tpu.memory_space<vmem>>, vector<1x64xf32>
    %c0_3 = arith.constant 0 : index
    %c0_4 = arith.constant 0 : index
    %c0_5 = arith.constant 0 : index
    %2 = vector.load %arg2[%c0_3, %c0_4, %c0_5] : memref<8x64x128xf32, #tpu.memory_space<vmem>>, vector<1x64x128xf32>
    %3 = vector.shape_cast %2 : vector<1x64x128xf32> to vector<64x128xf32>
    %c0_6 = arith.constant 0 : index
    %c0_7 = arith.constant 0 : index
    %c0_8 = arith.constant 0 : index
    %4 = vector.load %arg3[%c0_6, %c0_7, %c0_8] : memref<64x8x128xf32, #tpu.memory_space<vmem>>, vector<64x1x128xf32>
    %5 = vector.shape_cast %4 : vector<64x1x128xf32> to vector<64x128xf32>
    %6 = arith.addf %3, %5 : vector<64x128xf32>
    %cst = arith.constant dense<0.000000e+00> : vector<64x64xf32>
    %7 = tpu.matmul %6, %0, %cst {dimension_numbers = #tpu.dot_dimension_numbers<[1], [0], [0], [1], [0, 0, 1, 1], [], []>} : vector<64x128xf32>, vector<128x64xf32>, vector<64x64xf32> -> vector<64x64xf32>
    %8 = vector.broadcast %1 : vector<1x64xf32> to vector<64x64xf32>
    %9 = arith.addf %7, %8 : vector<64x64xf32>
    %c0_9 = arith.constant 0 : index
    %c0_10 = arith.constant 0 : index
    %c0_11 = arith.constant 0 : index
    %10 = vector.load %arg6[%c0_9, %c0_10, %c0_11] : memref<8x64x64xf32, #tpu.memory_space<vmem>>, vector<1x64x64xf32>
    %11 = vector.shape_cast %10 : vector<1x64x64xf32> to vector<64x64xf32>
    %12 = vector.shape_cast %9 : vector<64x64xf32> to vector<1x64x64xf32>
    tpu.vector_store %arg6[%c0_9, %c0_10, %c0_11], %12 {strides = array<i32>} : memref<8x64x64xf32, #tpu.memory_space<vmem>>, vector<1x64x64xf32>,
    %c1 = arith.constant 1 : index
    %c0_12 = arith.constant 0 : index
    %c0_13 = arith.constant 0 : index
    %13 = vector.load %arg2[%c1, %c0_12, %c0_13] : memref<8x64x128xf32, #tpu.memory_space<vmem>>, vector<1x64x128xf32>
    %14 = vector.shape_cast %13 : vector<1x64x128xf32> to vector<64x128xf32>
    %c0_14 = arith.constant 0 : index
    %c1_15 = arith.constant 1 : index
    %c0_16 = arith.constant 0 : index
    %15 = vector.load %arg3[%c0_14, %c1_15, %c0_16] : memref<64x8x128xf32, #tpu.memory_space<vmem>>, vector<64x1x128xf32>
    %16 = vector.shape_cast %15 : vector<64x1x128xf32> to vector<64x128xf32>
    %17 = arith.addf %14, %16 : vector<64x128xf32>
    %cst_17 = arith.constant dense<0.000000e+00> : vector<64x64xf32>
    %18 = tpu.matmul %17, %0, %cst_17 {dimension_numbers = #tpu.dot_dimension_numbers<[1], [0], [0], [1], [0, 0, 1, 1], [], []>} : vector<64x128xf32>, vector<128x64xf32>, vector<64x64xf32> -> vector<64x64xf32>
    %19 = vector.broadcast %1 : vector<1x64xf32> to vector<64x64xf32>
    %20 = arith.addf %18, %19 : vector<64x64xf32>
    %c1_18 = arith.constant 1 : index
    %c0_19 = arith.constant 0 : index
    %c0_20 = arith.constant 0 : index
    %21 = vector.load %arg6[%c1_18, %c0_19, %c0_20] : memref<8x64x64xf32, #tpu.memory_space<vmem>>, vector<1x64x64xf32>
    %22 = vector.shape_cast %21 : vector<1x64x64xf32> to vector<64x64xf32>
    %23 = vector.shape_cast %20 : vector<64x64xf32> to vector<1x64x64xf32>
    tpu.vector_store %arg6[%c1_18, %c0_19, %c0_20], %23 {strides = array<i32>} : memref<8x64x64xf32, #tpu.memory_space<vmem>>, vector<1x64x64xf32>,
    %c2 = arith.constant 2 : index
    %c0_21 = arith.constant 0 : index
    %c0_22 = arith.constant 0 : index
    %24 = vector.load %arg2[%c2, %c0_21, %c0_22] : memref<8x64x128xf32, #tpu.memory_space<vmem>>, vector<1x64x128xf32>
    %25 = vector.shape_cast %24 : vector<1x64x128xf32> to vector<64x128xf32>
    %c0_23 = arith.constant 0 : index
    %c2_24 = arith.constant 2 : index
    %c0_25 = arith.constant 0 : index
    %26 = vector.load %arg3[%c0_23, %c2_24, %c0_25] : memref<64x8x128xf32, #tpu.memory_space<vmem>>, vector<64x1x128xf32>
    %27 = vector.shape_cast %26 : vector<64x1x128xf32> to vector<64x128xf32>
    %28 = arith.addf %25, %27 : vector<64x128xf32>
    %cst_26 = arith.constant dense<0.000000e+00> : vector<64x64xf32>
    %29 = tpu.matmul %28, %0, %cst_26 {dimension_numbers = #tpu.dot_dimension_numbers<[1], [0], [0], [1], [0, 0, 1, 1], [], []>} : vector<64x128xf32>, vector<128x64xf32>, vector<64x64xf32> -> vector<64x64xf32>
    %30 = vector.broadcast %1 : vector<1x64xf32> to vector<64x64xf32>
    %31 = arith.addf %29, %30 : vector<64x64xf32>
    %c2_27 = arith.constant 2 : index
    %c0_28 = arith.constant 0 : index
    %c0_29 = arith.constant 0 : index
    %32 = vector.load %arg6[%c2_27, %c0_28, %c0_29] : memref<8x64x64xf32, #tpu.memory_space<vmem>>, vector<1x64x64xf32>
    %33 = vector.shape_cast %32 : vector<1x64x64xf32> to vector<64x64xf32>
    %34 = vector.shape_cast %31 : vector<64x64xf32> to vector<1x64x64xf32>
    tpu.vector_store %arg6[%c2_27, %c0_28, %c0_29], %34 {strides = array<i32>} : memref<8x64x64xf32, #tpu.memory_space<vmem>>, vector<1x64x64xf32>,
    %c3 = arith.constant 3 : index
    %c0_30 = arith.constant 0 : index
    %c0_31 = arith.constant 0 : index
    %35 = vector.load %arg2[%c3, %c0_30, %c0_31] : memref<8x64x128xf32, #tpu.memory_space<vmem>>, vector<1x64x128xf32>
    %36 = vector.shape_cast %35 : vector<1x64x128xf32> to vector<64x128xf32>
    %c0_32 = arith.constant 0 : index
    %c3_33 = arith.constant 3 : index
    %c0_34 = arith.constant 0 : index
    %37 = vector.load %arg3[%c0_32, %c3_33, %c0_34] : memref<64x8x128xf32, #tpu.memory_space<vmem>>, vector<64x1x128xf32>
    %38 = vector.shape_cast %37 : vector<64x1x128xf32> to vector<64x128xf32>
    %39 = arith.addf %36, %38 : vector<64x128xf32>
    %cst_35 = arith.constant dense<0.000000e+00> : vector<64x64xf32>
    %40 = tpu.matmul %39, %0, %cst_35 {dimension_numbers = #tpu.dot_dimension_numbers<[1], [0], [0], [1], [0, 0, 1, 1], [], []>} : vector<64x128xf32>, vector<128x64xf32>, vector<64x64xf32> -> vector<64x64xf32>
    %41 = vector.broadcast %1 : vector<1x64xf32> to vector<64x64xf32>
    %42 = arith.addf %40, %41 : vector<64x64xf32>
    %c3_36 = arith.constant 3 : index
    %c0_37 = arith.constant 0 : index
    %c0_38 = arith.constant 0 : index
    %43 = vector.load %arg6[%c3_36, %c0_37, %c0_38] : memref<8x64x64xf32, #tpu.memory_space<vmem>>, vector<1x64x64xf32>
    %44 = vector.shape_cast %43 : vector<1x64x64xf32> to vector<64x64xf32>
    %45 = vector.shape_cast %42 : vector<64x64xf32> to vector<1x64x64xf32>
    tpu.vector_store %arg6[%c3_36, %c0_37, %c0_38], %45 {strides = array<i32>} : memref<8x64x64xf32, #tpu.memory_space<vmem>>, vector<1x64x64xf32>,
    %c4 = arith.constant 4 : index
    %c0_39 = arith.constant 0 : index
    %c0_40 = arith.constant 0 : index
    %46 = vector.load %arg2[%c4, %c0_39, %c0_40] : memref<8x64x128xf32, #tpu.memory_space<vmem>>, vector<1x64x128xf32>
    %47 = vector.shape_cast %46 : vector<1x64x128xf32> to vector<64x128xf32>
    %c0_41 = arith.constant 0 : index
    %c4_42 = arith.constant 4 : index
    %c0_43 = arith.constant 0 : index
    %48 = vector.load %arg3[%c0_41, %c4_42, %c0_43] : memref<64x8x128xf32, #tpu.memory_space<vmem>>, vector<64x1x128xf32>
    %49 = vector.shape_cast %48 : vector<64x1x128xf32> to vector<64x128xf32>
    %50 = arith.addf %47, %49 : vector<64x128xf32>
    %cst_44 = arith.constant dense<0.000000e+00> : vector<64x64xf32>
    %51 = tpu.matmul %50, %0, %cst_44 {dimension_numbers = #tpu.dot_dimension_numbers<[1], [0], [0], [1], [0, 0, 1, 1], [], []>} : vector<64x128xf32>, vector<128x64xf32>, vector<64x64xf32> -> vector<64x64xf32>
    %52 = vector.broadcast %1 : vector<1x64xf32> to vector<64x64xf32>
    %53 = arith.addf %51, %52 : vector<64x64xf32>
    %c4_45 = arith.constant 4 : index
    %c0_46 = arith.constant 0 : index
    %c0_47 = arith.constant 0 : index
    %54 = vector.load %arg6[%c4_45, %c0_46, %c0_47] : memref<8x64x64xf32, #tpu.memory_space<vmem>>, vector<1x64x64xf32>
    %55 = vector.shape_cast %54 : vector<1x64x64xf32> to vector<64x64xf32>
    %56 = vector.shape_cast %53 : vector<64x64xf32> to vector<1x64x64xf32>
    tpu.vector_store %arg6[%c4_45, %c0_46, %c0_47], %56 {strides = array<i32>} : memref<8x64x64xf32, #tpu.memory_space<vmem>>, vector<1x64x64xf32>,
    %c5 = arith.constant 5 : index
    %c0_48 = arith.constant 0 : index
    %c0_49 = arith.constant 0 : index
    %57 = vector.load %arg2[%c5, %c0_48, %c0_49] : memref<8x64x128xf32, #tpu.memory_space<vmem>>, vector<1x64x128xf32>
    %58 = vector.shape_cast %57 : vector<1x64x128xf32> to vector<64x128xf32>
    %c0_50 = arith.constant 0 : index
    %c5_51 = arith.constant 5 : index
    %c0_52 = arith.constant 0 : index
    %59 = vector.load %arg3[%c0_50, %c5_51, %c0_52] : memref<64x8x128xf32, #tpu.memory_space<vmem>>, vector<64x1x128xf32>
    %60 = vector.shape_cast %59 : vector<64x1x128xf32> to vector<64x128xf32>
    %61 = arith.addf %58, %60 : vector<64x128xf32>
    %cst_53 = arith.constant dense<0.000000e+00> : vector<64x64xf32>
    %62 = tpu.matmul %61, %0, %cst_53 {dimension_numbers = #tpu.dot_dimension_numbers<[1], [0], [0], [1], [0, 0, 1, 1], [], []>} : vector<64x128xf32>, vector<128x64xf32>, vector<64x64xf32> -> vector<64x64xf32>
    %63 = vector.broadcast %1 : vector<1x64xf32> to vector<64x64xf32>
    %64 = arith.addf %62, %63 : vector<64x64xf32>
    %c5_54 = arith.constant 5 : index
    %c0_55 = arith.constant 0 : index
    %c0_56 = arith.constant 0 : index
    %65 = vector.load %arg6[%c5_54, %c0_55, %c0_56] : memref<8x64x64xf32, #tpu.memory_space<vmem>>, vector<1x64x64xf32>
    %66 = vector.shape_cast %65 : vector<1x64x64xf32> to vector<64x64xf32>
    %67 = vector.shape_cast %64 : vector<64x64xf32> to vector<1x64x64xf32>
    tpu.vector_store %arg6[%c5_54, %c0_55, %c0_56], %67 {strides = array<i32>} : memref<8x64x64xf32, #tpu.memory_space<vmem>>, vector<1x64x64xf32>,
    %c6 = arith.constant 6 : index
    %c0_57 = arith.constant 0 : index
    %c0_58 = arith.constant 0 : index
    %68 = vector.load %arg2[%c6, %c0_57, %c0_58] : memref<8x64x128xf32, #tpu.memory_space<vmem>>, vector<1x64x128xf32>
    %69 = vector.shape_cast %68 : vector<1x64x128xf32> to vector<64x128xf32>
    %c0_59 = arith.constant 0 : index
    %c6_60 = arith.constant 6 : index
    %c0_61 = arith.constant 0 : index
    %70 = vector.load %arg3[%c0_59, %c6_60, %c0_61] : memref<64x8x128xf32, #tpu.memory_space<vmem>>, vector<64x1x128xf32>
    %71 = vector.shape_cast %70 : vector<64x1x128xf32> to vector<64x128xf32>
    %72 = arith.addf %69, %71 : vector<64x128xf32>
    %cst_62 = arith.constant dense<0.000000e+00> : vector<64x64xf32>
    %73 = tpu.matmul %72, %0, %cst_62 {dimension_numbers = #tpu.dot_dimension_numbers<[1], [0], [0], [1], [0, 0, 1, 1], [], []>} : vector<64x128xf32>, vector<128x64xf32>, vector<64x64xf32> -> vector<64x64xf32>
    %74 = vector.broadcast %1 : vector<1x64xf32> to vector<64x64xf32>
    %75 = arith.addf %73, %74 : vector<64x64xf32>
    %c6_63 = arith.constant 6 : index
    %c0_64 = arith.constant 0 : index
    %c0_65 = arith.constant 0 : index
    %76 = vector.load %arg6[%c6_63, %c0_64, %c0_65] : memref<8x64x64xf32, #tpu.memory_space<vmem>>, vector<1x64x64xf32>
    %77 = vector.shape_cast %76 : vector<1x64x64xf32> to vector<64x64xf32>
    %78 = vector.shape_cast %75 : vector<64x64xf32> to vector<1x64x64xf32>
    tpu.vector_store %arg6[%c6_63, %c0_64, %c0_65], %78 {strides = array<i32>} : memref<8x64x64xf32, #tpu.memory_space<vmem>>, vector<1x64x64xf32>,
    %c7 = arith.constant 7 : index
    %c0_66 = arith.constant 0 : index
    %c0_67 = arith.constant 0 : index
    %79 = vector.load %arg2[%c7, %c0_66, %c0_67] : memref<8x64x128xf32, #tpu.memory_space<vmem>>, vector<1x64x128xf32>
    %80 = vector.shape_cast %79 : vector<1x64x128xf32> to vector<64x128xf32>
    %c0_68 = arith.constant 0 : index
    %c7_69 = arith.constant 7 : index
    %c0_70 = arith.constant 0 : index
    %81 = vector.load %arg3[%c0_68, %c7_69, %c0_70] : memref<64x8x128xf32, #tpu.memory_space<vmem>>, vector<64x1x128xf32>
    %82 = vector.shape_cast %81 : vector<64x1x128xf32> to vector<64x128xf32>
    %83 = arith.addf %80, %82 : vector<64x128xf32>
    %cst_71 = arith.constant dense<0.000000e+00> : vector<64x64xf32>
    %84 = tpu.matmul %83, %0, %cst_71 {dimension_numbers = #tpu.dot_dimension_numbers<[1], [0], [0], [1], [0, 0, 1, 1], [], []>} : vector<64x128xf32>, vector<128x64xf32>, vector<64x64xf32> -> vector<64x64xf32>
    %85 = vector.broadcast %1 : vector<1x64xf32> to vector<64x64xf32>
    %86 = arith.addf %84, %85 : vector<64x64xf32>
    %c7_72 = arith.constant 7 : index
    %c0_73 = arith.constant 0 : index
    %c0_74 = arith.constant 0 : index
    %87 = vector.load %arg6[%c7_72, %c0_73, %c0_74] : memref<8x64x64xf32, #tpu.memory_space<vmem>>, vector<1x64x64xf32>
    %88 = vector.shape_cast %87 : vector<1x64x64xf32> to vector<64x64xf32>
    %89 = vector.shape_cast %86 : vector<64x64xf32> to vector<1x64x64xf32>
    tpu.vector_store %arg6[%c7_72, %c0_73, %c0_74], %89 {strides = array<i32>} : memref<8x64x64xf32, #tpu.memory_space<vmem>>, vector<1x64x64xf32>,
    return
  }
  func.func @transform_0(%arg0: i32, %arg1: i32) -> (i32, i32, i32) {
    %c0_i32 = arith.constant 0 : i32
    %c0_i32_0 = arith.constant 0 : i32
    return %arg0, %arg1, %c0_i32 : i32, i32, i32
  }
  func.func @transform_1(%arg0: i32, %arg1: i32) -> (i32, i32, i32) {
    %c0_i32 = arith.constant 0 : i32
    %c0_i32_0 = arith.constant 0 : i32
    return %arg1, %arg0, %c0_i32 : i32, i32, i32
  }
  func.func @transform_2(%arg0: i32, %arg1: i32) -> (i32, i32) {
    %c0_i32 = arith.constant 0 : i32
    %c0_i32_0 = arith.constant 0 : i32
    %c0_i32_1 = arith.constant 0 : i32
    return %c0_i32, %c0_i32_0 : i32, i32
  }
  func.func @transform_3(%arg0: i32, %arg1: i32) -> (i32, i32) {
    %c0_i32 = arith.constant 0 : i32
    %c0_i32_0 = arith.constant 0 : i32
    %c0_i32_1 = arith.constant 0 : i32
    return %c0_i32, %c0_i32_0 : i32, i32
  }
  func.func @transform_4(%arg0: i32, %arg1: i32) -> (i32, i32, i32) {
    %c0_i32 = arith.constant 0 : i32
    %c0_i32_0 = arith.constant 0 : i32
    return %arg0, %arg1, %c0_i32 : i32, i32, i32
  }
}

module attributes {stable_mosaic.version = 11 : i64} {
  func.func @_half_logits_kernel(%arg0: i32, %arg1: memref<2048x128xf32, #tpu.memory_space<vmem>>, %arg2: memref<128x64xf32, #tpu.memory_space<vmem>>, %arg3: memref<1x64xf32, #tpu.memory_space<vmem>>, %arg4: memref<2048x64xf32, #tpu.memory_space<vmem>>) attributes {dimension_semantics = [#tpu.dimension_semantics<parallel>], iteration_bounds = array<i64: 2>, scalar_prefetch = 0 : i64, scratch_operands = 0 : i64, tpu.core_type = #tpu.core_type<tc>, window_params = [{transform_indices = @transform_0, window_bounds = array<i64: 2048, 128>}, {pipeline_mode = #tpu.pipeline_mode<synchronous>, transform_indices = @transform_1, window_bounds = array<i64: 128, 64>}, {pipeline_mode = #tpu.pipeline_mode<synchronous>, transform_indices = @transform_2, window_bounds = array<i64: 1, 64>}, {transform_indices = @transform_3, window_bounds = array<i64: 2048, 64>}]} {
    %c0 = arith.constant 0 : index
    %c0_0 = arith.constant 0 : index
    %0 = vector.load %arg1[%c0, %c0_0] : memref<2048x128xf32, #tpu.memory_space<vmem>>, vector<2048x128xf32>
    %c0_1 = arith.constant 0 : index
    %c0_2 = arith.constant 0 : index
    %1 = vector.load %arg2[%c0_1, %c0_2] : memref<128x64xf32, #tpu.memory_space<vmem>>, vector<128x64xf32>
    %cst = arith.constant dense<0.000000e+00> : vector<2048x64xf32>
    %2 = tpu.matmul %0, %1, %cst {dimension_numbers = #tpu.dot_dimension_numbers<[1], [0], [0], [1], [0, 0, 1, 1], [], []>} : vector<2048x128xf32>, vector<128x64xf32>, vector<2048x64xf32> -> vector<2048x64xf32>
    %c0_3 = arith.constant 0 : index
    %c0_4 = arith.constant 0 : index
    %3 = vector.load %arg3[%c0_3, %c0_4] : memref<1x64xf32, #tpu.memory_space<vmem>>, vector<1x64xf32>
    %4 = vector.broadcast %3 : vector<1x64xf32> to vector<2048x64xf32>
    %5 = arith.addf %2, %4 : vector<2048x64xf32>
    %c0_5 = arith.constant 0 : index
    %c0_6 = arith.constant 0 : index
    %6 = vector.load %arg4[%c0_5, %c0_6] : memref<2048x64xf32, #tpu.memory_space<vmem>>, vector<2048x64xf32>
    tpu.vector_store %arg4[%c0_5, %c0_6], %5 {strides = array<i32>} : memref<2048x64xf32, #tpu.memory_space<vmem>>, vector<2048x64xf32>,
    return
  }
  func.func @transform_0(%arg0: i32) -> (i32, i32) {
    %c0_i32 = arith.constant 0 : i32
    %c0_i32_0 = arith.constant 0 : i32
    return %arg0, %c0_i32 : i32, i32
  }
  func.func @transform_1(%arg0: i32) -> (i32, i32) {
    %c0_i32 = arith.constant 0 : i32
    %c0_i32_0 = arith.constant 0 : i32
    %c0_i32_1 = arith.constant 0 : i32
    return %c0_i32, %c0_i32_0 : i32, i32
  }
  func.func @transform_2(%arg0: i32) -> (i32, i32) {
    %c0_i32 = arith.constant 0 : i32
    %c0_i32_0 = arith.constant 0 : i32
    %c0_i32_1 = arith.constant 0 : i32
    return %c0_i32, %c0_i32_0 : i32, i32
  }
  func.func @transform_3(%arg0: i32) -> (i32, i32) {
    %c0_i32 = arith.constant 0 : i32
    %c0_i32_0 = arith.constant 0 : i32
    return %arg0, %c0_i32 : i32, i32
  }
}

</mosaic_0001>

<bundles_post_ra>
// kernel: _forward_fused.1
= control target key start
LH: loop header
LB: loop body
LE: loop exit
PB: predicated region body
PF: predicated region fallthrough
CT: control target
= control target key end

     0   :  { %s6340_s0 = inlined_call_operand.hbm [shape: f32[64,64,128], index: 0, kind: input, shape index: {}, may-alias: {0,1}]   ;;  %s6341_s1 = inlined_call_operand.hbm [shape: f32[64,64,128], index: 1, kind: input, shape index: {}, may-alias: {0,1}]   ;;  %s6342_s2 = inlined_call_operand.vmem [shape: f32[128,64], index: 2, kind: input, shape index: {}]   ;;  %s6343_s3 = inlined_call_operand.vmem [shape: f32[1,64], index: 3, kind: input, shape index: {}]   ;;  %s6344_s4 = inlined_call_operand.hbm [shape: f32[64,64,64], index: 4, kind: output, shape index: {}]  }
   0x1   :  { %6346 = sst [smem:[#allocation12_spill]] %s6340_s0 }
   0x2   :  { %9 = vsyncpa [#allocation3], 0 }
   0x3   :  { %11 = vsyncpa [#allocation3 + $0x1], 0 }
   0x4   :  { %12 = vsyncpa [#allocation6], 0 }
   0x5   :  { %14 = vsyncpa [#allocation6 + $0x1], 0 }
   0x6   :  { %15 = vsyncpa [#allocation4], 0 }
   0x7   :  { %17 = vsyncpa [#allocation4 + $0x1], 0  ;;  %s4419_s15 = smov 0   ;;  %s4421_s16 = smov 0  }
   0x8   :  { %s4423_s17 = smov 0   ;;  %s4425_s18 = smov 0  }
   0x9   :  { %s4427_s19 = smov 0   ;;  %s4429_s20 = smov 0  }
   0xa LB: > { %s3474_s21 = sadd.s32 4294967295, %s4384_s20   ;;  %s3475_s22 = sadd.s32 4294967294, %s4384_s20   ;;  %s4384_s20 = sphi %s4429_s20, %s23_s20   ;;  %s4380_s19 = sphi %s4427_s19, %s6360_s19   ;;  %s4376_s18 = sphi %s4425_s18, %s6359_s18   ;;  %s4372_s17 = sphi %s4423_s17, %s6358_s17   ;;  %s4368_s16 = sphi %s4421_s16, %s6357_s16   ;;  %s4364_s15 = sphi %s4419_s15, %s6356_s15  }
   0xb   : > { %s35_s23 = sadd.s32 1, %s4380_s19  ;;  %s44_s24 = sadd.s32 1, %s4372_s17 }
   0xc   : > { %p37_p0 = scmp.ge.s32.totalorder %s35_s23, 8  ;;  %p51_p1 = scmp.ne.s32.totalorder %s4372_s17, %s4368_s16 }
   0xd   : > { %p52_p2 = scmp.eq.s32.totalorder %s4384_s20, 0  ;;  %p57_p3 = scmp.ne.s32.totalorder %s4368_s16, %s4364_s15 }
   0xe   : > { %s6362_s23 = smov (%p37_p0, %s35_s23), 0  ;;  %p58_p5 = scmp.eq.s32.totalorder %s3474_s21, 0 }
   0xf   : > { %6347 = sst [smem:[#allocation11_spill]] %s6362_s23  ;;  %p4460_p4 = por %p52_p2, %p51_p1 }
  0x10   : > { %s39_s26 = ssub.s32 %s4380_s19, %s6362_s23  ;;  %p153_p6 = scmp.eq.s32.totalorder %s3474_s21, 7 }
  0x11   : > { %p42_p7 = scmp.eq.s32.totalorder %s39_s26, 0  ;;  %p4466_p8 = por %p58_p5, %p57_p3 }
  0x12   : > { %p4470_p9 = por %p153_p6, %p51_p1  ;;  %p159_p10 = scmp.eq.s32.totalorder %s3475_s22, 7 }
  0x13   : > { %s4475_s29 = scalar_select %p42_p7, %s4372_s17, %s44_s24  }
  0x14   : > { %p4477_p11 = por %p159_p10, %p57_p3  ;;  %p4172_p12 = scmp.lt.s32.totalorder %s4384_s20, 8 }
  0x15   : > { %s4483_s5 = sand.u32 1, %s4372_s17   ;;  %s3608_s7 = sshll.u32 %s4380_s19, 13 }
  0x16   : > { %s3478_s6 = sshll.u32 %s4483_s5, 9  ;;  %s6352_s0 = sld [smem:[#allocation12_spill]] }
  0x17   : > { %s189_s11 = scalar_lea.vmem [#allocation2], %s3478_s6  ;;  %p4494_p13 = pnand %p4172_p12, %p4460_p4 }
  0x18   : > { %s199_s12 = sshll.u32 %s189_s11, 4  ;;  %s186_s14 = scalar_lea.sflag [#allocation3], %s4483_s5  ;;  %s200_s12 = int_to_ptr.vmem [resolvable:$true] %s199_s12 }
  0x19   : > { %p4246_p0 = pneg %p4494_p13  ;;  %s4257_s21 = scalar_lea.vmem %s200_s12, 8192 }
  0x1a   : > { %p4258_p1 = scmp.ne.s32.totalorder %s200_s12, %s4257_s21  ;;  %s4386_s22 = smov [#allocation2]  }
  0x1b   : > { %s4262_s24 = sshll.u32 %s4386_s22, 4  ;;  %s4263_s24 = int_to_ptr.vmem [resolvable:$false] %s4262_s24 }
  0x1c   : > { %s198_s10 = scalar_lea.hbm %s6352_s0, %s3608_s7  ;;  %p4260_p2 = pnand %p4258_p1, %p4246_p0 }
  0x1d   : > { %s4264_s26 = scalar_lea.vmem %s4263_s24, 16384  ;;  %p4265_p5 = scmp.lt.s32.totalorder %s200_s12, %s4263_s24 }
  0x1e   : > { %p4261_p3 = pneg %p4260_p2  ;;  %p4266_p4 = scmp.lt.s32.totalorder %s4264_s26, %s4257_s21 }
  0x20   : > { %p4267_p6 = por %p4266_p4, %p4265_p5 }
  0x22   : > { %p4268_p7 = pnand %p4267_p6, %p4261_p3 }
  0x24   : > { %4271 = shalt.err (!%p4268_p7)
}
  0x25   : > { %s4387_s25 = smov 128   ;;  %s4388_s7 = smov 8  }
  0x26   : > { %4164 = dma.hbm_to_vmem [thread:$0]  (!%p4494_p13), %s198_s10, 8192, %s200_s12, %s186_s14, %s4387_s25, %s4387_s25, %s4388_s7  }
  0x27   : > { %s213_s8 = scalar_lea.vmem [#allocation5], %s3478_s6  ;;  %p3484_p10 = scmp.ge.s32.totalorder %s4384_s20, 1 }
  0x28   : > { %s222_s9 = sshll.u32 %s213_s8, 4  ;;  %p230_p12 = scmp.lt.s32.totalorder %s4384_s20, 9  ;;  %s223_s9 = int_to_ptr.vmem [resolvable:$true] %s222_s9 }
  0x29   : > { %s3483_s11 = sshll.u32 %s4380_s19, 7  ;;  %s210_s0 = scalar_lea.sflag [#allocation6], %s4483_s5 }
  0x2a   : > { %p4514_p1 = pnand %p3484_p10, %p230_p12  ;;  %s221_s26 = scalar_lea.hbm %s6341_s1, %s3483_s11 }
  0x2b   : > { %s4285_s23 = scalar_lea.vmem %s223_s9, 8192  ;;  %s4389_s6 = smov [#allocation5]  }
  0x2c   : > { %p4286_p2 = scmp.ne.s32.totalorder %s223_s9, %s4285_s23  ;;  %s4290_s10 = sshll.u32 %s4389_s6, 4  ;;  %s4291_s10 = int_to_ptr.vmem [resolvable:$false] %s4290_s10 }
  0x2d   : > { %s4292_s12 = scalar_lea.vmem %s4291_s10, 16384  ;;  %p4293_p4 = scmp.lt.s32.totalorder %s223_s9, %s4291_s10 }
  0x2e   : > { %p4288_p3 = pnand %p4286_p2, %p4246_p0  ;;  %p4294_p6 = scmp.lt.s32.totalorder %s4292_s12, %s4285_s23 }
  0x30   : > { %p4289_p5 = pneg %p4288_p3  ;;  %p4295_p7 = por %p4294_p6, %p4293_p4 }
  0x32   : > { %p4296_p10 = pnand %p4295_p7, %p4289_p5 }
  0x34   : > { %4299 = shalt.err (!%p4296_p10)
}
  0x35   : > { %s4390_s14 = smov 1024   ;;  %234 = sbr.rel (%p4514_p1) target bundleno = 545 (0x221), region = 36 }
  0x36   : > { %4167 = dma.hbm_to_vmem [thread:$0]  (!%p4494_p13), %s221_s26, 8192, %s223_s9, %s210_s0, %s4390_s14, %s4387_s25, %s4388_s7  }
  0x37   : > { %s4532_s5 = sand.u32 (!%p4514_p1), 1, %s4368_s16  }
  0x38   : > { %s4535_s8 = sshll.u32 (!%p4514_p1), %s4532_s5, 9  ;;  %s237_s23 = scalar_lea.sflag (!%p4514_p1), [#allocation3], %s4532_s5 }
  0x39   : > { %s4539_s11 = scalar_lea.vmem (!%p4514_p1), [#allocation2], %s4535_s8 }
  0x3a   : > { %4351 = dma.done.wait (%p4466_p8), %s237_s23, 8192  }
  0x3b   : > { %4353 = vsyncadd (%p4466_p8), %s237_s23, 4294959104  ;;  %s246_s0 = scalar_lea.sflag [#allocation6], %s4532_s5  ;;  %s4547_s13 = scalar_lea.vmem [#allocation5], %s4535_s8 }
  0x3c   : > { %4355 = dma.done.wait (%p4466_p8), %s246_s0, 8192  }
  0x3d   : > { %4357 = vsyncadd (%p4466_p8), %s246_s0, 4294959104  ;;  %v4556_v0 = vld [vmem:[%s6342_s2 + $0x78] sm:$0xff]  ;;  %v4561_v1 = vld [vmem:[%s6342_s2 + $0x70] sm:$0xff]  ;;  %vm438_vm0 = vcmask 1041409   ;;  %vm441_vm1 = vcmask 1042434   ;;  %vm444_vm2 = vcmask 1043459  }
  0x3e   : > { %3803 = vmatprep.subr.mxu0 %v4556_v0  ;;  %3847 = vmatprep.subr.mxu1 %v4556_v0  ;;  %v4570_v2 = vld [vmem:[%s6342_s2 + $0x68] sm:$0xff]  ;;  %v4579_v3 = vld [vmem:[%s6342_s2 + $0x60] sm:$0xff]  ;;  %v4586_v4 = vld [vmem:[%s6342_s2 + $0x58] sm:$0xff]  ;;  %vm447_vm3 = vcmask 1044484   ;;  %vm450_vm4 = vcmask 1045509   ;;  %vm453_vm5 = vcmask 1046534  }
  0x3f   : > { %3804 = vmatpush3.msra.mxu0 %v4556_v0  ;;  %3848 = vmatpush3.msra.mxu1 %v4556_v0  ;;  %v309_v5 = vld [vmem:[%s4547_s13] sm:$0x1]  ;;  %v310_v6 = vld [vmem:[%s4547_s13 + $0x8] sm:$0x1]  ;;  %v311_v7 = vld [vmem:[%s4547_s13 + $0x10] sm:$0x1] }
  0x40   : > { %3805 = vmatprep.subr.mxu0 %v4561_v1  ;;  %3849 = vmatprep.subr.mxu1 %v4561_v1  ;;  %v312_v8 = vld [vmem:[%s4547_s13 + $0x18] sm:$0x1]  ;;  %v313_v9 = vld [vmem:[%s4547_s13 + $0x20] sm:$0x1]  ;;  %v314_v10 = vld [vmem:[%s4547_s13 + $0x28] sm:$0x1] }
  0x41   : > { %3806 = vmatpush3.msra.mxu0 %v4561_v1  ;;  %3850 = vmatpush3.msra.mxu1 %v4561_v1  ;;  %v4599_v11 = vld [vmem:[%s4547_s13 + $0x30] sm:$0x1]  ;;  %v4609_v13 = vld [vmem:[%s4547_s13 + $0x38] sm:$0x1]  ;;  %v437_v14 = vrot.slane %v310_v6, 7  ;;  %v440_v15 = vrot.slane %v311_v7, 6 }
  0x42   : > { %3807 = vmatprep.subr.mxu0 %v4570_v2  ;;  %3851 = vmatprep.subr.mxu1 %v4570_v2  ;;  %v4606_v12 = vld [vmem:[%s6342_s2 + $0x50] sm:$0xff]  ;;  %v443_v16 = vrot.slane %v312_v8, 5  ;;  %v4616_v17 = vld [vmem:[%s6342_s2 + $0x48] sm:$0xff]  ;;  %v446_v18 = vrot.slane %v313_v9, 4  ;;  %v449_v19 = vrot.slane %v314_v10, 3  ;;  %v452_v20 = vrot.slane %v4599_v11, 2 }
  0x43   : > { %3808 = vmatpush3.msra.mxu0 %v4570_v2  ;;  %3852 = vmatpush3.msra.mxu1 %v4570_v2  ;;  %vm456_vm6 = vcmask 1047559   ;;  %v701_v21 = vld [vmem:[%s4547_s13 + $0x1] sm:$0x1]  ;;  %v439_v22 = vsel %vm438_vm0, %v437_v14, %v309_v5  ;;  %v702_v23 = vld [vmem:[%s4547_s13 + $0x9] sm:$0x1]  ;;  %v4648_v36 = vld [vmem:[%s6342_s2 + $0x38] sm:$0xff] }
  0x44   : > { %3809 = vmatprep.subr.mxu0 %v4579_v3  ;;  %3853 = vmatprep.subr.mxu1 %v4579_v3  ;;  %v703_v24 = vld [vmem:[%s4547_s13 + $0x11] sm:$0x1]  ;;  %v704_v25 = vld [vmem:[%s4547_s13 + $0x19] sm:$0x1]  ;;  %v442_v26 = vsel %vm441_vm1, %v440_v15, %v439_v22  ;;  %v705_v27 = vld [vmem:[%s4547_s13 + $0x21] sm:$0x1] }
  0x45   : > { %3810 = vmatpush3.msra.mxu0 %v4579_v3  ;;  %3854 = vmatpush3.msra.mxu1 %v4579_v3  ;;  %v706_v28 = vld [vmem:[%s4547_s13 + $0x29] sm:$0x1]  ;;  %v707_v29 = vld [vmem:[%s4547_s13 + $0x31] sm:$0x1]  ;;  %v4637_v30 = vld [vmem:[%s6342_s2 + $0x40] sm:$0xff]  ;;  %v445_v31 = vsel %vm444_vm2, %v443_v16, %v442_v26  ;;  %v829_v33 = vrot.slane %v702_v23, 7 }
  0x46   : > { %3811 = vmatprep.subr.mxu0 %v4586_v4  ;;  %3855 = vmatprep.subr.mxu1 %v4586_v4  ;;  %v4641_v32 = vld [vmem:[%s4547_s13 + $0x39] sm:$0x1]  ;;  %v831_v34 = vrot.slane %v703_v24, 6  ;;  %v833_v35 = vrot.slane %v704_v25, 5  ;;  %v448_v37 = vsel %vm447_vm3, %v446_v18, %v445_v31  ;;  %v455_v38 = vrot.slane %v4609_v13, 1  ;;  %v4658_v42 = vld [vmem:[%s6342_s2 + $0x30] sm:$0xff] }
  0x47   : > { %3812 = vmatpush3.msra.mxu0 %v4586_v4  ;;  %3856 = vmatpush3.msra.mxu1 %v4586_v4  ;;  %v835_v39 = vrot.slane %v705_v27, 4  ;;  %v837_v40 = vrot.slane %v706_v28, 3  ;;  %v317_v41 = vld [vmem:[%s4547_s13 + $0x40] sm:$0x1]  ;;  %v451_v43 = vsel %vm450_vm4, %v449_v19, %v448_v37  ;;  %v830_v44 = vsel %vm438_vm0, %v829_v33, %v701_v21  ;;  %v318_v47 = vld [vmem:[%s4547_s13 + $0x48] sm:$0x1] }
  0x48   : > { %3813 = vmatprep.subr.mxu0 %v4606_v12  ;;  %3857 = vmatprep.subr.mxu1 %v4606_v12  ;;  %v839_v45 = vrot.slane %v707_v29, 2  ;;  %v841_v46 = vrot.slane %v4641_v32, 1  ;;  %v319_v48 = vld [vmem:[%s4547_s13 + $0x50] sm:$0x1]  ;;  %v832_v49 = vsel %vm441_vm1, %v831_v34, %v830_v44  ;;  %v320_v50 = vld [vmem:[%s4547_s13 + $0x58] sm:$0x1]  ;;  %v454_v59 = vsel %vm453_vm5, %v452_v20, %v451_v43 }
  0x49   : > { %3814 = vmatpush3.msra.mxu0 %v4606_v12  ;;  %3858 = vmatpush3.msra.mxu1 %v4606_v12  ;;  %v321_v51 = vld [vmem:[%s4547_s13 + $0x60] sm:$0x1]  ;;  %v322_v52 = vld [vmem:[%s4547_s13 + $0x68] sm:$0x1]  ;;  %v834_v54 = vsel %vm444_vm2, %v833_v35, %v832_v49  ;;  %v323_v55 = vld [vmem:[%s4547_s13 + $0x70] sm:$0x1]  ;;  %v457_v23 = vsel %vm456_vm6, %v455_v38, %v454_v59 }
  0x4a   : > { %3815 = vmatprep.subr.mxu0 %v4616_v17  ;;  %3859 = vmatprep.subr.mxu1 %v4616_v17  ;;  %v4676_v53 = vld [vmem:[%s6342_s2 + $0x28] sm:$0xff]  ;;  %v4681_v56 = vld [vmem:[%s4547_s13 + $0x78] sm:$0x1]  ;;  %v458_v57 = vrot.slane %v318_v47, 7  ;;  %v460_v58 = vrot.slane %v319_v48, 6  ;;  %v836_v60 = vsel %vm447_vm3, %v835_v39, %v834_v54  ;;  %v462_v61 = vrot.slane %v320_v50, 5 }
  0x4b   : > { %3816 = vmatpush3.msra.mxu0 %v4616_v17  ;;  %3860 = vmatpush3.msra.mxu1 %v4616_v17  ;;  %v464_v62 = vrot.slane %v321_v51, 4  ;;  %v709_v63 = vld [vmem:[%s4547_s13 + $0x41] sm:$0x1]  ;;  %v710_v5 = vld [vmem:[%s4547_s13 + $0x49] sm:$0x1]  ;;  %v838_v7 = vsel %vm450_vm4, %v837_v40, %v836_v60  ;;  %v466_v9 = vrot.slane %v322_v52, 3 }
  0x4c   : > { %3817 = vmatprep.subr.mxu0 %v4637_v30  ;;  %3861 = vmatprep.subr.mxu1 %v4637_v30  ;;  %v4694_v6 = vld [vmem:[%s6342_s2 + $0x20] sm:$0xff]  ;;  %v459_v8 = vsel %vm438_vm0, %v458_v57, %v317_v41  ;;  %v468_v10 = vrot.slane %v323_v55, 2  ;;  %v711_v11 = vld [vmem:[%s4547_s13 + $0x51] sm:$0x1]  ;;  %v712_v13 = vld [vmem:[%s4547_s13 + $0x59] sm:$0x1]  ;;  %v840_v15 = vsel %vm453_vm5, %v839_v45, %v838_v7 }
  0x4d   : > { %3818 = vmatpush3.msra.mxu0 %v4637_v30  ;;  %3862 = vmatpush3.msra.mxu1 %v4637_v30  ;;  %v301_v14 = vld [vmem:[%s4539_s11] sm:$0xff]  ;;  %v461_v16 = vsel %vm441_vm1, %v460_v58, %v459_v8  ;;  %v470_v18 = vrot.slane %v4681_v56, 1  ;;  %v714_v20 = vld [vmem:[%s4547_s13 + $0x69] sm:$0x1]  ;;  %v843_v21 = vrot.slane %v710_v5, 7  ;;  %v4713_v22 = vld [vmem:[%s6342_s2 + $0x18] sm:$0xff]  ;;  %v842_v31 = vsel %vm456_vm6, %v841_v46, %v840_v15 }
  0x4e   : > { %3819 = vmatprep.subr.mxu0 %v4648_v36  ;;  %3863 = vmatprep.subr.mxu1 %v4648_v36  ;;  %v713_v19 = vld [vmem:[%s4547_s13 + $0x61] sm:$0x1]  ;;  %v463_v24 = vsel %vm444_vm2, %v462_v61, %v461_v16  ;;  %v715_v25 = vld [vmem:[%s4547_s13 + $0x71] sm:$0x1]  ;;  %v716_v26 = vld [vmem:[%s4547_s13 + $0x79] sm:$0x1]  ;;  %v4751_v54 = vadd.f32 %v457_v23, %v301_v14 }
  0x4f   : > { %3820 = vmatpush3.msra.mxu0 %v4648_v36  ;;  %3864 = vmatpush3.msra.mxu1 %v4648_v36  ;;  %v845_v27 = vrot.slane %v711_v11, 6  ;;  %v847_v28 = vrot.slane %v712_v13, 5  ;;  %v3489_v29 = vld [vmem:[%s4539_s11 + $0x40] sm:$0xff]  ;;  %v465_v32 = vsel %vm447_vm3, %v464_v62, %v463_v24  ;;  %v844_v33 = vsel %vm438_vm0, %v843_v21, %v709_v63  ;;  %v326_v37 = vld [vmem:[%s4547_s13 + $0x88] sm:$0x1]  ;;  %v4744_v51 = vld [vmem:[%s6342_s2 + $0x10] sm:$0xff] }
  0x50   : > { %3821 = vmatprep.subr.mxu0 %v4658_v42  ;;  %3865 = vmatprep.subr.mxu1 %v4658_v42  ;;  %v849_v34 = vrot.slane %v713_v19, 4  ;;  %v325_v35 = vld [vmem:[%s4547_s13 + $0x80] sm:$0x1]  ;;  %v467_v38 = vsel %vm450_vm4, %v466_v9, %v465_v32  ;;  %v851_v40 = vrot.slane %v714_v20, 3  ;;  %v853_v41 = vrot.slane %v715_v25, 2  ;;  %v4749_v52 = vld [vmem:[%s6342_s2 + $0x8] sm:$0xff] }
  0x51   : > { %3822 = vmatpush3.msra.mxu0 %v4658_v42  ;;  %3866 = vmatpush3.msra.mxu1 %v4658_v42  ;;  %v846_v39 = vsel %vm441_vm1, %v845_v27, %v844_v33  ;;  %v327_v43 = vld [vmem:[%s4547_s13 + $0x90] sm:$0x1]  ;;  %v328_v44 = vld [vmem:[%s4547_s13 + $0x98] sm:$0x1]  ;;  %v469_v45 = vsel %vm453_vm5, %v468_v10, %v467_v38  ;;  %v855_v47 = vrot.slane %v716_v26, 1  ;;  %v472_v50 = vrot.slane %v326_v37, 7 }
  0x52   : > { %3823 = vmatprep.subr.mxu0 %v4676_v53  ;;  %3867 = vmatprep.subr.mxu1 %v4676_v53  ;;  %v848_v46 = vsel %vm444_vm2, %v847_v28, %v846_v39  ;;  %v329_v48 = vld [vmem:[%s4547_s13 + $0xa0] sm:$0x1]  ;;  %v330_v49 = vld [vmem:[%s4547_s13 + $0xa8] sm:$0x1]  ;;  %v331_v56 = vld [vmem:[%s4547_s13 + $0xb0] sm:$0x1]  ;;  %v471_v60 = vsel %vm456_vm6, %v470_v18, %v469_v45  ;;  %v949_v10 = vadd.f32 %v3489_v29, %v842_v31 }
  0x53   : > { %3824 = vmatpush3.msra.mxu0 %v4676_v53  ;;  %3868 = vmatpush3.msra.mxu1 %v4676_v53  ;;  %v850_v55 = vsel %vm447_vm3, %v849_v34, %v848_v46  ;;  %v474_v57 = vrot.slane %v327_v43, 6  ;;  %v476_v58 = vrot.slane %v328_v44, 5  ;;  %v302_v59 = vld [vmem:[%s4539_s11 + $0x8] sm:$0xff]  ;;  %v4761_v62 = vld [vmem:[%s4547_s13 + $0xb8] sm:$0x1]  ;;  %v473_v63 = vsel %vm438_vm0, %v472_v50, %v325_v35  ;;  %v4771_v9 = vld [vmem:[%s6342_s2] sm:$0xff] }
  0x54   : > { %3825 = vmatprep.subr.mxu0 %v4694_v6  ;;  %3869 = vmatprep.subr.mxu1 %v4694_v6  ;;  %v852_v61 = vsel %vm450_vm4, %v851_v40, %v850_v55  ;;  %v478_v5 = vrot.slane %v329_v48, 4  ;;  %v717_v7 = vld [vmem:[%s4547_s13 + $0x81] sm:$0x1]  ;;  %v718_v8 = vld [vmem:[%s4547_s13 + $0x89] sm:$0x1]  ;;  %v480_v15 = vrot.slane %v330_v49, 3  ;;  %v565_v26 = vadd.f32 %v471_v60, %v302_v59 }
  0x55   : > { %3826 = vmatpush3.msra.mxu0 %v4694_v6  ;;  %3870 = vmatpush3.msra.mxu1 %v4694_v6  ;;  %v3490_v11 = vld [vmem:[%s4539_s11 + $0x48] sm:$0xff]  ;;  %v854_v13 = vsel %vm453_vm5, %v853_v41, %v852_v61  ;;  %v475_v14 = vsel %vm441_vm1, %v474_v57, %v473_v63  ;;  %v719_v16 = vld [vmem:[%s4547_s13 + $0x91] sm:$0x1]  ;;  %v720_v18 = vld [vmem:[%s4547_s13 + $0x99] sm:$0x1]  ;;  %v482_v21 = vrot.slane %v331_v56, 2 }
  0x56   : > { %3827 = vmatprep.subr.mxu0 %v4713_v22  ;;  %3871 = vmatprep.subr.mxu1 %v4713_v22  ;;  %v856_v19 = vsel %vm456_vm6, %v855_v47, %v854_v13  ;;  %v477_v20 = vsel %vm444_vm2, %v476_v58, %v475_v14  ;;  %v721_v23 = vld [vmem:[%s4547_s13 + $0xa1] sm:$0x1]  ;;  %v722_v24 = vld [vmem:[%s4547_s13 + $0xa9] sm:$0x1]  ;;  %v857_v25 = vrot.slane %v718_v8, 7  ;;  %v859_v31 = vrot.slane %v719_v16, 6 }
  0x57   : > { %3828 = vmatpush3.msra.mxu0 %v4713_v22  ;;  %3872 = vmatpush3.msra.mxu1 %v4713_v22  ;;  %v479_v27 = vsel %vm447_vm3, %v478_v5, %v477_v20  ;;  %v723_v28 = vld [vmem:[%s4547_s13 + $0xb1] sm:$0x1]  ;;  %v724_v29 = vld [vmem:[%s4547_s13 + $0xb9] sm:$0x1]  ;;  %v861_v32 = vrot.slane %v720_v18, 5  ;;  %v863_v35 = vrot.slane %v721_v23, 4  ;;  %v950_v40 = vadd.f32 %v3490_v11, %v856_v19 }
  0x58   : > { %3829 = vmatprep.subr.mxu0 %v4744_v51  ;;  %3873 = vmatprep.subr.mxu1 %v4744_v51  ;;  %v481_v33 = vsel %vm450_vm4, %v480_v15, %v479_v27  ;;  %v858_v34 = vsel %vm438_vm0, %v857_v25, %v717_v7  ;;  %v865_v37 = vrot.slane %v722_v24, 3  ;;  %v333_v38 = vld [vmem:[%s4547_s13 + $0xc0] sm:$0x1]  ;;  %v334_v39 = vld [vmem:[%s4547_s13 + $0xc8] sm:$0x1]  ;;  %v484_v41 = vrot.slane %v4761_v62, 1 }
  0x59   : > { %3830 = vmatpush3.msra.mxu0 %v4744_v51  ;;  %3874 = vmatpush3.msra.mxu1 %v4744_v51  ;;  %v860_v43 = vsel %vm441_vm1, %v859_v31, %v858_v34  ;;  %v867_v44 = vrot.slane %v723_v28, 2  ;;  %v335_v45 = vld [vmem:[%s4547_s13 + $0xd0] sm:$0x1]  ;;  %v336_v46 = vld [vmem:[%s4547_s13 + $0xd8] sm:$0x1]  ;;  %v483_v47 = vsel %vm453_vm5, %v482_v21, %v481_v33  ;;  %v869_v57 = vrot.slane %v724_v29, 1 }
  0x5a   : > { %3831 = vmatprep.subr.mxu0 %v4749_v52  ;;  %3875 = vmatprep.subr.mxu1 %v4749_v52  ;;  %v862_v48 = vsel %vm444_vm2, %v861_v32, %v860_v43  ;;  %v337_v49 = vld [vmem:[%s4547_s13 + $0xe0] sm:$0x1]  ;;  %v338_v50 = vld [vmem:[%s4547_s13 + $0xe8] sm:$0x1]  ;;  %v339_v55 = vld [vmem:[%s4547_s13 + $0xf0] sm:$0x1]  ;;  %v485_v16 = vsel %vm456_vm6, %v484_v41, %v483_v47 }
  0x5b   : > { %3832 = vmatpush3.msra.mxu0 %v4749_v52  ;;  %3876 = vmatpush3.msra.mxu1 %v4749_v52  ;;  %v864_v56 = vsel %vm447_vm3, %v863_v35, %v862_v48  ;;  %v4812_v58 = vld [vmem:[%s4547_s13 + $0xf8] sm:$0x1]  ;;  %v486_v59 = vrot.slane %v334_v39, 7  ;;  %v488_v60 = vrot.slane %v335_v45, 6  ;;  %v490_v62 = vrot.slane %v336_v46, 5  ;;  %v303_v7 = vld [vmem:[%s4539_s11 + $0x10] sm:$0xff] }
  0x5c   : > { %3833 = vmatprep.subr.mxu0 %v4771_v9  ;;  %3877 = vmatprep.subr.mxu1 %v4771_v9  ;;  %v866_v61 = vsel %vm450_vm4, %v865_v37, %v864_v56  ;;  %v492_v63 = vrot.slane %v337_v49, 4  ;;  %v494_v5 = vrot.slane %v338_v50, 3  ;;  %v496_v13 = vrot.slane %v339_v55, 2  ;;  %v726_v14 = vld [vmem:[%s4547_s13 + $0xc9] sm:$0x1]  ;;  %v3491_v29 = vld [vmem:[%s4539_s11 + $0x50] sm:$0xff] }
  0x5d   : > { %3834 = vmatpush3.msra.mxu0 %v4771_v9  ;;  %3835 = vmatprep.mubr.f32.mxu0 %v4751_v54  ;;  %v725_v54 = vld [vmem:[%s4547_s13 + $0xc1] sm:$0x1]  ;;  %v868_v8 = vsel %vm453_vm5, %v867_v44, %v866_v61  ;;  %v487_v11 = vsel %vm438_vm0, %v486_v59, %v333_v38  ;;  %v727_v15 = vld [vmem:[%s4547_s13 + $0xd1] sm:$0x1]  ;;  %v728_v19 = vld [vmem:[%s4547_s13 + $0xd9] sm:$0x1]  ;;  %v4852_v43 = vadd.f32 %v485_v16, %v303_v7 }
  0x5e   : > { %3878 = vmatpush3.msra.mxu1 %v4771_v9  ;;  %3879 = vmatprep.mubr.f32.mxu1 %v949_v10  ;;  %v498_v10 = vrot.slane %v4812_v58, 1  ;;  %v489_v18 = vsel %vm441_vm1, %v488_v60, %v487_v11  ;;  %v729_v20 = vld [vmem:[%s4547_s13 + $0xe1] sm:$0x1]  ;;  %v730_v21 = vld [vmem:[%s4547_s13 + $0xe9] sm:$0x1]  ;;  %v870_v23 = vsel %vm456_vm6, %v869_v57, %v868_v8  ;;  %v871_v27 = vrot.slane %v726_v14, 7 }
  0x5f   : > { %3836 = vmatmul.mubr.f32.vlgmr.msra.gmra.mxu0 %v565_v26  ;;  %3880 = vmatmul.mubr.f32.vlgmr.msra.gmra.mxu1 %v950_v40  ;;  %v491_v24 = vsel %vm444_vm2, %v490_v62, %v489_v18  ;;  %v731_v25 = vld [vmem:[%s4547_s13 + $0xf1] sm:$0x1]  ;;  %v4836_v26 = vld [vmem:[%s4547_s13 + $0xf9] sm:$0x1]  ;;  %v873_v28 = vrot.slane %v727_v15, 6  ;;  %v877_v32 = vrot.slane %v729_v20, 4  ;;  %v4862_v49 = vadd.f32 %v3491_v29, %v870_v23 }
  0x60   : > { %3891 = vmatprep.subr.mxu0 %v4556_v0  ;;  %3935 = vmatprep.subr.mxu1 %v4556_v0  ;;  %v493_v31 = vsel %vm447_vm3, %v492_v63, %v491_v24  ;;  %v879_v33 = vrot.slane %v730_v21, 3  ;;  %v341_v34 = vld [vmem:[%s4547_s13 + $0x100] sm:$0x1]  ;;  %v872_v37 = vsel %vm438_vm0, %v871_v27, %v725_v54  ;;  %v881_v38 = vrot.slane %v731_v25, 2  ;;  %v342_v40 = vld [vmem:[%s4547_s13 + $0x108] sm:$0x1] }
  0x61   : > { %3892 = vmatpush3.msra.mxu0 %v4556_v0  ;;  %3936 = vmatpush3.msra.mxu1 %v4556_v0  ;;  %v875_v0 = vrot.slane %v728_v19, 5  ;;  %v495_v35 = vsel %vm450_vm4, %v494_v5, %v493_v31  ;;  %v883_v39 = vrot.slane %v4836_v26, 1  ;;  %v343_v41 = vld [vmem:[%s4547_s13 + $0x110] sm:$0x1]  ;;  %v304_v44 = vld [vmem:[%s4539_s11 + $0x18] sm:$0xff]  ;;  %v874_v45 = vsel %vm441_vm1, %v873_v28, %v872_v37  ;;  %s4391_s9 = smov [#allocation7]  }
  0x62   : > { %3893 = vmatprep.subr.mxu0 %v4561_v1  ;;  %3937 = vmatprep.subr.mxu1 %v4561_v1  ;;  %v344_v46 = vld [vmem:[%s4547_s13 + $0x118] sm:$0x1]  ;;  %v345_v47 = vld [vmem:[%s4547_s13 + $0x120] sm:$0x1]  ;;  %v346_v48 = vld [vmem:[%s4547_s13 + $0x128] sm:$0x1] }
  0x63   : > { %3894 = vmatpush3.msra.mxu0 %v4561_v1  ;;  %3938 = vmatpush3.msra.mxu1 %v4561_v1  ;;  %v497_v1 = vsel %vm453_vm5, %v496_v13, %v495_v35  ;;  %v876_v50 = vsel %vm444_vm2, %v875_v0, %v874_v45  ;;  %v347_v55 = vld [vmem:[%s4547_s13 + $0x130] sm:$0x1]  ;;  %v4867_v56 = vld [vmem:[%s4547_s13 + $0x138] sm:$0x1]  ;;  %v500_v57 = vrot.slane %v342_v40, 7  ;;  %v502_v58 = vrot.slane %v343_v41, 6 }
  0x64   : > { %3895 = vmatprep.subr.mxu0 %v4570_v2  ;;  %3939 = vmatprep.subr.mxu1 %v4570_v2  ;;  %v499_v59 = vsel %vm456_vm6, %v498_v10, %v497_v1  ;;  %v878_v60 = vsel %vm447_vm3, %v877_v32, %v876_v50  ;;  %v506_v61 = vrot.slane %v345_v47, 4  ;;  %v733_v62 = vld [vmem:[%s4547_s13 + $0x101] sm:$0x1]  ;;  %v734_v63 = vld [vmem:[%s4547_s13 + $0x109] sm:$0x1]  ;;  %v508_v7 = vrot.slane %v346_v48, 3 }
  0x65   : > { %3896 = vmatpush3.msra.mxu0 %v4570_v2  ;;  %3940 = vmatpush3.msra.mxu1 %v4570_v2  ;;  %v504_v2 = vrot.slane %v344_v46, 5  ;;  %v880_v5 = vsel %vm450_vm4, %v879_v33, %v878_v60  ;;  %v501_v54 = vsel %vm438_vm0, %v500_v57, %v341_v34  ;;  %v510_v8 = vrot.slane %v347_v55, 2  ;;  %v735_v11 = vld [vmem:[%s4547_s13 + $0x111] sm:$0x1]  ;;  %v736_v13 = vld [vmem:[%s4547_s13 + $0x119] sm:$0x1] }
  0x66   : > { %3897 = vmatprep.subr.mxu0 %v4579_v3  ;;  %3941 = vmatprep.subr.mxu1 %v4579_v3  ;;  %v882_v10 = vsel %vm453_vm5, %v881_v38, %v880_v5  ;;  %v503_v14 = vsel %vm441_vm1, %v502_v58, %v501_v54  ;;  %v737_v15 = vld [vmem:[%s4547_s13 + $0x121] sm:$0x1]  ;;  %v738_v16 = vld [vmem:[%s4547_s13 + $0x129] sm:$0x1]  ;;  %v885_v18 = vrot.slane %v734_v63, 7  ;;  %v4890_v19 = vadd.f32 %v499_v59, %v304_v44  ;;  %v3492_v26 = vld [vmem:[%s4539_s11 + $0x58] sm:$0xff] }
  0x67   : > { %3898 = vmatpush3.msra.mxu0 %v4579_v3  ;;  %3942 = vmatpush3.msra.mxu1 %v4579_v3  ;;  %v512_v3 = vrot.slane %v4867_v56, 1  ;;  %v505_v20 = vsel %vm444_vm2, %v504_v2, %v503_v14  ;;  %v739_v21 = vld [vmem:[%s4547_s13 + $0x131] sm:$0x1]  ;;  %v4895_v23 = vld [vmem:[%s4547_s13 + $0x139] sm:$0x1]  ;;  %v887_v24 = vrot.slane %v735_v11, 6  ;;  %v884_v27 = vsel %vm456_vm6, %v883_v39, %v882_v10 }
  0x68   : > { %3899 = vmatprep.subr.mxu0 %v4586_v4  ;;  %3943 = vmatprep.subr.mxu1 %v4586_v4  ;;  %v889_v25 = vrot.slane %v736_v13, 5  ;;  %v886_v28 = vsel %vm438_vm0, %v885_v18, %v733_v62  ;;  %v891_v29 = vrot.slane %v737_v15, 4  ;;  %v349_v31 = vld [vmem:[%s4547_s13 + $0x140] sm:$0x1]  ;;  %v350_v0 = vld [vmem:[%s4547_s13 + $0x148] sm:$0x1]  ;;  %v952_v57 = vadd.f32 %v3492_v26, %v884_v27 }
  0x69   : > { %3900 = vmatpush3.msra.mxu0 %v4586_v4  ;;  %3944 = vmatpush3.msra.mxu1 %v4586_v4  ;;  %v507_v4 = vsel %vm447_vm3, %v506_v61, %v505_v20  ;;  %v305_v32 = vld [vmem:[%s4539_s11 + $0x20] sm:$0xff]  ;;  %v888_v34 = vsel %vm441_vm1, %v887_v24, %v886_v28  ;;  %v893_v35 = vrot.slane %v738_v16, 3  ;;  %v895_v37 = vrot.slane %v739_v21, 2  ;;  %v351_v38 = vld [vmem:[%s4547_s13 + $0x150] sm:$0x1]  ;;  %v306_v13 = vld [vmem:[%s4539_s11 + $0x28] sm:$0xff] }
  0x6a   : > { %3901 = vmatprep.subr.mxu0 %v4606_v12  ;;  %3945 = vmatprep.subr.mxu1 %v4606_v12  ;;  %v509_v33 = vsel %vm450_vm4, %v508_v7, %v507_v4  ;;  %v352_v39 = vld [vmem:[%s4547_s13 + $0x158] sm:$0x1]  ;;  %v890_v41 = vsel %vm444_vm2, %v889_v25, %v888_v34  ;;  %v353_v44 = vld [vmem:[%s4547_s13 + $0x160] sm:$0x1]  ;;  %v354_v1 = vld [vmem:[%s4547_s13 + $0x168] sm:$0x1] }
  0x6b   : > { %3902 = vmatpush3.msra.mxu0 %v4606_v12  ;;  %3946 = vmatpush3.msra.mxu1 %v4606_v12  ;;  %v511_v40 = vsel %vm453_vm5, %v510_v8, %v509_v33  ;;  %v897_v12 = vrot.slane %v4895_v23, 1  ;;  %v514_v45 = vrot.slane %v350_v0, 7  ;;  %v892_v47 = vsel %vm447_vm3, %v891_v29, %v890_v41  ;;  %v355_v48 = vld [vmem:[%s4547_s13 + $0x170] sm:$0x1]  ;;  %v356_v50 = vld [vmem:[%s4547_s13 + $0x178] sm:$0x1] }
  0x6c   : > { %3903 = vmatprep.subr.mxu0 %v4616_v17  ;;  %3947 = vmatprep.subr.mxu1 %v4616_v17  ;;  %v513_v46 = vsel %vm456_vm6, %v512_v3, %v511_v40  ;;  %v516_v55 = vrot.slane %v351_v38, 6  ;;  %v518_v56 = vrot.slane %v352_v39, 5  ;;  %v894_v58 = vsel %vm450_vm4, %v893_v35, %v892_v47  ;;  %v741_v60 = vld [vmem:[%s4547_s13 + $0x141] sm:$0x1]  ;;  %v742_v2 = vld [vmem:[%s4547_s13 + $0x149] sm:$0x1] }
  0x6d   : > { %3904 = vmatpush3.msra.mxu0 %v4616_v17  ;;  %3948 = vmatpush3.msra.mxu1 %v4616_v17  ;;  %v515_v17 = vsel %vm438_vm0, %v514_v45, %v349_v31  ;;  %v520_v59 = vrot.slane %v353_v44, 4  ;;  %v3493_v61 = vld [vmem:[%s4539_s11 + $0x60] sm:$0xff]  ;;  %v896_v62 = vsel %vm453_vm5, %v895_v37, %v894_v58  ;;  %v522_v5 = vrot.slane %v354_v1, 3  ;;  %v743_v7 = vld [vmem:[%s4547_s13 + $0x151] sm:$0x1]  ;;  %v3494_v1 = vld [vmem:[%s4539_s11 + $0x68] sm:$0xff] }
  0x6e   : > { %3905 = vmatprep.subr.mxu0 %v4637_v30  ;;  %3949 = vmatprep.subr.mxu1 %v4637_v30  ;;  %v517_v63 = vsel %vm441_vm1, %v516_v55, %v515_v17  ;;  %v524_v54 = vrot.slane %v355_v48, 2  ;;  %v744_v8 = vld [vmem:[%s4547_s13 + $0x159] sm:$0x1]  ;;  %v568_v11 = vadd.f32 %v513_v46, %v305_v32  ;;  %v745_v14 = vld [vmem:[%s4547_s13 + $0x161] sm:$0x1]  ;;  %v899_v15 = vrot.slane %v742_v2, 7 }
  0x6f   : > { %3906 = vmatpush3.msra.mxu0 %v4637_v30  ;;  %3950 = vmatpush3.msra.mxu1 %v4637_v30  ;;  %v519_v10 = vsel %vm444_vm2, %v518_v56, %v517_v63  ;;  %v526_v30 = vrot.slane %v356_v50, 1  ;;  %v746_v3 = vld [vmem:[%s4547_s13 + $0x169] sm:$0x1]  ;;  %v898_v16 = vsel %vm456_vm6, %v897_v12, %v896_v62  ;;  %v747_v20 = vld [vmem:[%s4547_s13 + $0x171] sm:$0x1]  ;;  %v901_v23 = vrot.slane %v743_v7, 6 }
  0x70   : > { %3907 = vmatprep.subr.mxu0 %v4648_v36  ;;  %3951 = vmatprep.subr.mxu1 %v4648_v36  ;;  %v521_v18 = vsel %vm447_vm3, %v520_v59, %v519_v10  ;;  %v748_v21 = vld [vmem:[%s4547_s13 + $0x179] sm:$0x1]  ;;  %v903_v24 = vrot.slane %v744_v8, 5  ;;  %v900_v26 = vsel %vm438_vm0, %v899_v15, %v741_v60  ;;  %v905_v27 = vrot.slane %v745_v14, 4  ;;  %v357_v4 = vld [vmem:[%s4547_s13 + $0x180] sm:$0x1] }
  0x71   : > { %3908 = vmatpush3.msra.mxu0 %v4648_v36  ;;  %3952 = vmatpush3.msra.mxu1 %v4648_v36  ;;  %v523_v25 = vsel %vm450_vm4, %v522_v5, %v521_v18  ;;  %v907_v36 = vrot.slane %v746_v3, 3  ;;  %v358_v28 = vld [vmem:[%s4547_s13 + $0x188] sm:$0x1]  ;;  %v911_v31 = vrot.slane %v748_v21, 1  ;;  %v359_v0 = vld [vmem:[%s4547_s13 + $0x190] sm:$0x1]  ;;  %v953_v33 = vadd.f32 %v3493_v61, %v898_v16 }
  0x72   : > { %3838 = vmatprep.mubr.f32.mxu0 %v4852_v43  ;;  %3882 = vmatprep.mubr.f32.mxu1 %v4862_v49  ;;  %v525_v29 = vsel %vm453_vm5, %v524_v54, %v523_v25  ;;  %v902_v43 = vsel %vm441_vm1, %v901_v23, %v900_v26  ;;  %v909_v49 = vrot.slane %v747_v20, 2  ;;  %v360_v32 = vld [vmem:[%s4547_s13 + $0x198] sm:$0x1]  ;;  %v361_v37 = vld [vmem:[%s4547_s13 + $0x1a0] sm:$0x1]  ;;  %v530_v44 = vrot.slane %v359_v0, 6 }
  0x73   : > { %3909 = vmatprep.subr.mxu0 %v4658_v42  ;;  %3953 = vmatprep.subr.mxu1 %v4658_v42  ;;  %v527_v34 = vsel %vm456_vm6, %v526_v30, %v525_v29  ;;  %v904_v35 = vsel %vm444_vm2, %v903_v24, %v902_v43  ;;  %v362_v38 = vld [vmem:[%s4547_s13 + $0x1a8] sm:$0x1]  ;;  %v363_v39 = vld [vmem:[%s4547_s13 + $0x1b0] sm:$0x1]  ;;  %v364_v12 = vld [vmem:[%s4547_s13 + $0x1b8] sm:$0x1] }
  0x74   : > { %3839 = vmatmul.mubr.f32.gmra.mxu0 %v4890_v19  ;;  %3883 = vmatmul.mubr.f32.gmra.mxu1 %v952_v57  ;;  %v569_v40 = vadd.f32 %v527_v34, %v306_v13  ;;  %v906_v41 = vsel %vm447_vm3, %v905_v27, %v904_v35  ;;  %v528_v19 = vrot.slane %v358_v28, 7  ;;  %v532_v46 = vrot.slane %v360_v32, 5  ;;  %v749_v48 = vld [vmem:[%s4547_s13 + $0x181] sm:$0x1]  ;;  %v750_v58 = vld [vmem:[%s4547_s13 + $0x189] sm:$0x1] }
  0x75   : > { %3910 = vmatpush3.msra.mxu0 %v4658_v42  ;;  %3954 = vmatpush3.msra.mxu1 %v4658_v42  ;;  %v908_v45 = vsel %vm450_vm4, %v907_v36, %v906_v41  ;;  %v534_v47 = vrot.slane %v361_v37, 4  ;;  %v536_v42 = vrot.slane %v362_v38, 3  ;;  %v538_v56 = vrot.slane %v363_v39, 2  ;;  %v751_v17 = vld [vmem:[%s4547_s13 + $0x191] sm:$0x1]  ;;  %s4304_s21 = sshll.u32 %s4391_s9, 4  ;;  %s4305_s21 = int_to_ptr.vmem [resolvable:$false] %s4304_s21 }
  0x76   : > { %3911 = vmatprep.subr.mxu0 %v4676_v53  ;;  %3955 = vmatprep.subr.mxu1 %v4676_v53  ;;  %v910_v50 = vsel %vm453_vm5, %v909_v49, %v908_v45  ;;  %v529_v55 = vsel %vm438_vm0, %v528_v19, %v357_v4  ;;  %v540_v57 = vrot.slane %v364_v12, 1  ;;  %v752_v2 = vld [vmem:[%s4547_s13 + $0x199] sm:$0x1]  ;;  %v753_v61 = vld [vmem:[%s4547_s13 + $0x1a1] sm:$0x1]  ;;  %v913_v7 = vrot.slane %v750_v58, 7 }
  0x77   : > { %3912 = vmatpush3.msra.mxu0 %v4676_v53  ;;  %3956 = vmatpush3.msra.mxu1 %v4676_v53  ;;  %v912_v59 = vsel %vm456_vm6, %v911_v31, %v910_v50  ;;  %v531_v60 = vsel %vm441_vm1, %v530_v44, %v529_v55  ;;  %v754_v53 = vld [vmem:[%s4547_s13 + $0x1a9] sm:$0x1]  ;;  %v755_v5 = vld [vmem:[%s4547_s13 + $0x1b1] sm:$0x1]  ;;  %v756_v54 = vld [vmem:[%s4547_s13 + $0x1b9] sm:$0x1] }
  0x78   : > { %3841 = vmatprep.mubr.f32.mxu0 %v568_v11  ;;  %3885 = vmatprep.mubr.f32.mxu1 %v953_v33  ;;  %v954_v62 = vadd.f32 %v3494_v1, %v912_v59  ;;  %v533_v63 = vsel %vm444_vm2, %v532_v46, %v531_v60  ;;  %v915_v8 = vrot.slane %v751_v17, 6  ;;  %v307_v11 = vld [vmem:[%s4539_s11 + $0x30] sm:$0xff]  ;;  %v917_v10 = vrot.slane %v752_v2, 5  ;;  %v365_v3 = vld [vmem:[%s4547_s13 + $0x1c0] sm:$0x1]  ;;  %v308_v58 = vld [vmem:[%s4539_s11 + $0x38] sm:$0xff] }
  0x79   : > { %3913 = vmatprep.subr.mxu0 %v4694_v6  ;;  %3957 = vmatprep.subr.mxu1 %v4694_v6  ;;  %v535_v13 = vsel %vm447_vm3, %v534_v47, %v533_v63  ;;  %v919_v30 = vrot.slane %v753_v61, 4  ;;  %v921_v14 = vrot.slane %v754_v53, 3  ;;  %v914_v16 = vsel %vm438_vm0, %v913_v7, %v749_v48  ;;  %v366_v21 = vld [vmem:[%s4547_s13 + $0x1c8] sm:$0x1]  ;;  %v367_v23 = vld [vmem:[%s4547_s13 + $0x1d0] sm:$0x1] }
  0x7a   : > { %3842 = vmatmul.mubr.f32.gmra.mxu0 %v569_v40  ;;  %3958 = vmatpush3.msra.mxu1 %v4694_v6  ;;  %v537_v15 = vsel %vm450_vm4, %v536_v42, %v535_v13  ;;  %v923_v18 = vrot.slane %v755_v5, 2  ;;  %v925_v20 = vrot.slane %v756_v54, 1  ;;  %v916_v25 = vsel %vm441_vm1, %v915_v8, %v914_v16  ;;  %v369_v26 = vld [vmem:[%s4547_s13 + $0x1e0] sm:$0x1]  ;;  %v370_v27 = vld [vmem:[%s4547_s13 + $0x1e8] sm:$0x1] }
  0x7b   : > { %3886 = vmatmul.mubr.f32.gmra.mxu1 %v954_v62  ;;  %3914 = vmatpush3.msra.mxu0 %v4694_v6  ;;  %v539_v24 = vsel %vm453_vm5, %v538_v56, %v537_v15  ;;  %v368_v6 = vld [vmem:[%s4547_s13 + $0x1d8] sm:$0x1]  ;;  %v3495_v4 = vld [vmem:[%s4539_s11 + $0x70] sm:$0xff]  ;;  %v918_v28 = vsel %vm444_vm2, %v917_v10, %v916_v25  ;;  %v542_v49 = vrot.slane %v366_v21, 7  ;;  %v544_v31 = vrot.slane %v367_v23, 6  ;;  %s4306_s27 = scalar_lea.vmem %s4305_s21, 16384 }
  0x7c   : > { %3915 = vmatprep.subr.mxu0 %v4713_v22  ;;  %3959 = vmatprep.subr.mxu1 %v4713_v22  ;;  %v541_v36 = vsel %vm456_vm6, %v540_v57, %v539_v24  ;;  %v371_v29 = vld [vmem:[%s4547_s13 + $0x1f0] sm:$0x1]  ;;  %v372_v43 = vld [vmem:[%s4547_s13 + $0x1f8] sm:$0x1]  ;;  %v920_v32 = vsel %vm447_vm3, %v919_v30, %v918_v28  ;;  %v546_v33 = vrot.slane %v368_v6, 5  ;;  %v550_v39 = vrot.slane %v370_v27, 3 }
  0x7d   : > { %3916 = vmatpush3.msra.mxu0 %v4713_v22  ;;  %3960 = vmatpush3.msra.mxu1 %v4713_v22  ;;  %v570_v0 = vadd.f32 %v541_v36, %v307_v11  ;;  %v548_v22 = vrot.slane %v369_v26, 4  ;;  %v757_v34 = vld [vmem:[%s4547_s13 + $0x1c1] sm:$0x1]  ;;  %v758_v35 = vld [vmem:[%s4547_s13 + $0x1c9] sm:$0x1]  ;;  %v922_v37 = vsel %vm450_vm4, %v921_v14, %v920_v32  ;;  %v543_v38 = vsel %vm438_vm0, %v542_v49, %v365_v3  ;;  %v5063_v21 = vld [vmem:[%s6342_s2 + $0x78] sm:$0xff] }
  0x7e   : > { %3917 = vmatprep.subr.mxu0 %v4744_v51  ;;  %3961 = vmatprep.subr.mxu1 %v4744_v51  ;;  %v552_v40 = vrot.slane %v371_v29, 2  ;;  %v759_v41 = vld [vmem:[%s4547_s13 + $0x1d1] sm:$0x1]  ;;  %v760_v12 = vld [vmem:[%s4547_s13 + $0x1d9] sm:$0x1]  ;;  %v924_v19 = vsel %vm453_vm5, %v923_v18, %v922_v37  ;;  %v545_v44 = vsel %vm441_vm1, %v544_v31, %v543_v38  ;;  %v554_v1 = vrot.slane %v372_v43, 1 }
  0x7f   : > { %3918 = vmatpush3.msra.mxu0 %v4744_v51  ;;  %3962 = vmatpush3.msra.mxu1 %v4744_v51  ;;  %v761_v45 = vld [vmem:[%s4547_s13 + $0x1e1] sm:$0x1]  ;;  %v762_v46 = vld [vmem:[%s4547_s13 + $0x1e9] sm:$0x1]  ;;  %v927_v47 = vrot.slane %v758_v35, 7  ;;  %v926_v42 = vsel %vm456_vm6, %v925_v20, %v924_v19  ;;  %v547_v48 = vsel %vm444_vm2, %v546_v33, %v545_v44  ;;  %v929_v55 = vrot.slane %v759_v41, 6 }
  0x80   : > { %3844 = vmatprep.mubr.f32.mxu0 %v570_v0  ;;  %3919 = vmatprep.subr.mxu0 %v4749_v52  ;;  %v763_v50 = vld [vmem:[%s4547_s13 + $0x1f1] sm:$0x1]  ;;  %v764_v51 = vld [vmem:[%s4547_s13 + $0x1f9] sm:$0x1]  ;;  %v931_v56 = vrot.slane %v760_v12, 5  ;;  %v955_v57 = vadd.f32 %v3495_v4, %v926_v42  ;;  %v549_v17 = vsel %vm447_vm3, %v548_v22, %v547_v48  ;;  %v933_v60 = vrot.slane %v761_v45, 4 }
  0x81   : > { %3963 = vmatprep.subr.mxu1 %v4749_v52  ;;  %3920 = vmatpush3.msra.mxu0 %v4749_v52  ;;  %v928_v59 = vsel %vm438_vm0, %v927_v47, %v757_v34  ;;  %v1080_v2 = vld [vmem:[%s4547_s13 + $0x2] sm:$0x1]  ;;  %v1081_v61 = vld [vmem:[%s4547_s13 + $0xa] sm:$0x1]  ;;  %v551_v53 = vsel %vm450_vm4, %v550_v39, %v549_v17  ;;  %v935_v63 = vrot.slane %v762_v46, 3  ;;  %v937_v5 = vrot.slane %v763_v50, 2 }
  0x82   : > { %3964 = vmatpush3.msra.mxu1 %v4749_v52  ;;  %3921 = vmatprep.subr.mxu0 %v4771_v9  ;;  %v930_v62 = vsel %vm441_vm1, %v929_v55, %v928_v59  ;;  %v1082_v54 = vld [vmem:[%s4547_s13 + $0x12] sm:$0x1]  ;;  %v1083_v52 = vld [vmem:[%s4547_s13 + $0x1a] sm:$0x1]  ;;  %v553_v7 = vsel %vm453_vm5, %v552_v40, %v551_v53  ;;  %v939_v11 = vrot.slane %v764_v51, 1  ;;  %v1208_v30 = vrot.slane %v1081_v61, 7 }
  0x83   : > { %3965 = vmatprep.subr.mxu1 %v4771_v9  ;;  %3922 = vmatpush3.msra.mxu0 %v4771_v9  ;;  %v932_v8 = vsel %vm444_vm2, %v931_v56, %v930_v62  ;;  %v1084_v13 = vld [vmem:[%s4547_s13 + $0x22] sm:$0x1]  ;;  %v1085_v10 = vld [vmem:[%s4547_s13 + $0x2a] sm:$0x1]  ;;  %v555_v14 = vsel %vm456_vm6, %v554_v1, %v553_v7  ;;  %v1086_v15 = vld [vmem:[%s4547_s13 + $0x32] sm:$0x1] }
  0x84   : > { %3888 = vmatprep.mubr.f32.mxu1 %v955_v57  ;;  %3966 = vmatpush3.msra.mxu1 %v4771_v9  ;;  %v934_v3 = vsel %vm447_vm3, %v933_v60, %v932_v8  ;;  %v1087_v16 = vld [vmem:[%s4547_s13 + $0x3a] sm:$0x1]  ;;  %v1210_v18 = vrot.slane %v1082_v54, 6  ;;  %v1212_v20 = vrot.slane %v1083_v52, 5  ;;  %v571_v9 = vadd.f32 %v555_v14, %v308_v58  ;;  %v1459_v26 = vld [vmem:[%s4547_s13 + $0x3] sm:$0x1] }
  0x85   : > { %3979 = vmatprep.subr.mxu0 %v5063_v21  ;;  %4023 = vmatprep.subr.mxu1 %v5063_v21  ;;  %v3496_v23 = vld [vmem:[%s4539_s11 + $0x78] sm:$0xff]  ;;  %v936_v24 = vsel %vm450_vm4, %v935_v63, %v934_v3  ;;  %v1209_v25 = vsel %vm438_vm0, %v1208_v30, %v1080_v2  ;;  %v1214_v6 = vrot.slane %v1084_v13, 4  ;;  %v1460_v27 = vld [vmem:[%s4547_s13 + $0xb] sm:$0x1]  ;;  %v1216_v28 = vrot.slane %v1085_v10, 3  ;;  %v3505_v0 = vld [vmem:[%s4539_s11 + $0x80] sm:$0xff] }
  0x86   : > { %v938_v36 = vsel %vm453_vm5, %v937_v5, %v936_v24  ;;  %v1211_v4 = vsel %vm441_vm1, %v1210_v18, %v1209_v25  ;;  %v1218_v29 = vrot.slane %v1086_v15, 2  ;;  %v1461_v43 = vld [vmem:[%s4547_s13 + $0x13] sm:$0x1]  ;;  %v1462_v49 = vld [vmem:[%s4547_s13 + $0x1b] sm:$0x1]  ;;  %3845 = vmatmul.mubr.f32.gmra.mxu0 %v571_v9  ;;  %v1220_v33 = vrot.slane %v1087_v16, 1 }
  0x87   : > { %v940_v31 = vsel %vm456_vm6, %v939_v11, %v938_v36  ;;  %v1213_v32 = vsel %vm444_vm2, %v1212_v20, %v1211_v4  ;;  %v1463_v22 = vld [vmem:[%s4547_s13 + $0x23] sm:$0x1]  ;;  %v1464_v34 = vld [vmem:[%s4547_s13 + $0x2b] sm:$0x1]  ;;  %v1587_v35 = vrot.slane %v1460_v27, 7  ;;  %v1589_v41 = vrot.slane %v1461_v43, 6 }
  0x88   : > { %v956_v37 = vadd.f32 %v3496_v23, %v940_v31  ;;  %v1215_v38 = vsel %vm447_vm3, %v1214_v6, %v1213_v32  ;;  %v1465_v39 = vld [vmem:[%s4547_s13 + $0x33] sm:$0x1]  ;;  %v1466_v40 = vld [vmem:[%s4547_s13 + $0x3b] sm:$0x1]  ;;  %v1591_v12 = vrot.slane %v1462_v49, 5  ;;  %v1593_v1 = vrot.slane %v1463_v22, 4 }
  0x89   : > { %v1217_v19 = vsel %vm450_vm4, %v1216_v28, %v1215_v38  ;;  %v1588_v44 = vsel %vm438_vm0, %v1587_v35, %v1459_v26  ;;  %v1595_v45 = vrot.slane %v1464_v34, 3  ;;  %v1088_v46 = vld [vmem:[%s4547_s13 + $0x42] sm:$0x1]  ;;  %v1089_v47 = vld [vmem:[%s4547_s13 + $0x4a] sm:$0x1]  ;;  %v1597_v50 = vrot.slane %v1465_v39, 2 }
  0x8a   : > { %3889 = vmatmul.mubr.f32.gmra.mxu1 %v956_v37  ;;  %v1219_v42 = vsel %vm453_vm5, %v1218_v29, %v1217_v19  ;;  %v1590_v48 = vsel %vm441_vm1, %v1589_v41, %v1588_v44  ;;  %v1599_v51 = vrot.slane %v1466_v40, 1  ;;  %v1090_v55 = vld [vmem:[%s4547_s13 + $0x52] sm:$0x1]  ;;  %v1091_v56 = vld [vmem:[%s4547_s13 + $0x5a] sm:$0x1]  ;;  %v1222_v62 = vrot.slane %v1089_v47, 7 }
  0x8b   : > { %v1221_v57 = vsel %vm456_vm6, %v1220_v33, %v1219_v42  ;;  %v1592_v58 = vsel %vm444_vm2, %v1591_v12, %v1590_v48  ;;  %v1092_v17 = vld [vmem:[%s4547_s13 + $0x62] sm:$0x1]  ;;  %v1093_v59 = vld [vmem:[%s4547_s13 + $0x6a] sm:$0x1]  ;;  %v1094_v60 = vld [vmem:[%s4547_s13 + $0x72] sm:$0x1] }
  0x8c   : > { %v1328_v2 = vadd.f32 %v3505_v0, %v1221_v57  ;;  %v1594_v61 = vsel %vm447_vm3, %v1593_v1, %v1592_v58  ;;  %v1095_v53 = vld [vmem:[%s4547_s13 + $0x7a] sm:$0x1]  ;;  %v1224_v63 = vrot.slane %v1090_v55, 6  ;;  %v3521_v5 = vld [vmem:[%s4539_s11 + $0xc0] sm:$0xff]  ;;  %v1226_v52 = vrot.slane %v1091_v56, 5  ;;  %v3506_v4 = vld [vmem:[%s4539_s11 + $0x88] sm:$0xff] }
  0x8d   : > { %v1596_v54 = vsel %vm450_vm4, %v1595_v45, %v1594_v61  ;;  %v1228_v7 = vrot.slane %v1092_v17, 4  ;;  %v1230_v8 = vrot.slane %v1093_v59, 3  ;;  %v1467_v11 = vld [vmem:[%s4547_s13 + $0x43] sm:$0x1]  ;;  %v1223_v10 = vsel %vm438_vm0, %v1222_v62, %v1088_v46  ;;  %v1468_v3 = vld [vmem:[%s4547_s13 + $0x4b] sm:$0x1] }
  0x8e   : > { %3923 = vmatprep.mubr.f32.mxu0 %v1328_v2  ;;  %v1598_v13 = vsel %vm453_vm5, %v1597_v50, %v1596_v54  ;;  %v1232_v30 = vrot.slane %v1094_v60, 2  ;;  %v1234_v14 = vrot.slane %v1095_v53, 1  ;;  %v1469_v15 = vld [vmem:[%s4547_s13 + $0x53] sm:$0x1]  ;;  %v1225_v18 = vsel %vm441_vm1, %v1224_v63, %v1223_v10  ;;  %v1470_v20 = vld [vmem:[%s4547_s13 + $0x5b] sm:$0x1] }
  0x8f   : > { %v1600_v16 = vsel %vm456_vm6, %v1599_v51, %v1598_v13  ;;  %v1471_v9 = vld [vmem:[%s4547_s13 + $0x63] sm:$0x1]  ;;  %v1472_v23 = vld [vmem:[%s4547_s13 + $0x6b] sm:$0x1]  ;;  %v1227_v25 = vsel %vm444_vm2, %v1226_v52, %v1225_v18  ;;  %v1473_v6 = vld [vmem:[%s4547_s13 + $0x73] sm:$0x1] }
  0x90   : > { %v1707_v24 = vadd.f32 %v3521_v5, %v1600_v16  ;;  %v1474_v26 = vld [vmem:[%s4547_s13 + $0x7b] sm:$0x1]  ;;  %v1601_v27 = vrot.slane %v1468_v3, 7  ;;  %v1603_v36 = vrot.slane %v1469_v15, 6  ;;  %v1229_v28 = vsel %vm447_vm3, %v1228_v7, %v1227_v25  ;;  %v1096_v31 = vld [vmem:[%s4547_s13 + $0x82] sm:$0x1] }
  0x91   : > { %v1605_v29 = vrot.slane %v1470_v20, 5  ;;  %v1607_v43 = vrot.slane %v1471_v9, 4  ;;  %v1609_v49 = vrot.slane %v1472_v23, 3  ;;  %v1231_v0 = vsel %vm450_vm4, %v1230_v8, %v1229_v28  ;;  %v1097_v34 = vld [vmem:[%s4547_s13 + $0x8a] sm:$0x1] }
  0x92   : > { %3967 = vmatprep.mubr.f32.mxu1 %v1707_v24  ;;  %v1602_v32 = vsel %vm438_vm0, %v1601_v27, %v1467_v11  ;;  %v1611_v33 = vrot.slane %v1473_v6, 2  ;;  %v1613_v22 = vrot.slane %v1474_v26, 1  ;;  %v1098_v35 = vld [vmem:[%s4547_s13 + $0x92] sm:$0x1]  ;;  %v1233_v37 = vsel %vm453_vm5, %v1232_v30, %v1231_v0  ;;  %v1099_v39 = vld [vmem:[%s4547_s13 + $0x9a] sm:$0x1] }
  0x93   : > { %v1604_v38 = vsel %vm441_vm1, %v1603_v36, %v1602_v32  ;;  %v1100_v40 = vld [vmem:[%s4547_s13 + $0xa2] sm:$0x1]  ;;  %v1101_v41 = vld [vmem:[%s4547_s13 + $0xaa] sm:$0x1]  ;;  %v1235_v12 = vsel %vm456_vm6, %v1234_v14, %v1233_v37  ;;  %v1102_v1 = vld [vmem:[%s4547_s13 + $0xb2] sm:$0x1] }
  0x94   : > { %v3522_v19 = vld [vmem:[%s4539_s11 + $0xc8] sm:$0xff]  ;;  %v1606_v44 = vsel %vm444_vm2, %v1605_v29, %v1604_v38  ;;  %v5131_v45 = vld [vmem:[%s4547_s13 + $0xba] sm:$0x1]  ;;  %v1236_v46 = vrot.slane %v1097_v34, 7  ;;  %v1238_v47 = vrot.slane %v1098_v35, 6  ;;  %v1329_v42 = vadd.f32 %v3506_v4, %v1235_v12  ;;  %v5155_v14 = vld [vmem:[%s6342_s2 + $0x70] sm:$0xff] }
  0x95   : > { %v1608_v48 = vsel %vm447_vm3, %v1607_v43, %v1606_v44  ;;  %v1240_v50 = vrot.slane %v1099_v39, 5  ;;  %v1242_v51 = vrot.slane %v1100_v40, 4  ;;  %v1475_v55 = vld [vmem:[%s4547_s13 + $0x83] sm:$0x1]  ;;  %v1476_v56 = vld [vmem:[%s4547_s13 + $0x8b] sm:$0x1] }
  0x96   : > { %v1610_v57 = vsel %vm450_vm4, %v1609_v49, %v1608_v48  ;;  %v1237_v58 = vsel %vm438_vm0, %v1236_v46, %v1096_v31  ;;  %v1244_v17 = vrot.slane %v1101_v41, 3  ;;  %v1246_v59 = vrot.slane %v1102_v1, 2  ;;  %v1477_v60 = vld [vmem:[%s4547_s13 + $0x93] sm:$0x1]  ;;  %v1478_v2 = vld [vmem:[%s4547_s13 + $0x9b] sm:$0x1]  ;;  %3924 = vmatmul.mubr.f32.vlgmr.msra.gmra.mxu0 %v1329_v42 }
  0x97   : > { %v1612_v61 = vsel %vm453_vm5, %v1611_v33, %v1610_v57  ;;  %v1239_v53 = vsel %vm441_vm1, %v1238_v47, %v1237_v58  ;;  %v1248_v62 = vrot.slane %v5131_v45, 1  ;;  %v1479_v63 = vld [vmem:[%s4547_s13 + $0xa3] sm:$0x1]  ;;  %v1480_v5 = vld [vmem:[%s4547_s13 + $0xab] sm:$0x1]  ;;  %v1615_v54 = vrot.slane %v1476_v56, 7  ;;  %3980 = vmatpush3.msra.mxu0 %v5063_v21 }
  0x98   : > { %v1614_v52 = vsel %vm456_vm6, %v1613_v22, %v1612_v61  ;;  %v1241_v7 = vsel %vm444_vm2, %v1240_v50, %v1239_v53  ;;  %v1481_v8 = vld [vmem:[%s4547_s13 + $0xb3] sm:$0x1]  ;;  %v5150_v11 = vld [vmem:[%s4547_s13 + $0xbb] sm:$0x1]  ;;  %v1617_v13 = vrot.slane %v1477_v60, 6  ;;  %v1619_v10 = vrot.slane %v1478_v2, 5  ;;  %3981 = vmatprep.subr.mxu0 %v5155_v14 }
  0x99   : > { %v1708_v30 = vadd.f32 %v3522_v19, %v1614_v52  ;;  %v1243_v3 = vsel %vm447_vm3, %v1242_v51, %v1241_v7  ;;  %v1616_v15 = vsel %vm438_vm0, %v1615_v54, %v1475_v55  ;;  %v1621_v16 = vrot.slane %v1479_v63, 4  ;;  %v1104_v18 = vld [vmem:[%s4547_s13 + $0xc2] sm:$0x1]  ;;  %v1105_v20 = vld [vmem:[%s4547_s13 + $0xca] sm:$0x1]  ;;  %3982 = vmatpush3.msra.mxu0 %v5155_v14  ;;  %v3507_v41 = vld [vmem:[%s4539_s11 + $0x90] sm:$0xff] }
  0x9a   : > { %v1245_v9 = vsel %vm450_vm4, %v1244_v17, %v1243_v3  ;;  %v1618_v23 = vsel %vm441_vm1, %v1617_v13, %v1616_v15  ;;  %v1623_v24 = vrot.slane %v1480_v5, 3  ;;  %v1625_v25 = vrot.slane %v1481_v8, 2  ;;  %v1106_v6 = vld [vmem:[%s4547_s13 + $0xd2] sm:$0x1]  ;;  %v1107_v26 = vld [vmem:[%s4547_s13 + $0xda] sm:$0x1] }
  0x9b   : > { %3968 = vmatmul.mubr.f32.vlgmr.msra.gmra.mxu1 %v1708_v30  ;;  %v5170_v27 = vld [vmem:[%s6342_s2 + $0x68] sm:$0xff]  ;;  %v1620_v36 = vsel %vm444_vm2, %v1619_v10, %v1618_v23  ;;  %v1627_v4 = vrot.slane %v5150_v11, 1  ;;  %v1108_v28 = vld [vmem:[%s4547_s13 + $0xe2] sm:$0x1]  ;;  %v1250_v43 = vrot.slane %v1105_v20, 7  ;;  %v1247_v49 = vsel %vm453_vm5, %v1246_v59, %v1245_v9  ;;  %v3523_v12 = vld [vmem:[%s4539_s11 + $0xd0] sm:$0xff] }
  0x9c   : > { %3983 = vmatprep.subr.mxu0 %v5170_v27  ;;  %v1109_v29 = vld [vmem:[%s4547_s13 + $0xea] sm:$0x1]  ;;  %4024 = vmatpush3.msra.mxu1 %v5063_v21  ;;  %v1622_v31 = vsel %vm447_vm3, %v1621_v16, %v1620_v36  ;;  %v1110_v0 = vld [vmem:[%s4547_s13 + $0xf2] sm:$0x1]  ;;  %v5183_v32 = vld [vmem:[%s4547_s13 + $0xfa] sm:$0x1]  ;;  %v1249_v50 = vsel %vm456_vm6, %v1248_v62, %v1247_v49 }
  0x9d   : > { %3984 = vmatpush3.msra.mxu0 %v5170_v27  ;;  %v1252_v33 = vrot.slane %v1106_v6, 6  ;;  %v1254_v22 = vrot.slane %v1107_v26, 5  ;;  %4025 = vmatprep.subr.mxu1 %v5155_v14  ;;  %v5189_v34 = vld [vmem:[%s6342_s2 + $0x60] sm:$0xff]  ;;  %v1624_v35 = vsel %vm450_vm4, %v1623_v24, %v1622_v31  ;;  %v1251_v37 = vsel %vm438_vm0, %v1250_v43, %v1104_v18  ;;  %v1484_v40 = vld [vmem:[%s4547_s13 + $0xcb] sm:$0x1]  ;;  %v5208_v48 = vld [vmem:[%s6342_s2 + $0x58] sm:$0xff] }
  0x9e   : > { %3985 = vmatprep.subr.mxu0 %v5189_v34  ;;  %v1256_v38 = vrot.slane %v1108_v28, 4  ;;  %v1483_v39 = vld [vmem:[%s4547_s13 + $0xc3] sm:$0x1]  ;;  %4026 = vmatpush3.msra.mxu1 %v5155_v14  ;;  %v1626_v19 = vsel %vm453_vm5, %v1625_v25, %v1624_v35  ;;  %v1258_v1 = vrot.slane %v1109_v29, 3  ;;  %v1260_v46 = vrot.slane %v1110_v0, 2  ;;  %v5228_v53 = vld [vmem:[%s6342_s2 + $0x50] sm:$0xff] }
  0x9f   : > { %3986 = vmatpush3.msra.mxu0 %v5189_v34  ;;  %v1253_v44 = vsel %vm441_vm1, %v1252_v33, %v1251_v37  ;;  %v1485_v47 = vld [vmem:[%s4547_s13 + $0xd3] sm:$0x1]  ;;  %v1486_v42 = vld [vmem:[%s4547_s13 + $0xdb] sm:$0x1]  ;;  %4027 = vmatprep.subr.mxu1 %v5170_v27  ;;  %v1262_v55 = vrot.slane %v5183_v32, 1  ;;  %v1629_v58 = vrot.slane %v1484_v40, 7  ;;  %v1628_v17 = vsel %vm456_vm6, %v1627_v4, %v1626_v19 }
  0xa0   : > { %3987 = vmatprep.subr.mxu0 %v5208_v48  ;;  %v1255_v51 = vsel %vm444_vm2, %v1254_v22, %v1253_v44  ;;  %v1487_v56 = vld [vmem:[%s4547_s13 + $0xe3] sm:$0x1]  ;;  %v1488_v57 = vld [vmem:[%s4547_s13 + $0xeb] sm:$0x1]  ;;  %4028 = vmatpush3.msra.mxu1 %v5170_v27  ;;  %v1489_v45 = vld [vmem:[%s4547_s13 + $0xf3] sm:$0x1]  ;;  %v1330_v16 = vadd.f32 %v3507_v41, %v1249_v50  ;;  %v1709_v18 = vadd.f32 %v3523_v12, %v1628_v17 }
  0xa1   : > { %3988 = vmatpush3.msra.mxu0 %v5208_v48  ;;  %v1257_v59 = vsel %vm447_vm3, %v1256_v38, %v1255_v51  ;;  %v1490_v60 = vld [vmem:[%s4547_s13 + $0xfb] sm:$0x1]  ;;  %v1631_v2 = vrot.slane %v1485_v47, 6  ;;  %v1633_v61 = vrot.slane %v1486_v42, 5  ;;  %4029 = vmatprep.subr.mxu1 %v5189_v34  ;;  %v1630_v63 = vsel %vm438_vm0, %v1629_v58, %v1483_v39  ;;  %v1112_v52 = vld [vmem:[%s4547_s13 + $0x102] sm:$0x1] }
  0xa2   : > { %3989 = vmatprep.subr.mxu0 %v5228_v53  ;;  %v1259_v62 = vsel %vm450_vm4, %v1258_v1, %v1257_v59  ;;  %v1635_v5 = vrot.slane %v1487_v56, 4  ;;  %v1637_v54 = vrot.slane %v1488_v57, 3  ;;  %v1113_v7 = vld [vmem:[%s4547_s13 + $0x10a] sm:$0x1]  ;;  %4030 = vmatpush3.msra.mxu1 %v5189_v34  ;;  %v1639_v13 = vrot.slane %v1489_v45, 2  ;;  %v3508_v25 = vld [vmem:[%s4539_s11 + $0x98] sm:$0xff] }
  0xa3   : > { %3990 = vmatpush3.msra.mxu0 %v5228_v53  ;;  %v1261_v8 = vsel %vm453_vm5, %v1260_v46, %v1259_v62  ;;  %v1632_v11 = vsel %vm441_vm1, %v1631_v2, %v1630_v63  ;;  %v1641_v10 = vrot.slane %v1490_v60, 1  ;;  %v1114_v30 = vld [vmem:[%s4547_s13 + $0x112] sm:$0x1]  ;;  %v1115_v3 = vld [vmem:[%s4547_s13 + $0x11a] sm:$0x1]  ;;  %4031 = vmatprep.subr.mxu1 %v5208_v48  ;;  %v5245_v15 = vld [vmem:[%s6342_s2 + $0x48] sm:$0xff] }
  0xa4   : > { %3991 = vmatprep.subr.mxu0 %v5245_v15  ;;  %v1634_v20 = vsel %vm444_vm2, %v1633_v61, %v1632_v11  ;;  %v1116_v9 = vld [vmem:[%s4547_s13 + $0x122] sm:$0x1]  ;;  %v1117_v23 = vld [vmem:[%s4547_s13 + $0x12a] sm:$0x1]  ;;  %v5252_v24 = vld [vmem:[%s4547_s13 + $0x132] sm:$0x1]  ;;  %4032 = vmatpush3.msra.mxu1 %v5208_v48  ;;  %v1263_v6 = vsel %vm456_vm6, %v1262_v55, %v1261_v8 }
  0xa5   : > { %3992 = vmatpush3.msra.mxu0 %v5245_v15  ;;  %v1636_v26 = vsel %vm447_vm3, %v1635_v5, %v1634_v20  ;;  %v5260_v36 = vld [vmem:[%s4547_s13 + $0x13a] sm:$0x1]  ;;  %v1264_v4 = vrot.slane %v1113_v7, 7  ;;  %v1266_v28 = vrot.slane %v1114_v30, 6  ;;  %4033 = vmatprep.subr.mxu1 %v5228_v53  ;;  %v5266_v29 = vld [vmem:[%s6342_s2 + $0x40] sm:$0xff]  ;;  %v1268_v31 = vrot.slane %v1115_v3, 5 }
  0xa6   : > { %3993 = vmatprep.subr.mxu0 %v5266_v29  ;;  %v3524_v43 = vld [vmem:[%s4539_s11 + $0xd8] sm:$0xff]  ;;  %v1638_v49 = vsel %vm450_vm4, %v1637_v54, %v1636_v26  ;;  %v1270_v0 = vrot.slane %v1116_v9, 4  ;;  %v1272_v32 = vrot.slane %v1117_v23, 3  ;;  %v1491_v33 = vld [vmem:[%s4547_s13 + $0x103] sm:$0x1]  ;;  %4034 = vmatpush3.msra.mxu1 %v5228_v53  ;;  %v1274_v37 = vrot.slane %v5252_v24, 2 }
  0xa7   : > { %3994 = vmatpush3.msra.mxu0 %v5266_v29  ;;  %v1640_v22 = vsel %vm453_vm5, %v1639_v13, %v1638_v49  ;;  %v1265_v35 = vsel %vm438_vm0, %v1264_v4, %v1112_v52  ;;  %v1276_v38 = vrot.slane %v5260_v36, 1  ;;  %v1492_v39 = vld [vmem:[%s4547_s13 + $0x10b] sm:$0x1]  ;;  %v1493_v40 = vld [vmem:[%s4547_s13 + $0x113] sm:$0x1]  ;;  %4035 = vmatprep.subr.mxu1 %v5245_v15  ;;  %v5284_v41 = vld [vmem:[%s6342_s2 + $0x38] sm:$0xff]  ;;  %v1331_v12 = vadd.f32 %v3508_v25, %v1263_v6 }
  0xa8   : > { %3995 = vmatprep.subr.mxu0 %v5284_v41  ;;  %v1642_v19 = vsel %vm456_vm6, %v1641_v10, %v1640_v22  ;;  %v1267_v44 = vsel %vm441_vm1, %v1266_v28, %v1265_v35  ;;  %v1494_v1 = vld [vmem:[%s4547_s13 + $0x11b] sm:$0x1]  ;;  %v1495_v46 = vld [vmem:[%s4547_s13 + $0x123] sm:$0x1]  ;;  %v1496_v47 = vld [vmem:[%s4547_s13 + $0x12b] sm:$0x1]  ;;  %4036 = vmatpush3.msra.mxu1 %v5245_v15 }
  0xa9   : > { %3996 = vmatpush3.msra.mxu0 %v5284_v41  ;;  %v1710_v42 = vadd.f32 %v3524_v43, %v1642_v19  ;;  %v1269_v50 = vsel %vm444_vm2, %v1268_v31, %v1267_v44  ;;  %v1497_v51 = vld [vmem:[%s4547_s13 + $0x133] sm:$0x1]  ;;  %v5297_v55 = vld [vmem:[%s4547_s13 + $0x13b] sm:$0x1]  ;;  %v1643_v56 = vrot.slane %v1492_v39, 7  ;;  %v1645_v57 = vrot.slane %v1493_v40, 6  ;;  %4037 = vmatprep.subr.mxu1 %v5266_v29 }
  0xaa   : > { %3926 = vmatprep.mubr.f32.mxu0 %v1330_v16  ;;  %v3509_v58 = vld [vmem:[%s4539_s11 + $0xa0] sm:$0xff]  ;;  %v1271_v17 = vsel %vm447_vm3, %v1270_v0, %v1269_v50  ;;  %v1647_v59 = vrot.slane %v1494_v1, 5  ;;  %v1649_v45 = vrot.slane %v1495_v46, 4  ;;  %v1651_v60 = vrot.slane %v1496_v47, 3  ;;  %4038 = vmatpush3.msra.mxu1 %v5266_v29  ;;  %v1121_v54 = vld [vmem:[%s4547_s13 + $0x14a] sm:$0x1] }
  0xab   : > { %v1120_v2 = vld [vmem:[%s4547_s13 + $0x142] sm:$0x1]  ;;  %3970 = vmatprep.mubr.f32.mxu1 %v1709_v18  ;;  %v1273_v61 = vsel %vm450_vm4, %v1272_v32, %v1271_v17  ;;  %v1644_v62 = vsel %vm438_vm0, %v1643_v56, %v1491_v33  ;;  %v1653_v63 = vrot.slane %v1497_v51, 2  ;;  %v1655_v5 = vrot.slane %v5297_v55, 1  ;;  %v1122_v52 = vld [vmem:[%s4547_s13 + $0x152] sm:$0x1]  ;;  %4039 = vmatprep.subr.mxu1 %v5284_v41 }
  0xac   : > { %v5313_v7 = vld [vmem:[%s6342_s2 + $0x30] sm:$0xff]  ;;  %v1275_v8 = vsel %vm453_vm5, %v1274_v37, %v1273_v61  ;;  %v1646_v11 = vsel %vm441_vm1, %v1645_v57, %v1644_v62  ;;  %v1123_v13 = vld [vmem:[%s4547_s13 + $0x15a] sm:$0x1]  ;;  %v1124_v10 = vld [vmem:[%s4547_s13 + $0x162] sm:$0x1]  ;;  %4040 = vmatpush3.msra.mxu1 %v5284_v41  ;;  %3927 = vmatmul.mubr.f32.gmra.mxu0 %v1331_v12  ;;  %v1278_v23 = vrot.slane %v1121_v54, 7 }
  0xad   : > { %3997 = vmatprep.subr.mxu0 %v5313_v7  ;;  %v1125_v30 = vld [vmem:[%s4547_s13 + $0x16a] sm:$0x1]  ;;  %v1277_v3 = vsel %vm456_vm6, %v1276_v38, %v1275_v8  ;;  %v3525_v16 = vld [vmem:[%s4539_s11 + $0xe0] sm:$0xff]  ;;  %v1648_v18 = vsel %vm444_vm2, %v1647_v59, %v1646_v11  ;;  %v1126_v20 = vld [vmem:[%s4547_s13 + $0x172] sm:$0x1]  ;;  %v1280_v24 = vrot.slane %v1122_v52, 6  ;;  %4041 = vmatprep.subr.mxu1 %v5313_v7 }
  0xae   : > { %v5327_v9 = vld [vmem:[%s4547_s13 + $0x17a] sm:$0x1]  ;;  %3971 = vmatmul.mubr.f32.gmra.mxu1 %v1710_v42  ;;  %v1332_v25 = vadd.f32 %v3509_v58, %v1277_v3  ;;  %v1650_v6 = vsel %vm447_vm3, %v1649_v45, %v1648_v18  ;;  %v1282_v26 = vrot.slane %v1123_v13, 5  ;;  %v1284_v36 = vrot.slane %v1124_v10, 4  ;;  %v1499_v4 = vld [vmem:[%s4547_s13 + $0x143] sm:$0x1]  ;;  %3998 = vmatpush3.msra.mxu0 %v5313_v7 }
  0xaf   : > { %v1500_v28 = vld [vmem:[%s4547_s13 + $0x14b] sm:$0x1]  ;;  %4042 = vmatpush3.msra.mxu1 %v5313_v7  ;;  %v1652_v43 = vsel %vm450_vm4, %v1651_v60, %v1650_v6  ;;  %v1279_v49 = vsel %vm438_vm0, %v1278_v23, %v1120_v2  ;;  %v1286_v31 = vrot.slane %v1125_v30, 3  ;;  %v1288_v0 = vrot.slane %v1126_v20, 2  ;;  %v1501_v32 = vld [vmem:[%s4547_s13 + $0x153] sm:$0x1] }
  0xb0   : > { %v1502_v33 = vld [vmem:[%s4547_s13 + $0x15b] sm:$0x1]  ;;  %v5342_v22 = vld [vmem:[%s6342_s2 + $0x28] sm:$0xff]  ;;  %v1654_v35 = vsel %vm453_vm5, %v1653_v63, %v1652_v43  ;;  %v1281_v37 = vsel %vm441_vm1, %v1280_v24, %v1279_v49  ;;  %v1290_v38 = vrot.slane %v5327_v9, 1  ;;  %v1503_v39 = vld [vmem:[%s4547_s13 + $0x163] sm:$0x1]  ;;  %3929 = vmatprep.mubr.f32.mxu0 %v1332_v25 }
  0xb1   : > { %3999 = vmatprep.subr.mxu0 %v5342_v22  ;;  %4043 = vmatprep.subr.mxu1 %v5342_v22  ;;  %v1504_v40 = vld [vmem:[%s4547_s13 + $0x16b] sm:$0x1]  ;;  %v1657_v12 = vrot.slane %v1500_v28, 7  ;;  %v1656_v19 = vsel %vm456_vm6, %v1655_v5, %v1654_v35  ;;  %v1283_v44 = vsel %vm444_vm2, %v1282_v26, %v1281_v37  ;;  %v1505_v1 = vld [vmem:[%s4547_s13 + $0x173] sm:$0x1]  ;;  %v1659_v47 = vrot.slane %v1501_v32, 6 }
  0xb2   : > { %4000 = vmatpush3.msra.mxu0 %v5342_v22  ;;  %4044 = vmatpush3.msra.mxu1 %v5342_v22  ;;  %v1506_v46 = vld [vmem:[%s4547_s13 + $0x17b] sm:$0x1]  ;;  %v1661_v42 = vrot.slane %v1502_v33, 5  ;;  %v1711_v50 = vadd.f32 %v3525_v16, %v1656_v19  ;;  %v5360_v51 = vld [vmem:[%s6342_s2 + $0x20] sm:$0xff]  ;;  %v3510_v55 = vld [vmem:[%s4539_s11 + $0xa8] sm:$0xff]  ;;  %v1285_v56 = vsel %vm447_vm3, %v1284_v36, %v1283_v44  ;;  %v1663_v58 = vrot.slane %v1503_v39, 4 }
  0xb3   : > { %4001 = vmatprep.subr.mxu0 %v5360_v51  ;;  %v1658_v57 = vsel %vm438_vm0, %v1657_v12, %v1499_v4  ;;  %v1128_v17 = vld [vmem:[%s4547_s13 + $0x182] sm:$0x1]  ;;  %v1129_v59 = vld [vmem:[%s4547_s13 + $0x18a] sm:$0x1]  ;;  %4045 = vmatprep.subr.mxu1 %v5360_v51  ;;  %v1287_v45 = vsel %vm450_vm4, %v1286_v31, %v1285_v56  ;;  %v1665_v2 = vrot.slane %v1504_v40, 3  ;;  %v1667_v61 = vrot.slane %v1505_v1, 2 }
  0xb4   : > { %v1660_v60 = vsel %vm441_vm1, %v1659_v47, %v1658_v57  ;;  %4002 = vmatpush3.msra.mxu0 %v5360_v51  ;;  %v1130_v62 = vld [vmem:[%s4547_s13 + $0x192] sm:$0x1]  ;;  %v1131_v63 = vld [vmem:[%s4547_s13 + $0x19a] sm:$0x1]  ;;  %3973 = vmatprep.mubr.f32.mxu1 %v1711_v50  ;;  %v1289_v5 = vsel %vm453_vm5, %v1288_v0, %v1287_v45  ;;  %v1669_v52 = vrot.slane %v1506_v46, 1  ;;  %v1292_v13 = vrot.slane %v1129_v59, 7 }
  0xb5   : > { %v1662_v54 = vsel %vm444_vm2, %v1661_v42, %v1660_v60  ;;  %4046 = vmatpush3.msra.mxu1 %v5360_v51  ;;  %v1132_v8 = vld [vmem:[%s4547_s13 + $0x1a2] sm:$0x1]  ;;  %v1133_v11 = vld [vmem:[%s4547_s13 + $0x1aa] sm:$0x1]  ;;  %v1291_v10 = vsel %vm456_vm6, %v1290_v38, %v1289_v5  ;;  %v5384_v3 = vld [vmem:[%s6342_s2 + $0x18] sm:$0xff]  ;;  %v1294_v20 = vrot.slane %v1130_v62, 6 }
  0xb6   : > { %v1664_v30 = vsel %vm447_vm3, %v1663_v58, %v1662_v54  ;;  %4003 = vmatprep.subr.mxu0 %v5384_v3  ;;  %4047 = vmatprep.subr.mxu1 %v5384_v3  ;;  %v1134_v16 = vld [vmem:[%s4547_s13 + $0x1b2] sm:$0x1]  ;;  %v1135_v18 = vld [vmem:[%s4547_s13 + $0x1ba] sm:$0x1]  ;;  %v1296_v9 = vrot.slane %v1131_v63, 5  ;;  %v1333_v23 = vadd.f32 %v3510_v55, %v1291_v10  ;;  %v3526_v24 = vld [vmem:[%s4539_s11 + $0xe8] sm:$0xff]  ;;  %v1293_v6 = vsel %vm438_vm0, %v1292_v13, %v1128_v17 }
  0xb7   : > { %v1666_v25 = vsel %vm450_vm4, %v1665_v2, %v1664_v30  ;;  %4004 = vmatpush3.msra.mxu0 %v5384_v3  ;;  %4048 = vmatpush3.msra.mxu1 %v5384_v3  ;;  %v1298_v26 = vrot.slane %v1132_v8, 4  ;;  %v1507_v36 = vld [vmem:[%s4547_s13 + $0x183] sm:$0x1]  ;;  %v1508_v4 = vld [vmem:[%s4547_s13 + $0x18b] sm:$0x1]  ;;  %v1295_v43 = vsel %vm441_vm1, %v1294_v20, %v1293_v6  ;;  %v1300_v49 = vrot.slane %v1133_v11, 3 }
  0xb8   : > { %v1668_v28 = vsel %vm453_vm5, %v1667_v61, %v1666_v25  ;;  %v1302_v31 = vrot.slane %v1134_v16, 2  ;;  %v1509_v0 = vld [vmem:[%s4547_s13 + $0x193] sm:$0x1]  ;;  %v1510_v32 = vld [vmem:[%s4547_s13 + $0x19b] sm:$0x1]  ;;  %3930 = vmatmul.mubr.f32.gmra.mxu0 %v1333_v23  ;;  %v1297_v38 = vsel %vm444_vm2, %v1296_v9, %v1295_v43  ;;  %v1304_v39 = vrot.slane %v1135_v18, 1 }
  0xb9   : > { %v5404_v33 = vld [vmem:[%s6342_s2 + $0x10] sm:$0xff]  ;;  %v1670_v35 = vsel %vm456_vm6, %v1669_v52, %v1668_v28  ;;  %v1511_v40 = vld [vmem:[%s4547_s13 + $0x1a3] sm:$0x1]  ;;  %v1512_v12 = vld [vmem:[%s4547_s13 + $0x1ab] sm:$0x1]  ;;  %v1671_v19 = vrot.slane %v1508_v4, 7  ;;  %v1299_v1 = vsel %vm447_vm3, %v1298_v26, %v1297_v38 }
  0xba   : > { %4005 = vmatprep.subr.mxu0 %v5404_v33  ;;  %4049 = vmatprep.subr.mxu1 %v5404_v33  ;;  %v3511_v37 = vld [vmem:[%s4539_s11 + $0xb0] sm:$0xff]  ;;  %v1712_v44 = vadd.f32 %v3526_v24, %v1670_v35  ;;  %v1514_v47 = vld [vmem:[%s4547_s13 + $0x1bb] sm:$0x1]  ;;  %v1673_v42 = vrot.slane %v1509_v0, 6  ;;  %v1675_v50 = vrot.slane %v1510_v32, 5  ;;  %v5421_v55 = vld [vmem:[%s6342_s2 + $0x8] sm:$0xff]  ;;  %v1301_v56 = vsel %vm450_vm4, %v1300_v49, %v1299_v1 }
  0xbb   : > { %4050 = vmatpush3.msra.mxu1 %v5404_v33  ;;  %v1513_v46 = vld [vmem:[%s4547_s13 + $0x1b3] sm:$0x1]  ;;  %4006 = vmatpush3.msra.mxu0 %v5404_v33  ;;  %v1672_v57 = vsel %vm438_vm0, %v1671_v19, %v1507_v36  ;;  %v1677_v58 = vrot.slane %v1511_v40, 4  ;;  %v1679_v17 = vrot.slane %v1512_v12, 3  ;;  %v1136_v59 = vld [vmem:[%s4547_s13 + $0x1c2] sm:$0x1]  ;;  %v1303_v60 = vsel %vm453_vm5, %v1302_v31, %v1301_v56 }
  0xbc   : > { %4051 = vmatprep.subr.mxu1 %v5421_v55  ;;  %v1137_v45 = vld [vmem:[%s4547_s13 + $0x1ca] sm:$0x1]  ;;  %4007 = vmatprep.subr.mxu0 %v5421_v55  ;;  %v1674_v2 = vsel %vm441_vm1, %v1673_v42, %v1672_v57  ;;  %v1681_v61 = vrot.slane %v1513_v46, 2  ;;  %v1683_v62 = vrot.slane %v1514_v47, 1  ;;  %v1138_v63 = vld [vmem:[%s4547_s13 + $0x1d2] sm:$0x1]  ;;  %v1305_v54 = vsel %vm456_vm6, %v1304_v39, %v1303_v60 }
  0xbd   : > { %4052 = vmatpush3.msra.mxu1 %v5421_v55  ;;  %v1139_v5 = vld [vmem:[%s4547_s13 + $0x1da] sm:$0x1]  ;;  %4008 = vmatpush3.msra.mxu0 %v5421_v55  ;;  %v1676_v52 = vsel %vm444_vm2, %v1675_v50, %v1674_v2  ;;  %v1140_v8 = vld [vmem:[%s4547_s13 + $0x1e2] sm:$0x1]  ;;  %v1141_v11 = vld [vmem:[%s4547_s13 + $0x1ea] sm:$0x1]  ;;  %v1334_v30 = vadd.f32 %v3511_v37, %v1305_v54 }
  0xbe   : > { %3974 = vmatmul.mubr.f32.gmra.mxu1 %v1712_v44  ;;  %v1142_v13 = vld [vmem:[%s4547_s13 + $0x1f2] sm:$0x1]  ;;  %v5443_v10 = vld [vmem:[%s6342_s2] sm:$0xff]  ;;  %v1678_v16 = vsel %vm447_vm3, %v1677_v58, %v1676_v52  ;;  %v1143_v18 = vld [vmem:[%s4547_s13 + $0x1fa] sm:$0x1]  ;;  %v1306_v20 = vrot.slane %v1137_v45, 7 }
  0xbf   : > { %4009 = vmatprep.subr.mxu0 %v5443_v10  ;;  %4053 = vmatprep.subr.mxu1 %v5443_v10  ;;  %v1308_v9 = vrot.slane %v1138_v63, 6  ;;  %v3527_v23 = vld [vmem:[%s4539_s11 + $0xf0] sm:$0xff]  ;;  %v1680_v24 = vsel %vm450_vm4, %v1679_v17, %v1678_v16  ;;  %v1310_v25 = vrot.slane %v1139_v5, 5  ;;  %v1312_v6 = vrot.slane %v1140_v8, 4  ;;  %v1515_v36 = vld [vmem:[%s4547_s13 + $0x1c3] sm:$0x1] }
  0xc0   : > { %4010 = vmatpush3.msra.mxu0 %v5443_v10  ;;  %4054 = vmatpush3.msra.mxu1 %v5443_v10  ;;  %v1314_v26 = vrot.slane %v1141_v11, 3  ;;  %v1682_v4 = vsel %vm453_vm5, %v1681_v61, %v1680_v24  ;;  %v1307_v28 = vsel %vm438_vm0, %v1306_v20, %v1136_v59  ;;  %v1316_v43 = vrot.slane %v1142_v13, 2  ;;  %v1516_v31 = vld [vmem:[%s4547_s13 + $0x1cb] sm:$0x1]  ;;  %v1517_v0 = vld [vmem:[%s4547_s13 + $0x1d3] sm:$0x1] }
  0xc1   : > { %4067 = vmatprep.subr.mxu0 %v5063_v21  ;;  %4111 = vmatprep.subr.mxu1 %v5063_v21  ;;  %v1318_v49 = vrot.slane %v1143_v18, 1  ;;  %v1684_v32 = vsel %vm456_vm6, %v1683_v62, %v1682_v4  ;;  %v1309_v35 = vsel %vm441_vm1, %v1308_v9, %v1307_v28  ;;  %v1518_v37 = vld [vmem:[%s4547_s13 + $0x1db] sm:$0x1]  ;;  %v1519_v38 = vld [vmem:[%s4547_s13 + $0x1e3] sm:$0x1]  ;;  %v1685_v44 = vrot.slane %v1516_v31, 7 }
  0xc2   : > { %3932 = vmatprep.mubr.f32.mxu0 %v1334_v30  ;;  %v1520_v39 = vld [vmem:[%s4547_s13 + $0x1eb] sm:$0x1]  ;;  %v1713_v21 = vadd.f32 %v3527_v23, %v1684_v32  ;;  %v1311_v40 = vsel %vm444_vm2, %v1310_v25, %v1309_v35  ;;  %v1521_v12 = vld [vmem:[%s4547_s13 + $0x1f3] sm:$0x1]  ;;  %v1522_v19 = vld [vmem:[%s4547_s13 + $0x1fb] sm:$0x1] }
  0xc3   : > { %v1687_v1 = vrot.slane %v1517_v0, 6  ;;  %v3512_v46 = vld [vmem:[%s4539_s11 + $0xb8] sm:$0xff]  ;;  %v1313_v47 = vsel %vm447_vm3, %v1312_v6, %v1311_v40  ;;  %v1689_v42 = vrot.slane %v1518_v37, 5  ;;  %v1691_v50 = vrot.slane %v1519_v38, 4  ;;  %v1838_v57 = vld [vmem:[%s4547_s13 + $0x4] sm:$0x1] }
  0xc4   : > { %v1693_v56 = vrot.slane %v1520_v39, 3  ;;  %3976 = vmatprep.mubr.f32.mxu1 %v1713_v21  ;;  %v1315_v58 = vsel %vm450_vm4, %v1314_v26, %v1313_v47  ;;  %v1686_v17 = vsel %vm438_vm0, %v1685_v44, %v1515_v36  ;;  %v1695_v59 = vrot.slane %v1521_v12, 2  ;;  %v1839_v60 = vld [vmem:[%s4547_s13 + $0xc] sm:$0x1]  ;;  %v1840_v2 = vld [vmem:[%s4547_s13 + $0x14] sm:$0x1] }
  0xc5   : > { %v1697_v45 = vrot.slane %v1522_v19, 1  ;;  %v1317_v61 = vsel %vm453_vm5, %v1316_v43, %v1315_v58  ;;  %v1688_v62 = vsel %vm441_vm1, %v1687_v1, %v1686_v17  ;;  %v1841_v63 = vld [vmem:[%s4547_s13 + $0x1c] sm:$0x1]  ;;  %v1842_v5 = vld [vmem:[%s4547_s13 + $0x24] sm:$0x1]  ;;  %v1966_v16 = vrot.slane %v1839_v60, 7 }
  0xc6   : > { %v1843_v54 = vld [vmem:[%s4547_s13 + $0x2c] sm:$0x1]  ;;  %v1319_v52 = vsel %vm456_vm6, %v1318_v49, %v1317_v61  ;;  %v3528_v8 = vld [vmem:[%s4539_s11 + $0xf8] sm:$0xff]  ;;  %v1690_v11 = vsel %vm444_vm2, %v1689_v42, %v1688_v62  ;;  %v1844_v13 = vld [vmem:[%s4547_s13 + $0x34] sm:$0x1]  ;;  %v1968_v18 = vrot.slane %v1840_v2, 6 }
  0xc7   : > { %v1845_v30 = vld [vmem:[%s4547_s13 + $0x3c] sm:$0x1]  ;;  %v1335_v20 = vadd.f32 %v3512_v46, %v1319_v52  ;;  %v1692_v9 = vsel %vm447_vm3, %v1691_v50, %v1690_v11  ;;  %v1970_v23 = vrot.slane %v1841_v63, 5  ;;  %v1972_v24 = vrot.slane %v1842_v5, 4  ;;  %v2217_v25 = vld [vmem:[%s4547_s13 + $0x5] sm:$0x1] }
  0xc8   : > { %v2218_v6 = vld [vmem:[%s4547_s13 + $0xd] sm:$0x1]  ;;  %v1694_v26 = vsel %vm450_vm4, %v1693_v56, %v1692_v9  ;;  %v1967_v36 = vsel %vm438_vm0, %v1966_v16, %v1838_v57  ;;  %v1974_v4 = vrot.slane %v1843_v54, 3  ;;  %v1976_v28 = vrot.slane %v1844_v13, 2  ;;  %v2219_v43 = vld [vmem:[%s4547_s13 + $0x15] sm:$0x1] }
  0xc9   : > { %v2220_v49 = vld [vmem:[%s4547_s13 + $0x1d] sm:$0x1]  ;;  %3933 = vmatmul.mubr.f32.gmra.mxu0 %v1335_v20  ;;  %v1696_v31 = vsel %vm453_vm5, %v1695_v59, %v1694_v26  ;;  %v1969_v0 = vsel %vm441_vm1, %v1968_v18, %v1967_v36  ;;  %v1978_v32 = vrot.slane %v1845_v30, 1  ;;  %v2221_v35 = vld [vmem:[%s4547_s13 + $0x25] sm:$0x1]  ;;  %v2345_v38 = vrot.slane %v2218_v6, 7 }
  0xca   : > { %v2222_v37 = vld [vmem:[%s4547_s13 + $0x2d] sm:$0x1]  ;;  %v1698_v39 = vsel %vm456_vm6, %v1697_v45, %v1696_v31  ;;  %v1971_v21 = vsel %vm444_vm2, %v1970_v23, %v1969_v0  ;;  %v2223_v40 = vld [vmem:[%s4547_s13 + $0x35] sm:$0x1]  ;;  %v2224_v12 = vld [vmem:[%s4547_s13 + $0x3d] sm:$0x1] }
  0xcb   : > { %v2347_v19 = vrot.slane %v2219_v43, 6  ;;  %v2349_v44 = vrot.slane %v2220_v49, 5  ;;  %v1714_v1 = vadd.f32 %v3528_v8, %v1698_v39  ;;  %v3537_v46 = vld [vmem:[%s4539_s11 + $0x100] sm:$0xff]  ;;  %v1973_v47 = vsel %vm447_vm3, %v1972_v24, %v1971_v21  ;;  %v1847_v57 = vld [vmem:[%s4547_s13 + $0x4c] sm:$0x1] }
  0xcc   : > { %v2346_v42 = vsel %vm438_vm0, %v2345_v38, %v2217_v25  ;;  %v2351_v50 = vrot.slane %v2221_v35, 4  ;;  %v1846_v56 = vld [vmem:[%s4547_s13 + $0x44] sm:$0x1]  ;;  %v1975_v58 = vsel %vm450_vm4, %v1974_v4, %v1973_v47  ;;  %v2353_v59 = vrot.slane %v2222_v37, 3  ;;  %v1848_v60 = vld [vmem:[%s4547_s13 + $0x54] sm:$0x1] }
  0xcd   : > { %v2348_v17 = vsel %vm441_vm1, %v2347_v19, %v2346_v42  ;;  %v2355_v45 = vrot.slane %v2223_v40, 2  ;;  %v1849_v2 = vld [vmem:[%s4547_s13 + $0x5c] sm:$0x1]  ;;  %3977 = vmatmul.mubr.f32.gmra.mxu1 %v1714_v1  ;;  %v1977_v61 = vsel %vm453_vm5, %v1976_v28, %v1975_v58  ;;  %v2357_v63 = vrot.slane %v2224_v12, 1  ;;  %v1850_v5 = vld [vmem:[%s4547_s13 + $0x64] sm:$0x1] }
  0xce   : > { %v2350_v62 = vsel %vm444_vm2, %v2349_v44, %v2348_v17  ;;  %v1851_v54 = vld [vmem:[%s4547_s13 + $0x6c] sm:$0x1]  ;;  %v1980_v52 = vrot.slane %v1847_v57, 7  ;;  %v1979_v8 = vsel %vm456_vm6, %v1978_v32, %v1977_v61  ;;  %v1852_v13 = vld [vmem:[%s4547_s13 + $0x74] sm:$0x1]  ;;  %v1982_v16 = vrot.slane %v1848_v60, 6 }
  0xcf   : > { %v2352_v11 = vsel %vm447_vm3, %v2351_v50, %v2350_v62  ;;  %v1853_v30 = vld [vmem:[%s4547_s13 + $0x7c] sm:$0x1]  ;;  %v1984_v18 = vrot.slane %v1849_v2, 5  ;;  %v2086_v20 = vadd.f32 %v3537_v46, %v1979_v8  ;;  %v3553_v9 = vld [vmem:[%s4539_s11 + $0x140] sm:$0xff]  ;;  %v1986_v25 = vrot.slane %v1850_v5, 4  ;;  %v3538_v32 = vld [vmem:[%s4539_s11 + $0x108] sm:$0xff] }
  0xd0   : > { %v2354_v23 = vsel %vm450_vm4, %v2353_v59, %v2352_v11  ;;  %v1981_v24 = vsel %vm438_vm0, %v1980_v52, %v1846_v56  ;;  %v2225_v6 = vld [vmem:[%s4547_s13 + $0x45] sm:$0x1]  ;;  %v2226_v26 = vld [vmem:[%s4547_s13 + $0x4d] sm:$0x1]  ;;  %v1988_v28 = vrot.slane %v1851_v54, 3  ;;  %v1990_v43 = vrot.slane %v1852_v13, 2 }
  0xd1   : > { %v2356_v36 = vsel %vm453_vm5, %v2355_v45, %v2354_v23  ;;  %v1983_v4 = vsel %vm441_vm1, %v1982_v16, %v1981_v24  ;;  %v2227_v49 = vld [vmem:[%s4547_s13 + $0x55] sm:$0x1]  ;;  %v2228_v31 = vld [vmem:[%s4547_s13 + $0x5d] sm:$0x1]  ;;  %4011 = vmatprep.mubr.f32.mxu0 %v2086_v20  ;;  %v1992_v37 = vrot.slane %v1853_v30, 1  ;;  %v2359_v21 = vrot.slane %v2226_v26, 7 }
  0xd2   : > { %v2358_v0 = vsel %vm456_vm6, %v2357_v63, %v2356_v36  ;;  %v1985_v35 = vsel %vm444_vm2, %v1984_v18, %v1983_v4  ;;  %v2229_v38 = vld [vmem:[%s4547_s13 + $0x65] sm:$0x1]  ;;  %v2230_v39 = vld [vmem:[%s4547_s13 + $0x6d] sm:$0x1]  ;;  %v2231_v19 = vld [vmem:[%s4547_s13 + $0x75] sm:$0x1] }
  0xd3   : > { %v2465_v40 = vadd.f32 %v3553_v9, %v2358_v0  ;;  %v1987_v12 = vsel %vm447_vm3, %v1986_v25, %v1985_v35  ;;  %v2232_v44 = vld [vmem:[%s4547_s13 + $0x7d] sm:$0x1]  ;;  %v2361_v1 = vrot.slane %v2227_v49, 6  ;;  %v2363_v46 = vrot.slane %v2228_v31, 5  ;;  %v1854_v57 = vld [vmem:[%s4547_s13 + $0x84] sm:$0x1] }
  0xd4   : > { %v1989_v47 = vsel %vm450_vm4, %v1988_v28, %v1987_v12  ;;  %v2360_v42 = vsel %vm438_vm0, %v2359_v21, %v2225_v6  ;;  %v2365_v50 = vrot.slane %v2229_v38, 4  ;;  %v2367_v56 = vrot.slane %v2230_v39, 3  ;;  %v1855_v58 = vld [vmem:[%s4547_s13 + $0x8c] sm:$0x1]  ;;  %v1856_v2 = vld [vmem:[%s4547_s13 + $0x94] sm:$0x1] }
  0xd5   : > { %4055 = vmatprep.mubr.f32.mxu1 %v2465_v40  ;;  %v1991_v17 = vsel %vm453_vm5, %v1990_v43, %v1989_v47  ;;  %v2362_v59 = vsel %vm441_vm1, %v2361_v1, %v2360_v42  ;;  %v2369_v45 = vrot.slane %v2231_v19, 2  ;;  %v2371_v60 = vrot.slane %v2232_v44, 1  ;;  %v1857_v61 = vld [vmem:[%s4547_s13 + $0x9c] sm:$0x1]  ;;  %v1858_v5 = vld [vmem:[%s4547_s13 + $0xa4] sm:$0x1] }
  0xd6   : > { %v1993_v62 = vsel %vm456_vm6, %v1992_v37, %v1991_v17  ;;  %v2364_v63 = vsel %vm444_vm2, %v2363_v46, %v2362_v59  ;;  %v1859_v54 = vld [vmem:[%s4547_s13 + $0xac] sm:$0x1]  ;;  %v1860_v52 = vld [vmem:[%s4547_s13 + $0xb4] sm:$0x1]  ;;  %v1861_v13 = vld [vmem:[%s4547_s13 + $0xbc] sm:$0x1] }
  0xd7   : > { %v2087_v8 = vadd.f32 %v3538_v32, %v1993_v62  ;;  %v2366_v11 = vsel %vm447_vm3, %v2365_v50, %v2364_v63  ;;  %v1994_v30 = vrot.slane %v1855_v58, 7  ;;  %v1996_v16 = vrot.slane %v1856_v2, 6  ;;  %v3554_v18 = vld [vmem:[%s4539_s11 + $0x148] sm:$0xff]  ;;  %v2233_v25 = vld [vmem:[%s4547_s13 + $0x85] sm:$0x1]  ;;  %v4243_v31 = vld [vmem:[%s6342_s2 + $0x78] sm:$0xff] }
  0xd8   : > { %v2368_v20 = vsel %vm450_vm4, %v2367_v56, %v2366_v11  ;;  %v1998_v9 = vrot.slane %v1857_v61, 5  ;;  %v2000_v23 = vrot.slane %v1858_v5, 4  ;;  %v2002_v24 = vrot.slane %v1859_v54, 3  ;;  %v2234_v28 = vld [vmem:[%s4547_s13 + $0x8d] sm:$0x1]  ;;  %v3539_v44 = vld [vmem:[%s4539_s11 + $0x110] sm:$0xff] }
  0xd9   : > { %4012 = vmatmul.mubr.f32.vlgmr.msra.gmra.mxu0 %v2087_v8  ;;  %v2370_v6 = vsel %vm453_vm5, %v2369_v45, %v2368_v20  ;;  %v1995_v26 = vsel %vm438_vm0, %v1994_v30, %v1854_v57  ;;  %v2004_v36 = vrot.slane %v1860_v52, 2  ;;  %v2006_v4 = vrot.slane %v1861_v13, 1  ;;  %v2235_v43 = vld [vmem:[%s4547_s13 + $0x95] sm:$0x1]  ;;  %v2236_v32 = vld [vmem:[%s4547_s13 + $0x9d] sm:$0x1] }
  0xda   : > { %v2372_v49 = vsel %vm456_vm6, %v2371_v60, %v2370_v6  ;;  %4068 = vmatpush3.msra.mxu0 %v4243_v31  ;;  %v1997_v0 = vsel %vm441_vm1, %v1996_v16, %v1995_v26  ;;  %v2237_v35 = vld [vmem:[%s4547_s13 + $0xa5] sm:$0x1]  ;;  %v2238_v37 = vld [vmem:[%s4547_s13 + $0xad] sm:$0x1]  ;;  %v2239_v21 = vld [vmem:[%s4547_s13 + $0xb5] sm:$0x1] }
  0xdb   : > { %v2466_v38 = vadd.f32 %v3554_v18, %v2372_v49  ;;  %4069 = vmatprep.subr.mxu0 %v5155_v14  ;;  %v1999_v39 = vsel %vm444_vm2, %v1998_v9, %v1997_v0  ;;  %v2240_v40 = vld [vmem:[%s4547_s13 + $0xbd] sm:$0x1]  ;;  %v2373_v12 = vrot.slane %v2234_v28, 7  ;;  %v2375_v19 = vrot.slane %v2235_v43, 6  ;;  %v1862_v50 = vld [vmem:[%s4547_s13 + $0xc4] sm:$0x1] }
  0xdc   : > { %4070 = vmatpush3.msra.mxu0 %v5155_v14  ;;  %v2001_v1 = vsel %vm447_vm3, %v2000_v23, %v1999_v39  ;;  %v2377_v46 = vrot.slane %v2236_v32, 5  ;;  %v2379_v47 = vrot.slane %v2237_v35, 4  ;;  %v2381_v42 = vrot.slane %v2238_v37, 3  ;;  %v1863_v59 = vld [vmem:[%s4547_s13 + $0xcc] sm:$0x1]  ;;  %v3555_v54 = vld [vmem:[%s4539_s11 + $0x150] sm:$0xff] }
  0xdd   : > { %4056 = vmatmul.mubr.f32.vlgmr.msra.gmra.mxu1 %v2466_v38  ;;  %4071 = vmatprep.subr.mxu0 %v5170_v27  ;;  %v2003_v56 = vsel %vm450_vm4, %v2002_v24, %v2001_v1  ;;  %v2374_v57 = vsel %vm438_vm0, %v2373_v12, %v2233_v25  ;;  %v2383_v58 = vrot.slane %v2239_v21, 2  ;;  %v2385_v17 = vrot.slane %v2240_v40, 1  ;;  %v1864_v45 = vld [vmem:[%s4547_s13 + $0xd4] sm:$0x1]  ;;  %v1865_v61 = vld [vmem:[%s4547_s13 + $0xdc] sm:$0x1] }
  0xde   : > { %4112 = vmatpush3.msra.mxu1 %v4243_v31  ;;  %4072 = vmatpush3.msra.mxu0 %v5170_v27  ;;  %v2005_v60 = vsel %vm453_vm5, %v2004_v36, %v2003_v56  ;;  %v2376_v2 = vsel %vm441_vm1, %v2375_v19, %v2374_v57  ;;  %v1866_v62 = vld [vmem:[%s4547_s13 + $0xe4] sm:$0x1]  ;;  %v1867_v63 = vld [vmem:[%s4547_s13 + $0xec] sm:$0x1]  ;;  %v1868_v8 = vld [vmem:[%s4547_s13 + $0xf4] sm:$0x1] }
  0xdf   : > { %4113 = vmatprep.subr.mxu1 %v5155_v14  ;;  %4073 = vmatprep.subr.mxu0 %v5189_v34  ;;  %v2007_v5 = vsel %vm456_vm6, %v2006_v4, %v2005_v60  ;;  %v2378_v52 = vsel %vm444_vm2, %v2377_v46, %v2376_v2  ;;  %v5590_v11 = vld [vmem:[%s4547_s13 + $0xfc] sm:$0x1]  ;;  %v2008_v13 = vrot.slane %v1863_v59, 7  ;;  %v2010_v30 = vrot.slane %v1864_v45, 6  ;;  %v2241_v23 = vld [vmem:[%s4547_s13 + $0xc5] sm:$0x1] }
  0xe0   : > { %4114 = vmatpush3.msra.mxu1 %v5155_v14  ;;  %4074 = vmatpush3.msra.mxu0 %v5189_v34  ;;  %v5594_v16 = vadd.f32 %v3539_v44, %v2007_v5  ;;  %v2380_v18 = vsel %vm447_vm3, %v2379_v47, %v2378_v52  ;;  %v2012_v20 = vrot.slane %v1865_v61, 5  ;;  %v2014_v9 = vrot.slane %v1866_v62, 4  ;;  %v2242_v24 = vld [vmem:[%s4547_s13 + $0xcd] sm:$0x1]  ;;  %v2243_v36 = vld [vmem:[%s4547_s13 + $0xd5] sm:$0x1] }
  0xe1   : > { %4115 = vmatprep.subr.mxu1 %v5170_v27  ;;  %4075 = vmatprep.subr.mxu0 %v5208_v48  ;;  %v2382_v25 = vsel %vm450_vm4, %v2381_v42, %v2380_v18  ;;  %v2009_v14 = vsel %vm438_vm0, %v2008_v13, %v1862_v50  ;;  %v2016_v6 = vrot.slane %v1867_v63, 3  ;;  %v2018_v26 = vrot.slane %v1868_v8, 2  ;;  %v2244_v4 = vld [vmem:[%s4547_s13 + $0xdd] sm:$0x1]  ;;  %v2245_v31 = vld [vmem:[%s4547_s13 + $0xe5] sm:$0x1] }
  0xe2   : > { %4116 = vmatpush3.msra.mxu1 %v5170_v27  ;;  %4076 = vmatpush3.msra.mxu0 %v5208_v48  ;;  %v2384_v28 = vsel %vm453_vm5, %v2383_v58, %v2382_v25  ;;  %v2011_v43 = vsel %vm441_vm1, %v2010_v30, %v2009_v14  ;;  %v2020_v49 = vrot.slane %v5590_v11, 1  ;;  %v2246_v0 = vld [vmem:[%s4547_s13 + $0xed] sm:$0x1]  ;;  %v2387_v32 = vrot.slane %v2242_v24, 7  ;;  %v2247_v37 = vld [vmem:[%s4547_s13 + $0xf5] sm:$0x1] }
  0xe3   : > { %4117 = vmatprep.subr.mxu1 %v5189_v34  ;;  %4077 = vmatprep.subr.mxu0 %v5228_v53  ;;  %v2386_v27 = vsel %vm456_vm6, %v2385_v17, %v2384_v28  ;;  %v2013_v35 = vsel %vm444_vm2, %v2012_v20, %v2011_v43  ;;  %v2248_v38 = vld [vmem:[%s4547_s13 + $0xfd] sm:$0x1]  ;;  %v2389_v39 = vrot.slane %v2243_v36, 6  ;;  %v2391_v21 = vrot.slane %v2244_v4, 5  ;;  %v1870_v46 = vld [vmem:[%s4547_s13 + $0x104] sm:$0x1] }
  0xe4   : > { %4118 = vmatpush3.msra.mxu1 %v5189_v34  ;;  %4078 = vmatpush3.msra.mxu0 %v5228_v53  ;;  %v2467_v40 = vadd.f32 %v3555_v54, %v2386_v27  ;;  %v3540_v12 = vld [vmem:[%s4539_s11 + $0x118] sm:$0xff]  ;;  %v2015_v19 = vsel %vm447_vm3, %v2014_v9, %v2013_v35  ;;  %v2388_v44 = vsel %vm438_vm0, %v2387_v32, %v2241_v23  ;;  %v2393_v1 = vrot.slane %v2245_v31, 4  ;;  %v1871_v47 = vld [vmem:[%s4547_s13 + $0x10c] sm:$0x1]  ;;  %v1872_v57 = vld [vmem:[%s4547_s13 + $0x114] sm:$0x1] }
  0xe5   : > { %4119 = vmatprep.subr.mxu1 %v5208_v48  ;;  %4079 = vmatprep.subr.mxu0 %v5245_v15  ;;  %v2017_v34 = vsel %vm450_vm4, %v2016_v6, %v2015_v19  ;;  %v2390_v42 = vsel %vm441_vm1, %v2389_v39, %v2388_v44  ;;  %v2395_v50 = vrot.slane %v2246_v0, 3  ;;  %v2397_v56 = vrot.slane %v2247_v37, 2  ;;  %v1873_v58 = vld [vmem:[%s4547_s13 + $0x11c] sm:$0x1]  ;;  %v1874_v60 = vld [vmem:[%s4547_s13 + $0x124] sm:$0x1] }
  0xe6   : > { %4120 = vmatpush3.msra.mxu1 %v5208_v48  ;;  %4080 = vmatpush3.msra.mxu0 %v5245_v15  ;;  %v2019_v17 = vsel %vm453_vm5, %v2018_v26, %v2017_v34  ;;  %v2392_v59 = vsel %vm444_vm2, %v2391_v21, %v2390_v42  ;;  %v2399_v45 = vrot.slane %v2248_v38, 1  ;;  %v1875_v2 = vld [vmem:[%s4547_s13 + $0x12c] sm:$0x1]  ;;  %v2022_v61 = vrot.slane %v1871_v47, 7  ;;  %v1876_v63 = vld [vmem:[%s4547_s13 + $0x134] sm:$0x1] }
  0xe7   : > { %4121 = vmatprep.subr.mxu1 %v5228_v53  ;;  %4081 = vmatprep.subr.mxu0 %v5266_v29  ;;  %v2021_v62 = vsel %vm456_vm6, %v2020_v49, %v2019_v17  ;;  %v2394_v48 = vsel %vm447_vm3, %v2393_v1, %v2392_v59  ;;  %v1877_v5 = vld [vmem:[%s4547_s13 + $0x13c] sm:$0x1]  ;;  %v2024_v54 = vrot.slane %v1872_v57, 6  ;;  %v2026_v52 = vrot.slane %v1873_v58, 5  ;;  %v2249_v20 = vld [vmem:[%s4547_s13 + $0x105] sm:$0x1] }
  0xe8   : > { %4122 = vmatpush3.msra.mxu1 %v5228_v53  ;;  %4082 = vmatpush3.msra.mxu0 %v5266_v29  ;;  %v2089_v8 = vadd.f32 %v3540_v12, %v2021_v62  ;;  %v3556_v11 = vld [vmem:[%s4539_s11 + $0x158] sm:$0xff]  ;;  %v2396_v13 = vsel %vm450_vm4, %v2395_v50, %v2394_v48  ;;  %v2023_v30 = vsel %vm438_vm0, %v2022_v61, %v1870_v46  ;;  %v2028_v18 = vrot.slane %v1874_v60, 4  ;;  %v2250_v9 = vld [vmem:[%s4547_s13 + $0x10d] sm:$0x1]  ;;  %v2251_v14 = vld [vmem:[%s4547_s13 + $0x115] sm:$0x1] }
  0xe9   : > { %4123 = vmatprep.subr.mxu1 %v5245_v15  ;;  %4083 = vmatprep.subr.mxu0 %v5284_v41  ;;  %v2398_v53 = vsel %vm453_vm5, %v2397_v56, %v2396_v13  ;;  %v2025_v23 = vsel %vm441_vm1, %v2024_v54, %v2023_v30  ;;  %v2030_v24 = vrot.slane %v1875_v2, 3  ;;  %v2032_v25 = vrot.slane %v1876_v63, 2  ;;  %v2252_v6 = vld [vmem:[%s4547_s13 + $0x11d] sm:$0x1]  ;;  %v3541_v36 = vld [vmem:[%s4539_s11 + $0x120] sm:$0xff] }
  0xea   : > { %4124 = vmatpush3.msra.mxu1 %v5245_v15  ;;  %4014 = vmatprep.mubr.f32.mxu0 %v5594_v16  ;;  %v2400_v26 = vsel %vm456_vm6, %v2399_v45, %v2398_v53  ;;  %v2027_v4 = vsel %vm444_vm2, %v2026_v52, %v2025_v23  ;;  %v2034_v28 = vrot.slane %v1877_v5, 1  ;;  %v2253_v43 = vld [vmem:[%s4547_s13 + $0x125] sm:$0x1]  ;;  %v2254_v49 = vld [vmem:[%s4547_s13 + $0x12d] sm:$0x1]  ;;  %v2401_v31 = vrot.slane %v2250_v9, 7 }
  0xeb   : > { %4125 = vmatprep.subr.mxu1 %v5266_v29  ;;  %4058 = vmatprep.mubr.f32.mxu1 %v2467_v40  ;;  %v2468_v0 = vadd.f32 %v3556_v11, %v2400_v26  ;;  %v2029_v32 = vsel %vm447_vm3, %v2028_v18, %v2027_v4  ;;  %v2255_v15 = vld [vmem:[%s4547_s13 + $0x135] sm:$0x1]  ;;  %v2256_v27 = vld [vmem:[%s4547_s13 + $0x13d] sm:$0x1]  ;;  %v2403_v16 = vrot.slane %v2251_v14, 6  ;;  %v2405_v35 = vrot.slane %v2252_v6, 5 }
  0xec   : > { %4126 = vmatpush3.msra.mxu1 %v5266_v29  ;;  %4084 = vmatpush3.msra.mxu0 %v5284_v41  ;;  %v2031_v37 = vsel %vm450_vm4, %v2030_v24, %v2029_v32  ;;  %v2402_v38 = vsel %vm438_vm0, %v2401_v31, %v2249_v20  ;;  %v2407_v39 = vrot.slane %v2253_v43, 4  ;;  %v2409_v21 = vrot.slane %v2254_v49, 3  ;;  %v1878_v40 = vld [vmem:[%s4547_s13 + $0x144] sm:$0x1]  ;;  %v1879_v12 = vld [vmem:[%s4547_s13 + $0x14c] sm:$0x1] }
  0xed   : > { %4127 = vmatprep.subr.mxu1 %v5284_v41  ;;  %4015 = vmatmul.mubr.f32.gmra.mxu0 %v2089_v8  ;;  %v2033_v19 = vsel %vm453_vm5, %v2032_v25, %v2031_v37  ;;  %v2404_v29 = vsel %vm441_vm1, %v2403_v16, %v2402_v38  ;;  %v2411_v44 = vrot.slane %v2255_v15, 2  ;;  %v2413_v1 = vrot.slane %v2256_v27, 1  ;;  %v1880_v46 = vld [vmem:[%s4547_s13 + $0x154] sm:$0x1]  ;;  %v1881_v47 = vld [vmem:[%s4547_s13 + $0x15c] sm:$0x1] }
  0xee   : > { %4128 = vmatpush3.msra.mxu1 %v5284_v41  ;;  %4085 = vmatprep.subr.mxu0 %v5313_v7  ;;  %v2035_v34 = vsel %vm456_vm6, %v2034_v28, %v2033_v19  ;;  %v2406_v42 = vsel %vm444_vm2, %v2405_v35, %v2404_v29  ;;  %v1882_v50 = vld [vmem:[%s4547_s13 + $0x164] sm:$0x1]  ;;  %v1883_v56 = vld [vmem:[%s4547_s13 + $0x16c] sm:$0x1]  ;;  %v1884_v57 = vld [vmem:[%s4547_s13 + $0x174] sm:$0x1] }
  0xef   : > { %4059 = vmatmul.mubr.f32.gmra.mxu1 %v2468_v0  ;;  %4129 = vmatprep.subr.mxu1 %v5313_v7  ;;  %v2090_v58 = vadd.f32 %v3541_v36, %v2035_v34  ;;  %v2408_v17 = vsel %vm447_vm3, %v2407_v39, %v2406_v42  ;;  %v1885_v59 = vld [vmem:[%s4547_s13 + $0x17c] sm:$0x1]  ;;  %v2036_v45 = vrot.slane %v1879_v12, 7  ;;  %v2038_v41 = vrot.slane %v1880_v46, 6  ;;  %v3557_v60 = vld [vmem:[%s4539_s11 + $0x160] sm:$0xff]  ;;  %v3542_v26 = vld [vmem:[%s4539_s11 + $0x128] sm:$0xff] }
  0xf0   : > { %4086 = vmatpush3.msra.mxu0 %v5313_v7  ;;  %4130 = vmatpush3.msra.mxu1 %v5313_v7  ;;  %v2410_v2 = vsel %vm450_vm4, %v2409_v21, %v2408_v17  ;;  %v2040_v61 = vrot.slane %v1881_v47, 5  ;;  %v2042_v62 = vrot.slane %v1882_v50, 4  ;;  %v2044_v48 = vrot.slane %v1883_v56, 3  ;;  %v2257_v63 = vld [vmem:[%s4547_s13 + $0x145] sm:$0x1] }
  0xf1   : > { %4087 = vmatprep.subr.mxu0 %v5342_v22  ;;  %4131 = vmatprep.subr.mxu1 %v5342_v22  ;;  %v2412_v5 = vsel %vm453_vm5, %v2411_v44, %v2410_v2  ;;  %v2037_v54 = vsel %vm438_vm0, %v2036_v45, %v1878_v40  ;;  %v2046_v7 = vrot.slane %v1884_v57, 2  ;;  %v2048_v52 = vrot.slane %v1885_v59, 1  ;;  %v2258_v8 = vld [vmem:[%s4547_s13 + $0x14d] sm:$0x1]  ;;  %v2259_v11 = vld [vmem:[%s4547_s13 + $0x155] sm:$0x1] }
  0xf2   : > { %4017 = vmatprep.mubr.f32.mxu0 %v2090_v58  ;;  %v2414_v13 = vsel %vm456_vm6, %v2413_v1, %v2412_v5  ;;  %4088 = vmatpush3.msra.mxu0 %v5342_v22  ;;  %v2039_v30 = vsel %vm441_vm1, %v2038_v41, %v2037_v54  ;;  %v2260_v18 = vld [vmem:[%s4547_s13 + $0x15d] sm:$0x1]  ;;  %v2261_v20 = vld [vmem:[%s4547_s13 + $0x165] sm:$0x1]  ;;  %v2262_v9 = vld [vmem:[%s4547_s13 + $0x16d] sm:$0x1] }
  0xf3   : > { %v2469_v53 = vadd.f32 %v3557_v60, %v2414_v13  ;;  %4132 = vmatpush3.msra.mxu1 %v5342_v22  ;;  %v2041_v23 = vsel %vm444_vm2, %v2040_v61, %v2039_v30  ;;  %v2263_v24 = vld [vmem:[%s4547_s13 + $0x175] sm:$0x1]  ;;  %v2264_v25 = vld [vmem:[%s4547_s13 + $0x17d] sm:$0x1]  ;;  %v2415_v14 = vrot.slane %v2258_v8, 7  ;;  %v2417_v6 = vrot.slane %v2259_v11, 6  ;;  %4089 = vmatprep.subr.mxu0 %v5360_v51 }
  0xf4   : > { %v2043_v36 = vsel %vm447_vm3, %v2042_v62, %v2041_v23  ;;  %v2419_v4 = vrot.slane %v2260_v18, 5  ;;  %v2421_v28 = vrot.slane %v2261_v20, 4  ;;  %v2423_v43 = vrot.slane %v2262_v9, 3  ;;  %4133 = vmatprep.subr.mxu1 %v5360_v51  ;;  %4090 = vmatpush3.msra.mxu0 %v5360_v51  ;;  %v1886_v22 = vld [vmem:[%s4547_s13 + $0x184] sm:$0x1]  ;;  %v3558_v40 = vld [vmem:[%s4539_s11 + $0x168] sm:$0xff] }
  0xf5   : > { %4061 = vmatprep.mubr.f32.mxu1 %v2469_v53  ;;  %v2045_v49 = vsel %vm450_vm4, %v2044_v48, %v2043_v36  ;;  %v2416_v31 = vsel %vm438_vm0, %v2415_v14, %v2257_v63  ;;  %v2425_v0 = vrot.slane %v2263_v24, 2  ;;  %v2427_v32 = vrot.slane %v2264_v25, 1  ;;  %4134 = vmatpush3.msra.mxu1 %v5360_v51  ;;  %v1887_v15 = vld [vmem:[%s4547_s13 + $0x18c] sm:$0x1]  ;;  %v1888_v27 = vld [vmem:[%s4547_s13 + $0x194] sm:$0x1] }
  0xf6   : > { %v2047_v16 = vsel %vm453_vm5, %v2046_v7, %v2045_v49  ;;  %v2418_v35 = vsel %vm441_vm1, %v2417_v6, %v2416_v31  ;;  %4091 = vmatprep.subr.mxu0 %v5384_v3  ;;  %4135 = vmatprep.subr.mxu1 %v5384_v3  ;;  %v1889_v37 = vld [vmem:[%s4547_s13 + $0x19c] sm:$0x1]  ;;  %v1890_v38 = vld [vmem:[%s4547_s13 + $0x1a4] sm:$0x1]  ;;  %v1891_v39 = vld [vmem:[%s4547_s13 + $0x1ac] sm:$0x1] }
  0xf7   : > { %v2049_v21 = vsel %vm456_vm6, %v2048_v52, %v2047_v16  ;;  %v2420_v51 = vsel %vm444_vm2, %v2419_v4, %v2418_v35  ;;  %v1892_v12 = vld [vmem:[%s4547_s13 + $0x1b4] sm:$0x1]  ;;  %v5732_v19 = vld [vmem:[%s4547_s13 + $0x1bc] sm:$0x1]  ;;  %v2050_v29 = vrot.slane %v1887_v15, 7  ;;  %v2052_v44 = vrot.slane %v1888_v27, 6  ;;  %4092 = vmatpush3.msra.mxu0 %v5384_v3  ;;  %4136 = vmatpush3.msra.mxu1 %v5384_v3 }
  0xf8   : > { %v2091_v1 = vadd.f32 %v3542_v26, %v2049_v21  ;;  %v2422_v46 = vsel %vm447_vm3, %v2421_v28, %v2420_v51  ;;  %v2054_v47 = vrot.slane %v1889_v37, 5  ;;  %v2056_v34 = vrot.slane %v1890_v38, 4  ;;  %v2265_v42 = vld [vmem:[%s4547_s13 + $0x185] sm:$0x1]  ;;  %v2266_v50 = vld [vmem:[%s4547_s13 + $0x18d] sm:$0x1]  ;;  %4093 = vmatprep.subr.mxu0 %v5404_v33  ;;  %4137 = vmatprep.subr.mxu1 %v5404_v33 }
  0xf9   : > { %v2424_v56 = vsel %vm450_vm4, %v2423_v43, %v2422_v46  ;;  %v2051_v57 = vsel %vm438_vm0, %v2050_v29, %v1886_v22  ;;  %v2058_v58 = vrot.slane %v1891_v39, 3  ;;  %v2060_v3 = vrot.slane %v1892_v12, 2  ;;  %v2267_v17 = vld [vmem:[%s4547_s13 + $0x195] sm:$0x1]  ;;  %v2268_v59 = vld [vmem:[%s4547_s13 + $0x19d] sm:$0x1]  ;;  %4094 = vmatpush3.msra.mxu0 %v5404_v33  ;;  %4138 = vmatpush3.msra.mxu1 %v5404_v33 }
  0xfa   : > { %4018 = vmatmul.mubr.f32.gmra.mxu0 %v2091_v1  ;;  %v2426_v45 = vsel %vm453_vm5, %v2425_v0, %v2424_v56  ;;  %v2053_v41 = vsel %vm441_vm1, %v2052_v44, %v2051_v57  ;;  %v2062_v60 = vrot.slane %v5732_v19, 1  ;;  %v2269_v2 = vld [vmem:[%s4547_s13 + $0x1a5] sm:$0x1]  ;;  %v2270_v61 = vld [vmem:[%s4547_s13 + $0x1ad] sm:$0x1]  ;;  %v2429_v62 = vrot.slane %v2266_v50, 7  ;;  %4095 = vmatprep.subr.mxu0 %v5421_v55 }
  0xfb   : > { %v2428_v48 = vsel %vm456_vm6, %v2427_v32, %v2426_v45  ;;  %v2055_v63 = vsel %vm444_vm2, %v2054_v47, %v2053_v41  ;;  %v2271_v33 = vld [vmem:[%s4547_s13 + $0x1b5] sm:$0x1]  ;;  %v2272_v5 = vld [vmem:[%s4547_s13 + $0x1bd] sm:$0x1]  ;;  %v2431_v54 = vrot.slane %v2267_v17, 6  ;;  %v2433_v7 = vrot.slane %v2268_v59, 5  ;;  %4139 = vmatprep.subr.mxu1 %v5421_v55  ;;  %4096 = vmatpush3.msra.mxu0 %v5421_v55 }
  0xfc   : > { %v2470_v52 = vadd.f32 %v3558_v40, %v2428_v48  ;;  %v3543_v8 = vld [vmem:[%s4539_s11 + $0x130] sm:$0xff]  ;;  %v2057_v11 = vsel %vm447_vm3, %v2056_v34, %v2055_v63  ;;  %v2430_v13 = vsel %vm438_vm0, %v2429_v62, %v2265_v42  ;;  %v2435_v30 = vrot.slane %v2269_v2, 4  ;;  %v1894_v18 = vld [vmem:[%s4547_s13 + $0x1c4] sm:$0x1]  ;;  %v1895_v20 = vld [vmem:[%s4547_s13 + $0x1cc] sm:$0x1]  ;;  %4140 = vmatpush3.msra.mxu1 %v5421_v55  ;;  %4097 = vmatprep.subr.mxu0 %v5443_v10 }
  0xfd   : > { %v2059_v9 = vsel %vm450_vm4, %v2058_v58, %v2057_v11  ;;  %v2432_v53 = vsel %vm441_vm1, %v2431_v54, %v2430_v13  ;;  %v2437_v23 = vrot.slane %v2270_v61, 3  ;;  %v2439_v24 = vrot.slane %v2271_v33, 2  ;;  %v1896_v25 = vld [vmem:[%s4547_s13 + $0x1d4] sm:$0x1]  ;;  %v1897_v14 = vld [vmem:[%s4547_s13 + $0x1dc] sm:$0x1]  ;;  %4141 = vmatprep.subr.mxu1 %v5443_v10  ;;  %4098 = vmatpush3.msra.mxu0 %v5443_v10 }
  0xfe   : > { %4062 = vmatmul.mubr.f32.gmra.mxu1 %v2470_v52  ;;  %v2061_v55 = vsel %vm453_vm5, %v2060_v3, %v2059_v9  ;;  %v2434_v6 = vsel %vm444_vm2, %v2433_v7, %v2432_v53  ;;  %v2441_v26 = vrot.slane %v2272_v5, 1  ;;  %v1898_v36 = vld [vmem:[%s4547_s13 + $0x1e4] sm:$0x1]  ;;  %v1899_v4 = vld [vmem:[%s4547_s13 + $0x1ec] sm:$0x1]  ;;  %v2064_v28 = vrot.slane %v1895_v20, 7 }
  0xff   : > { %v2063_v43 = vsel %vm456_vm6, %v2062_v60, %v2061_v55  ;;  %v2436_v22 = vsel %vm447_vm3, %v2435_v30, %v2434_v6  ;;  %v1900_v49 = vld [vmem:[%s4547_s13 + $0x1f4] sm:$0x1]  ;;  %v1901_v31 = vld [vmem:[%s4547_s13 + $0x1fc] sm:$0x1]  ;;  %v2066_v0 = vrot.slane %v1896_v25, 6  ;;  %v2068_v32 = vrot.slane %v1897_v14, 5  ;;  %4142 = vmatpush3.msra.mxu1 %v5443_v10 }
 0x100   : > { %v2092_v15 = vadd.f32 %v3543_v8, %v2063_v43  ;;  %v3559_v27 = vld [vmem:[%s4539_s11 + $0x170] sm:$0xff]  ;;  %v2438_v16 = vsel %vm450_vm4, %v2437_v23, %v2436_v22  ;;  %v2065_v35 = vsel %vm438_vm0, %v2064_v28, %v1894_v18  ;;  %v2070_v37 = vrot.slane %v1898_v36, 4  ;;  %v2273_v38 = vld [vmem:[%s4547_s13 + $0x1c5] sm:$0x1]  ;;  %v2274_v39 = vld [vmem:[%s4547_s13 + $0x1cd] sm:$0x1] }
 0x101   : > { %v2440_v21 = vsel %vm453_vm5, %v2439_v24, %v2438_v16  ;;  %v2067_v40 = vsel %vm441_vm1, %v2066_v0, %v2065_v35  ;;  %v2072_v51 = vrot.slane %v1899_v4, 3  ;;  %v2074_v10 = vrot.slane %v1900_v49, 2  ;;  %v2275_v12 = vld [vmem:[%s4547_s13 + $0x1d5] sm:$0x1]  ;;  %v2276_v19 = vld [vmem:[%s4547_s13 + $0x1dd] sm:$0x1] }
 0x102   : > { %4020 = vmatprep.mubr.f32.mxu0 %v2092_v15  ;;  %v2442_v29 = vsel %vm456_vm6, %v2441_v26, %v2440_v21  ;;  %v3544_v44 = vld [vmem:[%s4539_s11 + $0x138] sm:$0xff]  ;;  %v2069_v1 = vsel %vm444_vm2, %v2068_v32, %v2067_v40  ;;  %v2076_v46 = vrot.slane %v1901_v31, 1  ;;  %v2277_v47 = vld [vmem:[%s4547_s13 + $0x1e5] sm:$0x1]  ;;  %v2278_v34 = vld [vmem:[%s4547_s13 + $0x1ed] sm:$0x1] }
 0x103   : > { %v2443_v42 = vrot.slane %v2274_v39, 7  ;;  %v2471_v50 = vadd.f32 %v3559_v27, %v2442_v29  ;;  %v2071_v56 = vsel %vm447_vm3, %v2070_v37, %v2069_v1  ;;  %v2279_v57 = vld [vmem:[%s4547_s13 + $0x1f5] sm:$0x1]  ;;  %v2280_v58 = vld [vmem:[%s4547_s13 + $0x1fd] sm:$0x1]  ;;  %v2445_v3 = vrot.slane %v2275_v12, 6 }
 0x104   : > { %v2447_v17 = vrot.slane %v2276_v19, 5  ;;  %v2073_v59 = vsel %vm450_vm4, %v2072_v51, %v2071_v56  ;;  %v2449_v41 = vrot.slane %v2277_v47, 4  ;;  %v2451_v60 = vrot.slane %v2278_v34, 3  ;;  %v2596_v2 = vld [vmem:[%s4547_s13 + $0x6] sm:$0x1]  ;;  %v3560_v23 = vld [vmem:[%s4539_s11 + $0x178] sm:$0xff] }
 0x105   : > { %v2444_v45 = vsel %vm438_vm0, %v2443_v42, %v2273_v38  ;;  %v2597_v61 = vld [vmem:[%s4547_s13 + $0xe] sm:$0x1]  ;;  %4064 = vmatprep.mubr.f32.mxu1 %v2471_v50  ;;  %v2075_v62 = vsel %vm453_vm5, %v2074_v10, %v2073_v59  ;;  %v2453_v63 = vrot.slane %v2279_v57, 2  ;;  %v2455_v33 = vrot.slane %v2280_v58, 1  ;;  %v2598_v5 = vld [vmem:[%s4547_s13 + $0x16] sm:$0x1] }
 0x106   : > { %v2446_v48 = vsel %vm441_vm1, %v2445_v3, %v2444_v45  ;;  %v2599_v54 = vld [vmem:[%s4547_s13 + $0x1e] sm:$0x1]  ;;  %v2077_v7 = vsel %vm456_vm6, %v2076_v46, %v2075_v62  ;;  %v2600_v8 = vld [vmem:[%s4547_s13 + $0x26] sm:$0x1]  ;;  %v2601_v11 = vld [vmem:[%s4547_s13 + $0x2e] sm:$0x1] }
 0x107   : > { %v2448_v52 = vsel %vm444_vm2, %v2447_v17, %v2446_v48  ;;  %v2602_v13 = vld [vmem:[%s4547_s13 + $0x36] sm:$0x1]  ;;  %v2093_v30 = vadd.f32 %v3544_v44, %v2077_v7  ;;  %v2603_v20 = vld [vmem:[%s4547_s13 + $0x3e] sm:$0x1]  ;;  %v2724_v9 = vrot.slane %v2597_v61, 7  ;;  %v2726_v53 = vrot.slane %v2598_v5, 6 }
 0x108   : > { %v2450_v18 = vsel %vm447_vm3, %v2449_v41, %v2448_v52  ;;  %v2728_v25 = vrot.slane %v2599_v54, 5  ;;  %v2730_v14 = vrot.slane %v2600_v8, 4  ;;  %v2732_v55 = vrot.slane %v2601_v11, 3  ;;  %v2975_v6 = vld [vmem:[%s4547_s13 + $0x7] sm:$0x1] }
 0x109   : > { %v2452_v24 = vsel %vm450_vm4, %v2451_v60, %v2450_v18  ;;  %4021 = vmatmul.mubr.f32.gmra.mxu0 %v2093_v30  ;;  %v2725_v36 = vsel %vm438_vm0, %v2724_v9, %v2596_v2  ;;  %v2734_v4 = vrot.slane %v2602_v13, 2  ;;  %v2736_v28 = vrot.slane %v2603_v20, 1  ;;  %v2976_v43 = vld [vmem:[%s4547_s13 + $0xf] sm:$0x1]  ;;  %v2977_v22 = vld [vmem:[%s4547_s13 + $0x17] sm:$0x1] }
 0x10a   : > { %v2454_v26 = vsel %vm453_vm5, %v2453_v63, %v2452_v24  ;;  %v2727_v31 = vsel %vm441_vm1, %v2726_v53, %v2725_v36  ;;  %v2978_v0 = vld [vmem:[%s4547_s13 + $0x1f] sm:$0x1]  ;;  %v2979_v32 = vld [vmem:[%s4547_s13 + $0x27] sm:$0x1]  ;;  %v2980_v15 = vld [vmem:[%s4547_s13 + $0x2f] sm:$0x1] }
 0x10b   : > { %v2456_v49 = vsel %vm456_vm6, %v2455_v33, %v2454_v26  ;;  %v2729_v16 = vsel %vm444_vm2, %v2728_v25, %v2727_v31  ;;  %v2981_v35 = vld [vmem:[%s4547_s13 + $0x37] sm:$0x1]  ;;  %v2982_v37 = vld [vmem:[%s4547_s13 + $0x3f] sm:$0x1]  ;;  %v3103_v38 = vrot.slane %v2976_v43, 7  ;;  %v3105_v39 = vrot.slane %v2977_v22, 6 }
 0x10c   : > { %v2472_v27 = vadd.f32 %v3560_v23, %v2456_v49  ;;  %v3569_v21 = vld [vmem:[%s4539_s11 + $0x180] sm:$0xff]  ;;  %v2731_v40 = vsel %vm447_vm3, %v2730_v14, %v2729_v16  ;;  %v3107_v51 = vrot.slane %v2978_v0, 5  ;;  %v3109_v10 = vrot.slane %v2979_v32, 4  ;;  %v2605_v47 = vld [vmem:[%s4547_s13 + $0x4e] sm:$0x1] }
 0x10d   : > { %v3111_v12 = vrot.slane %v2980_v15, 3  ;;  %v2604_v19 = vld [vmem:[%s4547_s13 + $0x46] sm:$0x1]  ;;  %v2733_v29 = vsel %vm450_vm4, %v2732_v55, %v2731_v40  ;;  %v3104_v44 = vsel %vm438_vm0, %v3103_v38, %v2975_v6  ;;  %v3113_v1 = vrot.slane %v2981_v35, 2  ;;  %v2606_v34 = vld [vmem:[%s4547_s13 + $0x56] sm:$0x1] }
 0x10e   : > { %4065 = vmatmul.mubr.f32.gmra.mxu1 %v2472_v27  ;;  %v3115_v46 = vrot.slane %v2982_v37, 1  ;;  %v2735_v42 = vsel %vm453_vm5, %v2734_v4, %v2733_v29  ;;  %v3106_v50 = vsel %vm441_vm1, %v3105_v39, %v3104_v44  ;;  %v2607_v56 = vld [vmem:[%s4547_s13 + $0x5e] sm:$0x1]  ;;  %v2608_v57 = vld [vmem:[%s4547_s13 + $0x66] sm:$0x1]  ;;  %v2738_v60 = vrot.slane %v2605_v47, 7 }
 0x10f   : > { %v2609_v58 = vld [vmem:[%s4547_s13 + $0x6e] sm:$0x1]  ;;  %v2737_v3 = vsel %vm456_vm6, %v2736_v28, %v2735_v42  ;;  %v3585_v17 = vld [vmem:[%s4539_s11 + $0x1c0] sm:$0xff]  ;;  %v3108_v59 = vsel %vm444_vm2, %v3107_v51, %v3106_v50  ;;  %v2610_v45 = vld [vmem:[%s4547_s13 + $0x76] sm:$0x1]  ;;  %v2740_v2 = vrot.slane %v2606_v34, 6 }
 0x110   : > { %v2611_v41 = vld [vmem:[%s4547_s13 + $0x7e] sm:$0x1]  ;;  %v2844_v61 = vadd.f32 %v3569_v21, %v2737_v3  ;;  %v3110_v62 = vsel %vm447_vm3, %v3109_v10, %v3108_v59  ;;  %v2742_v48 = vrot.slane %v2607_v56, 5  ;;  %v2744_v63 = vrot.slane %v2608_v57, 4  ;;  %v2983_v33 = vld [vmem:[%s4547_s13 + $0x47] sm:$0x1] }
 0x111   : > { %v2984_v5 = vld [vmem:[%s4547_s13 + $0x4f] sm:$0x1]  ;;  %v3112_v54 = vsel %vm450_vm4, %v3111_v12, %v3110_v62  ;;  %v2739_v7 = vsel %vm438_vm0, %v2738_v60, %v2604_v19  ;;  %v2746_v52 = vrot.slane %v2609_v58, 3  ;;  %v2748_v8 = vrot.slane %v2610_v45, 2  ;;  %v2985_v11 = vld [vmem:[%s4547_s13 + $0x57] sm:$0x1] }
 0x112   : > { %v2986_v13 = vld [vmem:[%s4547_s13 + $0x5f] sm:$0x1]  ;;  %4099 = vmatprep.mubr.f32.mxu0 %v2844_v61  ;;  %v3114_v30 = vsel %vm453_vm5, %v3113_v1, %v3112_v54  ;;  %v2741_v18 = vsel %vm441_vm1, %v2740_v2, %v2739_v7  ;;  %v2750_v20 = vrot.slane %v2611_v41, 1  ;;  %v2987_v9 = vld [vmem:[%s4547_s13 + $0x67] sm:$0x1]  ;;  %v3117_v23 = vrot.slane %v2984_v5, 7 }
 0x113   : > { %v2988_v53 = vld [vmem:[%s4547_s13 + $0x6f] sm:$0x1]  ;;  %v3116_v24 = vsel %vm456_vm6, %v3115_v46, %v3114_v30  ;;  %v2743_v25 = vsel %vm444_vm2, %v2742_v48, %v2741_v18  ;;  %v2989_v14 = vld [vmem:[%s4547_s13 + $0x77] sm:$0x1]  ;;  %v2990_v55 = vld [vmem:[%s4547_s13 + $0x7f] sm:$0x1] }
 0x114   : > { %v3119_v6 = vrot.slane %v2985_v11, 6  ;;  %v3121_v26 = vrot.slane %v2986_v13, 5  ;;  %v3223_v36 = vadd.f32 %v3585_v17, %v3116_v24  ;;  %v3570_v4 = vld [vmem:[%s4539_s11 + $0x188] sm:$0xff]  ;;  %v2745_v28 = vsel %vm447_vm3, %v2744_v63, %v2743_v25  ;;  %v2612_v49 = vld [vmem:[%s4547_s13 + $0x86] sm:$0x1]  ;;  %v3571_v2 = vld [vmem:[%s4539_s11 + $0x190] sm:$0xff] }
 0x115   : > { %v3118_v43 = vsel %vm438_vm0, %v3117_v23, %v2983_v33  ;;  %v3123_v22 = vrot.slane %v2987_v9, 4  ;;  %v2613_v31 = vld [vmem:[%s4547_s13 + $0x8e] sm:$0x1]  ;;  %v2747_v0 = vsel %vm450_vm4, %v2746_v52, %v2745_v28  ;;  %v3125_v15 = vrot.slane %v2988_v53, 3  ;;  %v2614_v16 = vld [vmem:[%s4547_s13 + $0x96] sm:$0x1] }
 0x116   : > { %v3120_v32 = vsel %vm441_vm1, %v3119_v6, %v3118_v43  ;;  %v3127_v27 = vrot.slane %v2989_v14, 2  ;;  %v2615_v35 = vld [vmem:[%s4547_s13 + $0x9e] sm:$0x1]  ;;  %4143 = vmatprep.mubr.f32.mxu1 %v3223_v36  ;;  %v2749_v37 = vsel %vm453_vm5, %v2748_v8, %v2747_v0  ;;  %v3129_v39 = vrot.slane %v2990_v55, 1  ;;  %v2616_v21 = vld [vmem:[%s4547_s13 + $0xa6] sm:$0x1] }
 0x117   : > { %v3122_v38 = vsel %vm444_vm2, %v3121_v26, %v3120_v32  ;;  %v2617_v40 = vld [vmem:[%s4547_s13 + $0xae] sm:$0x1]  ;;  %v2752_v51 = vrot.slane %v2613_v31, 7  ;;  %v2751_v10 = vsel %vm456_vm6, %v2750_v20, %v2749_v37  ;;  %v2618_v19 = vld [vmem:[%s4547_s13 + $0xb6] sm:$0x1]  ;;  %v2754_v44 = vrot.slane %v2614_v16, 6 }
 0x118   : > { %v3124_v12 = vsel %vm447_vm3, %v3123_v22, %v3122_v38  ;;  %v2619_v29 = vld [vmem:[%s4547_s13 + $0xbe] sm:$0x1]  ;;  %v2756_v1 = vrot.slane %v2615_v35, 5  ;;  %v2845_v46 = vadd.f32 %v3570_v4, %v2751_v10  ;;  %v3586_v47 = vld [vmem:[%s4539_s11 + $0x1c8] sm:$0xff]  ;;  %v2758_v50 = vrot.slane %v2616_v21, 4 }
 0x119   : > { %v3126_v34 = vsel %vm450_vm4, %v3125_v15, %v3124_v12  ;;  %v2753_v42 = vsel %vm438_vm0, %v2752_v51, %v2612_v49  ;;  %v2991_v56 = vld [vmem:[%s4547_s13 + $0x87] sm:$0x1]  ;;  %v2992_v57 = vld [vmem:[%s4547_s13 + $0x8f] sm:$0x1]  ;;  %v2760_v17 = vrot.slane %v2617_v40, 3  ;;  %v2762_v59 = vrot.slane %v2618_v19, 2 }
 0x11a   : > { %v3128_v58 = vsel %vm453_vm5, %v3127_v27, %v3126_v34  ;;  %v2755_v3 = vsel %vm441_vm1, %v2754_v44, %v2753_v42  ;;  %v2993_v45 = vld [vmem:[%s4547_s13 + $0x97] sm:$0x1]  ;;  %v2994_v41 = vld [vmem:[%s4547_s13 + $0x9f] sm:$0x1]  ;;  %4100 = vmatmul.mubr.f32.vlgmr.msra.gmra.mxu0 %v2845_v46  ;;  %v2764_v62 = vrot.slane %v2619_v29, 1  ;;  %v3131_v33 = vrot.slane %v2992_v57, 7 }
 0x11b   : > { %v3130_v60 = vsel %vm456_vm6, %v3129_v39, %v3128_v58  ;;  %v2757_v61 = vsel %vm444_vm2, %v2756_v1, %v2755_v3  ;;  %v2995_v48 = vld [vmem:[%s4547_s13 + $0xa7] sm:$0x1]  ;;  %v2996_v63 = vld [vmem:[%s4547_s13 + $0xaf] sm:$0x1]  ;;  %v2997_v7 = vld [vmem:[%s4547_s13 + $0xb7] sm:$0x1] }
 0x11c   : > { %v3224_v5 = vadd.f32 %v3586_v47, %v3130_v60  ;;  %v2759_v54 = vsel %vm447_vm3, %v2758_v50, %v2757_v61  ;;  %v2998_v52 = vld [vmem:[%s4547_s13 + $0xbf] sm:$0x1]  ;;  %v3133_v8 = vrot.slane %v2993_v45, 6  ;;  %v3135_v11 = vrot.slane %v2994_v41, 5  ;;  %v2620_v9 = vld [vmem:[%s4547_s13 + $0xc6] sm:$0x1] }
 0x11d   : > { %v2761_v13 = vsel %vm450_vm4, %v2760_v17, %v2759_v54  ;;  %v3132_v30 = vsel %vm438_vm0, %v3131_v33, %v2991_v56  ;;  %v3137_v18 = vrot.slane %v2995_v48, 4  ;;  %v3139_v20 = vrot.slane %v2996_v63, 3  ;;  %v2621_v53 = vld [vmem:[%s4547_s13 + $0xce] sm:$0x1]  ;;  %v2622_v55 = vld [vmem:[%s4547_s13 + $0xd6] sm:$0x1] }
 0x11e   : > { %4144 = vmatmul.mubr.f32.vlgmr.msra.gmra.mxu1 %v3224_v5  ;;  %v2763_v23 = vsel %vm453_vm5, %v2762_v59, %v2761_v13  ;;  %v3134_v24 = vsel %vm441_vm1, %v3133_v8, %v3132_v30  ;;  %v3141_v25 = vrot.slane %v2997_v7, 2  ;;  %v3143_v14 = vrot.slane %v2998_v52, 1  ;;  %v2623_v6 = vld [vmem:[%s4547_s13 + $0xde] sm:$0x1]  ;;  %v2624_v4 = vld [vmem:[%s4547_s13 + $0xe6] sm:$0x1] }
 0x11f   : > { %v2765_v26 = vsel %vm456_vm6, %v2764_v62, %v2763_v23  ;;  %v3136_v36 = vsel %vm444_vm2, %v3135_v11, %v3134_v24  ;;  %v2625_v28 = vld [vmem:[%s4547_s13 + $0xee] sm:$0x1]  ;;  %v2626_v43 = vld [vmem:[%s4547_s13 + $0xf6] sm:$0x1]  ;;  %v2627_v31 = vld [vmem:[%s4547_s13 + $0xfe] sm:$0x1] }
 0x120   : > { %v2846_v22 = vadd.f32 %v3571_v2, %v2765_v26  ;;  %v3138_v49 = vsel %vm447_vm3, %v3137_v18, %v3136_v36  ;;  %v2766_v0 = vrot.slane %v2621_v53, 7  ;;  %v2768_v32 = vrot.slane %v2622_v55, 6  ;;  %v3587_v15 = vld [vmem:[%s4539_s11 + $0x1d0] sm:$0xff]  ;;  %v2999_v38 = vld [vmem:[%s4547_s13 + $0xc7] sm:$0x1]  ;;  %v3572_v58 = vld [vmem:[%s4539_s11 + $0x198] sm:$0xff] }
 0x121   : > { %v3140_v27 = vsel %vm450_vm4, %v3139_v20, %v3138_v49  ;;  %v2770_v16 = vrot.slane %v2623_v6, 5  ;;  %v2772_v35 = vrot.slane %v2624_v4, 4  ;;  %v2774_v37 = vrot.slane %v2625_v28, 3  ;;  %v3000_v10 = vld [vmem:[%s4547_s13 + $0xcf] sm:$0x1]  ;;  %v3588_v11 = vld [vmem:[%s4539_s11 + $0x1d8] sm:$0xff] }
 0x122   : > { %4102 = vmatprep.mubr.f32.mxu0 %v2846_v22  ;;  %v3142_v39 = vsel %vm453_vm5, %v3141_v25, %v3140_v27  ;;  %v2767_v21 = vsel %vm438_vm0, %v2766_v0, %v2620_v9  ;;  %v2776_v40 = vrot.slane %v2626_v43, 2  ;;  %v2778_v51 = vrot.slane %v2627_v31, 1  ;;  %v3001_v12 = vld [vmem:[%s4547_s13 + $0xd7] sm:$0x1]  ;;  %v3002_v44 = vld [vmem:[%s4547_s13 + $0xdf] sm:$0x1] }
 0x123   : > { %v3144_v19 = vsel %vm456_vm6, %v3143_v14, %v3142_v39  ;;  %v2769_v29 = vsel %vm441_vm1, %v2768_v32, %v2767_v21  ;;  %v3003_v1 = vld [vmem:[%s4547_s13 + $0xe7] sm:$0x1]  ;;  %v3004_v46 = vld [vmem:[%s4547_s13 + $0xef] sm:$0x1]  ;;  %v3005_v42 = vld [vmem:[%s4547_s13 + $0xf7] sm:$0x1] }
 0x124   : > { %v3225_v47 = vadd.f32 %v3587_v15, %v3144_v19  ;;  %v2771_v34 = vsel %vm444_vm2, %v2770_v16, %v2769_v29  ;;  %v3006_v50 = vld [vmem:[%s4547_s13 + $0xff] sm:$0x1]  ;;  %v3145_v56 = vrot.slane %v3000_v10, 7  ;;  %v3147_v57 = vrot.slane %v3001_v12, 6  ;;  %v2628_v41 = vld [vmem:[%s4547_s13 + $0x106] sm:$0x1] }
 0x125   : > { %v2773_v3 = vsel %vm447_vm3, %v2772_v35, %v2771_v34  ;;  %v3149_v17 = vrot.slane %v3002_v44, 5  ;;  %v3151_v59 = vrot.slane %v3003_v1, 4  ;;  %v3153_v45 = vrot.slane %v3004_v46, 3  ;;  %v2629_v48 = vld [vmem:[%s4547_s13 + $0x10e] sm:$0x1] }
 0x126   : > { %4146 = vmatprep.mubr.f32.mxu1 %v3225_v47  ;;  %v2775_v60 = vsel %vm450_vm4, %v2774_v37, %v2773_v3  ;;  %v3146_v2 = vsel %vm438_vm0, %v3145_v56, %v2999_v38  ;;  %v3155_v61 = vrot.slane %v3005_v42, 2  ;;  %v3157_v62 = vrot.slane %v3006_v50, 1  ;;  %v2630_v63 = vld [vmem:[%s4547_s13 + $0x116] sm:$0x1]  ;;  %v2631_v54 = vld [vmem:[%s4547_s13 + $0x11e] sm:$0x1] }
 0x127   : > { %v2777_v33 = vsel %vm453_vm5, %v2776_v40, %v2775_v60  ;;  %v3148_v5 = vsel %vm441_vm1, %v3147_v57, %v3146_v2  ;;  %v2632_v7 = vld [vmem:[%s4547_s13 + $0x126] sm:$0x1]  ;;  %v2633_v52 = vld [vmem:[%s4547_s13 + $0x12e] sm:$0x1]  ;;  %v2634_v30 = vld [vmem:[%s4547_s13 + $0x136] sm:$0x1] }
 0x128   : > { %v2779_v8 = vsel %vm456_vm6, %v2778_v51, %v2777_v33  ;;  %v3150_v13 = vsel %vm444_vm2, %v3149_v17, %v3148_v5  ;;  %v2635_v18 = vld [vmem:[%s4547_s13 + $0x13e] sm:$0x1]  ;;  %v2780_v20 = vrot.slane %v2629_v48, 7  ;;  %v2782_v9 = vrot.slane %v2630_v63, 6  ;;  %v3007_v14 = vld [vmem:[%s4547_s13 + $0x107] sm:$0x1] }
 0x129   : > { %v2847_v53 = vadd.f32 %v3572_v58, %v2779_v8  ;;  %v3152_v23 = vsel %vm447_vm3, %v3151_v59, %v3150_v13  ;;  %v2784_v24 = vrot.slane %v2631_v54, 5  ;;  %v2786_v25 = vrot.slane %v2632_v7, 4  ;;  %v3008_v55 = vld [vmem:[%s4547_s13 + $0x10f] sm:$0x1]  ;;  %v3009_v28 = vld [vmem:[%s4547_s13 + $0x117] sm:$0x1] }
 0x12a   : > { %v3154_v6 = vsel %vm450_vm4, %v3153_v45, %v3152_v23  ;;  %v2781_v26 = vsel %vm438_vm0, %v2780_v20, %v2628_v41  ;;  %v2788_v36 = vrot.slane %v2633_v52, 3  ;;  %v2790_v4 = vrot.slane %v2634_v30, 2  ;;  %v3010_v43 = vld [vmem:[%s4547_s13 + $0x11f] sm:$0x1]  ;;  %v3011_v0 = vld [vmem:[%s4547_s13 + $0x127] sm:$0x1] }
 0x12b   : > { %4103 = vmatmul.mubr.f32.gmra.mxu0 %v2847_v53  ;;  %v3156_v22 = vsel %vm453_vm5, %v3155_v61, %v3154_v6  ;;  %v2783_v49 = vsel %vm441_vm1, %v2782_v9, %v2781_v26  ;;  %v2792_v31 = vrot.slane %v2635_v18, 1  ;;  %v3012_v32 = vld [vmem:[%s4547_s13 + $0x12f] sm:$0x1]  ;;  %v3159_v15 = vrot.slane %v3008_v55, 7  ;;  %v3013_v35 = vld [vmem:[%s4547_s13 + $0x137] sm:$0x1] }
 0x12c   : > { %v3158_v27 = vsel %vm456_vm6, %v3157_v62, %v3156_v22  ;;  %v2785_v16 = vsel %vm444_vm2, %v2784_v24, %v2783_v49  ;;  %v3014_v37 = vld [vmem:[%s4547_s13 + $0x13f] sm:$0x1]  ;;  %v3161_v38 = vrot.slane %v3009_v28, 6  ;;  %v3163_v39 = vrot.slane %v3010_v43, 5  ;;  %v3573_v40 = vld [vmem:[%s4539_s11 + $0x1a0] sm:$0xff]  ;;  %v3574_v9 = vld [vmem:[%s4539_s11 + $0x1a8] sm:$0xff] }
 0x12d   : > { %v3226_v21 = vadd.f32 %v3588_v11, %v3158_v27  ;;  %v2787_v51 = vsel %vm447_vm3, %v2786_v25, %v2785_v16  ;;  %v3160_v10 = vsel %vm438_vm0, %v3159_v15, %v3007_v14  ;;  %v3165_v12 = vrot.slane %v3011_v0, 4  ;;  %v2636_v19 = vld [vmem:[%s4547_s13 + $0x146] sm:$0x1]  ;;  %v2637_v29 = vld [vmem:[%s4547_s13 + $0x14e] sm:$0x1]  ;;  %v5994_v15 = vpop.f32.mrf.mxu0 }
 0x12e   : > { %v2789_v44 = vsel %vm450_vm4, %v2788_v36, %v2787_v51  ;;  %v3162_v1 = vsel %vm441_vm1, %v3161_v38, %v3160_v10  ;;  %v3167_v46 = vrot.slane %v3012_v32, 3  ;;  %v3169_v47 = vrot.slane %v3013_v35, 2  ;;  %v2638_v34 = vld [vmem:[%s4547_s13 + $0x156] sm:$0x1]  ;;  %v2639_v42 = vld [vmem:[%s4547_s13 + $0x15e] sm:$0x1] }
 0x12f   : > { %4147 = vmatmul.mubr.f32.gmra.mxu1 %v3226_v21  ;;  %v2791_v50 = vsel %vm453_vm5, %v2790_v4, %v2789_v44  ;;  %v3164_v56 = vsel %vm444_vm2, %v3163_v39, %v3162_v1  ;;  %v3171_v57 = vrot.slane %v3014_v37, 1  ;;  %v2640_v58 = vld [vmem:[%s4547_s13 + $0x166] sm:$0x1]  ;;  %v2641_v3 = vld [vmem:[%s4547_s13 + $0x16e] sm:$0x1]  ;;  %v2794_v17 = vrot.slane %v2637_v29, 7 }
 0x130   : > { %v2793_v59 = vsel %vm456_vm6, %v2792_v31, %v2791_v50  ;;  %v3166_v45 = vsel %vm447_vm3, %v3165_v12, %v3164_v56  ;;  %v2642_v41 = vld [vmem:[%s4547_s13 + $0x176] sm:$0x1]  ;;  %v2643_v60 = vld [vmem:[%s4547_s13 + $0x17e] sm:$0x1]  ;;  %v2796_v2 = vrot.slane %v2638_v34, 6  ;;  %v2798_v61 = vrot.slane %v2639_v42, 5 }
 0x131   : > { %v2848_v62 = vadd.f32 %v3573_v40, %v2793_v59  ;;  %v3589_v48 = vld [vmem:[%s4539_s11 + $0x1e0] sm:$0xff]  ;;  %v3168_v63 = vsel %vm450_vm4, %v3167_v46, %v3166_v45  ;;  %v2795_v33 = vsel %vm438_vm0, %v2794_v17, %v2636_v19  ;;  %v2800_v5 = vrot.slane %v2640_v58, 4  ;;  %v3016_v7 = vld [vmem:[%s4547_s13 + $0x14f] sm:$0x1]  ;;  %v3017_v30 = vld [vmem:[%s4547_s13 + $0x157] sm:$0x1]  ;;  %v6005_v19 = vpop.f32.mrf.mxu1 }
 0x132   : > { %v3015_v54 = vld [vmem:[%s4547_s13 + $0x147] sm:$0x1]  ;;  %v3170_v52 = vsel %vm453_vm5, %v3169_v47, %v3168_v63  ;;  %v2797_v8 = vsel %vm441_vm1, %v2796_v2, %v2795_v33  ;;  %v2802_v11 = vrot.slane %v2641_v3, 3  ;;  %v2804_v13 = vrot.slane %v2642_v41, 2  ;;  %v3018_v18 = vld [vmem:[%s4547_s13 + $0x15f] sm:$0x1]  ;;  %v6012_v3 = vpop.f32.mrf.mxu0 }
 0x133   : > { %4105 = vmatprep.mubr.f32.mxu0 %v2848_v62  ;;  %v3172_v20 = vsel %vm456_vm6, %v3171_v57, %v3170_v52  ;;  %v2799_v53 = vsel %vm444_vm2, %v2798_v61, %v2797_v8  ;;  %v2806_v23 = vrot.slane %v2643_v60, 1  ;;  %v3019_v24 = vld [vmem:[%s4547_s13 + $0x167] sm:$0x1]  ;;  %v3020_v25 = vld [vmem:[%s4547_s13 + $0x16f] sm:$0x1]  ;;  %v3173_v14 = vrot.slane %v3016_v7, 7 }
 0x134   : > { %v3227_v55 = vadd.f32 %v3589_v48, %v3172_v20  ;;  %v2801_v6 = vsel %vm447_vm3, %v2800_v5, %v2799_v53  ;;  %v3021_v26 = vld [vmem:[%s4547_s13 + $0x177] sm:$0x1]  ;;  %v3022_v36 = vld [vmem:[%s4547_s13 + $0x17f] sm:$0x1]  ;;  %v3175_v4 = vrot.slane %v3017_v30, 6  ;;  %v3177_v28 = vrot.slane %v3018_v18, 5  ;;  %v6023_v5 = vpop.f32.mrf.mxu1 }
 0x135   : > { %v2803_v43 = vsel %vm450_vm4, %v2802_v11, %v2801_v6  ;;  %v3174_v22 = vsel %vm438_vm0, %v3173_v14, %v3015_v54  ;;  %v3179_v49 = vrot.slane %v3019_v24, 4  ;;  %v3181_v31 = vrot.slane %v3020_v25, 3  ;;  %v2644_v0 = vld [vmem:[%s4547_s13 + $0x186] sm:$0x1]  ;;  %v2645_v32 = vld [vmem:[%s4547_s13 + $0x18e] sm:$0x1]  ;;  %v6025_v54 = vpop.f32.mrf.mxu0 }
 0x136   : > { %4149 = vmatprep.mubr.f32.mxu1 %v3227_v55  ;;  %v2805_v27 = vsel %vm453_vm5, %v2804_v13, %v2803_v43  ;;  %v3176_v16 = vsel %vm441_vm1, %v3175_v4, %v3174_v22  ;;  %v3183_v35 = vrot.slane %v3021_v26, 2  ;;  %v3185_v37 = vrot.slane %v3022_v36, 1  ;;  %v2646_v38 = vld [vmem:[%s4547_s13 + $0x196] sm:$0x1]  ;;  %v2647_v39 = vld [vmem:[%s4547_s13 + $0x19e] sm:$0x1]  ;;  %v6033_v25 = vpop.f32.mrf.mxu1 }
 0x137   : > { %v2807_v21 = vsel %vm456_vm6, %v2806_v23, %v2805_v27  ;;  %v3178_v40 = vsel %vm444_vm2, %v3177_v28, %v3176_v16  ;;  %v2648_v51 = vld [vmem:[%s4547_s13 + $0x1a6] sm:$0x1]  ;;  %v2649_v10 = vld [vmem:[%s4547_s13 + $0x1ae] sm:$0x1]  ;;  %v2650_v12 = vld [vmem:[%s4547_s13 + $0x1b6] sm:$0x1] }
 0x138   : > { %v2849_v29 = vadd.f32 %v3574_v9, %v2807_v21  ;;  %v3180_v44 = vsel %vm447_vm3, %v3179_v49, %v3178_v40  ;;  %v2651_v1 = vld [vmem:[%s4547_s13 + $0x1be] sm:$0x1]  ;;  %v2808_v46 = vrot.slane %v2645_v32, 7  ;;  %v2810_v47 = vrot.slane %v2646_v38, 6  ;;  %v3590_v34 = vld [vmem:[%s4539_s11 + $0x1e8] sm:$0xff]  ;;  %v3575_v18 = vld [vmem:[%s4539_s11 + $0x1b0] sm:$0xff] }
 0x139   : > { %v3182_v42 = vsel %vm450_vm4, %v3181_v31, %v3180_v44  ;;  %v2812_v50 = vrot.slane %v2647_v39, 5  ;;  %v2814_v56 = vrot.slane %v2648_v51, 4  ;;  %v2816_v57 = vrot.slane %v2649_v10, 3  ;;  %v3023_v58 = vld [vmem:[%s4547_s13 + $0x187] sm:$0x1]  ;;  %v3591_v27 = vld [vmem:[%s4539_s11 + $0x1f0] sm:$0xff]  ;;  %v1033_v44 = vpop.f32.mrf.mxu1 }
 0x13a   : > { %4106 = vmatmul.mubr.f32.gmra.mxu0 %v2849_v29  ;;  %v3184_v17 = vsel %vm453_vm5, %v3183_v35, %v3182_v42  ;;  %v2809_v59 = vsel %vm438_vm0, %v2808_v46, %v2644_v0  ;;  %v2818_v45 = vrot.slane %v2650_v12, 2  ;;  %v2820_v41 = vrot.slane %v2651_v1, 1  ;;  %v3024_v60 = vld [vmem:[%s4547_s13 + $0x18f] sm:$0x1]  ;;  %v3025_v2 = vld [vmem:[%s4547_s13 + $0x197] sm:$0x1]  ;;  %v6044_v0 = vpop.f32.mrf.mxu0 }
 0x13b   : > { %v3186_v61 = vsel %vm456_vm6, %v3185_v37, %v3184_v17  ;;  %v2811_v62 = vsel %vm441_vm1, %v2810_v47, %v2809_v59  ;;  %v3026_v48 = vld [vmem:[%s4547_s13 + $0x19f] sm:$0x1]  ;;  %v3027_v63 = vld [vmem:[%s4547_s13 + $0x1a7] sm:$0x1]  ;;  %v3028_v33 = vld [vmem:[%s4547_s13 + $0x1af] sm:$0x1] }
 0x13c   : > { %v3228_v7 = vadd.f32 %v3590_v34, %v3186_v61  ;;  %v2813_v52 = vsel %vm444_vm2, %v2812_v50, %v2811_v62  ;;  %v3029_v8 = vld [vmem:[%s4547_s13 + $0x1b7] sm:$0x1]  ;;  %v3030_v11 = vld [vmem:[%s4547_s13 + $0x1bf] sm:$0x1]  ;;  %v3187_v13 = vrot.slane %v3024_v60, 7  ;;  %v3189_v30 = vrot.slane %v3025_v2, 6 }
 0x13d   : > { %v2815_v20 = vsel %vm447_vm3, %v2814_v56, %v2813_v52  ;;  %v3191_v9 = vrot.slane %v3026_v48, 5  ;;  %v3193_v53 = vrot.slane %v3027_v63, 4  ;;  %v3195_v23 = vrot.slane %v3028_v33, 3  ;;  %v2652_v24 = vld [vmem:[%s4547_s13 + $0x1c6] sm:$0x1] }
 0x13e   : > { %4150 = vmatmul.mubr.f32.gmra.mxu1 %v3228_v7  ;;  %v2817_v14 = vsel %vm450_vm4, %v2816_v57, %v2815_v20  ;;  %v3188_v55 = vsel %vm438_vm0, %v3187_v13, %v3023_v58  ;;  %v3197_v6 = vrot.slane %v3029_v8, 2  ;;  %v3199_v26 = vrot.slane %v3030_v11, 1  ;;  %v2653_v36 = vld [vmem:[%s4547_s13 + $0x1ce] sm:$0x1]  ;;  %v2654_v4 = vld [vmem:[%s4547_s13 + $0x1d6] sm:$0x1]  ;;  %v3887_v13 = vpop.f32.mrf.mxu1 }
 0x13f   : > { %v2819_v28 = vsel %vm453_vm5, %v2818_v45, %v2817_v14  ;;  %v3190_v43 = vsel %vm441_vm1, %v3189_v30, %v3188_v55  ;;  %v2655_v22 = vld [vmem:[%s4547_s13 + $0x1de] sm:$0x1]  ;;  %v2656_v49 = vld [vmem:[%s4547_s13 + $0x1e6] sm:$0x1]  ;;  %v2657_v31 = vld [vmem:[%s4547_s13 + $0x1ee] sm:$0x1] }
 0x140   : > { %v2821_v32 = vsel %vm456_vm6, %v2820_v41, %v2819_v28  ;;  %v3192_v16 = vsel %vm444_vm2, %v3191_v9, %v3190_v43  ;;  %v2658_v35 = vld [vmem:[%s4547_s13 + $0x1f6] sm:$0x1]  ;;  %v2659_v37 = vld [vmem:[%s4547_s13 + $0x1fe] sm:$0x1]  ;;  %v2822_v38 = vrot.slane %v2653_v36, 7  ;;  %v2824_v39 = vrot.slane %v2654_v4, 6  ;;  %v3843_v41 = vpop.f32.mrf.mxu0 }
 0x141   : > { %v2850_v21 = vadd.f32 %v3575_v18, %v2821_v32  ;;  %v3194_v40 = vsel %vm447_vm3, %v3193_v53, %v3192_v16  ;;  %v2826_v51 = vrot.slane %v2655_v22, 5  ;;  %v2828_v10 = vrot.slane %v2656_v49, 4  ;;  %v3031_v12 = vld [vmem:[%s4547_s13 + $0x1c7] sm:$0x1]  ;;  %v3032_v29 = vld [vmem:[%s4547_s13 + $0x1cf] sm:$0x1] }
 0x142   : > { %v3196_v1 = vsel %vm450_vm4, %v3195_v23, %v3194_v40  ;;  %v2823_v46 = vsel %vm438_vm0, %v2822_v38, %v2652_v24  ;;  %v2830_v47 = vrot.slane %v2657_v31, 3  ;;  %v2832_v34 = vrot.slane %v2658_v35, 2  ;;  %v3033_v42 = vld [vmem:[%s4547_s13 + $0x1d7] sm:$0x1]  ;;  %v3034_v50 = vld [vmem:[%s4547_s13 + $0x1df] sm:$0x1] }
 0x143   : > { %4108 = vmatprep.mubr.f32.mxu0 %v2850_v21  ;;  %v3198_v56 = vsel %vm453_vm5, %v3197_v6, %v3196_v1  ;;  %v2825_v57 = vsel %vm441_vm1, %v2824_v39, %v2823_v46  ;;  %v2834_v58 = vrot.slane %v2659_v37, 1  ;;  %v3035_v17 = vld [vmem:[%s4547_s13 + $0x1e7] sm:$0x1]  ;;  %v3036_v59 = vld [vmem:[%s4547_s13 + $0x1ef] sm:$0x1]  ;;  %v3201_v45 = vrot.slane %v3032_v29, 7  ;;  %v664_v6 = vpop.f32.mrf.mxu0 }
 0x144   : > { %v3200_v60 = vsel %vm456_vm6, %v3199_v26, %v3198_v56  ;;  %v2827_v2 = vsel %vm444_vm2, %v2826_v51, %v2825_v57  ;;  %v3037_v61 = vld [vmem:[%s4547_s13 + $0x1f7] sm:$0x1]  ;;  %v3038_v62 = vld [vmem:[%s4547_s13 + $0x1ff] sm:$0x1]  ;;  %v3203_v48 = vrot.slane %v3033_v42, 6  ;;  %v3205_v63 = vrot.slane %v3034_v50, 5 }
 0x145   : > { %v3229_v33 = vadd.f32 %v3591_v27, %v3200_v60  ;;  %v2829_v7 = vsel %vm447_vm3, %v2828_v10, %v2827_v2  ;;  %v3202_v52 = vsel %vm438_vm0, %v3201_v45, %v3031_v12  ;;  %v3207_v8 = vrot.slane %v3035_v17, 4  ;;  %v6071_v11 = vld [vmem:[%s6343_s3] ss:$0 sm:$0xff]  ;;  %v3576_v30 = vld [vmem:[%s4539_s11 + $0x1b8] sm:$0xff]  ;;  %s6087_s13 = scalar_lea.vmem [#allocation7], %s4535_s8  ;;  %s3610_s8 = sshll.u32 %s4376_s18, 13 }
 0x146   : > { %v2831_v18 = vsel %vm450_vm4, %v2830_v47, %v2829_v7  ;;  %v3204_v20 = vsel %vm441_vm1, %v3203_v48, %v3202_v52  ;;  %v3209_v9 = vrot.slane %v3036_v59, 3  ;;  %v3211_v53 = vrot.slane %v3037_v61, 2  ;;  %v3592_v43 = vld [vmem:[%s4539_s11 + $0x1f8] sm:$0xff]  ;;  %s3362_s11 = sshll.u32 %s6087_s13, 4  ;;  %s6286_s25 = scalar_lea.hbm %s6344_s4, %s3610_s8  ;;  %s6288_s11 = int_to_ptr.vmem [resolvable:$true] %s3362_s11 }
 0x147   : > { %4152 = vmatprep.mubr.f32.mxu1 %v3229_v33  ;;  %v2833_v23 = vsel %vm453_vm5, %v2832_v34, %v2831_v18  ;;  %v3206_v24 = vsel %vm444_vm2, %v3205_v63, %v3204_v20  ;;  %v3213_v14 = vrot.slane %v3038_v62, 1  ;;  %v650_v55 = vadd.f32 %v5994_v15, %v6071_v11  ;;  %s3346_s18 = scalar_lea.sflag [#allocation4], %s4532_s5  ;;  %s4300_s7 = scalar_lea.vmem %s6288_s11, 8192 }
 0x148   : > { %v2835_v26 = vsel %vm456_vm6, %v2834_v58, %v2833_v23  ;;  %v3208_v36 = vsel %vm447_vm3, %v3207_v8, %v3206_v24  ;;  %vm683_vm7 = vcmask 523264   ;;  %v1029_v4 = vadd.f32 %v6005_v19, %v6071_v11  ;;  %v1043_v19 = vpop.f32.mrf.mxu1  ;;  %p4301_p8 = scmp.ne.s32.totalorder %s6288_s11, %s4300_s7  ;;  %p4307_p12 = scmp.lt.s32.totalorder %s6288_s11, %s4305_s21 }
 0x149   : > { %v2851_v28 = vadd.f32 %v3576_v30, %v2835_v26  ;;  %v3210_v22 = vsel %vm450_vm4, %v3209_v9, %v3208_v36  ;;  %685 = vst.msk [vmem:[%s6087_s13 + $0x8] sm:$0xff] %vm683_vm7, %v650_v55  ;;  %v645_v15 = vadd.f32 %v6071_v11, %v6012_v3  ;;  %v1024_v49 = vadd.f32 %v6071_v11, %v6023_v5  ;;  %p4308_p1 = scmp.lt.s32.totalorder %s4306_s27, %s4300_s7 }
 0x14a   : > { %v3212_v31 = vsel %vm453_vm5, %v3211_v53, %v3210_v22  ;;  %3498 = vst.msk [vmem:[%s6087_s13 + $0x48] sm:$0xff] %vm683_vm7, %v1029_v4  ;;  %v660_v32 = vadd.f32 %v6025_v54, %v6071_v11  ;;  %v1039_v27 = vadd.f32 %v6033_v25, %v6071_v11  ;;  %v655_v3 = vadd.f32 %v6071_v11, %v6044_v0  ;;  %v3846_v0 = vpop.f32.mrf.mxu0  ;;  %v3890_v40 = vpop.f32.mrf.mxu1  ;;  %p4302_p13 = pnand %p4301_p8, %p4470_p9 }
 0x14b   : > { %4109 = vmatmul.mubr.f32.gmra.mxu0 %v2851_v28  ;;  %v3214_v5 = vsel %vm456_vm6, %v3213_v14, %v3212_v31  ;;  %684 = vst.msk [vmem:[%s6087_s13] sm:$0xff] %vm683_vm7, %v645_v15  ;;  %3497 = vst.msk [vmem:[%s6087_s13 + $0x40] sm:$0xff] %vm683_vm7, %v1024_v49  ;;  %v1034_v16 = vadd.f32 %v6071_v11, %v1033_v44  ;;  %v670_v54 = vadd.f32 %v3843_v41, %v6071_v11  ;;  %p4309_p2 = por %p4308_p1, %p4307_p12 }
 0x14c   : > { %v1049_v25 = vadd.f32 %v3887_v13, %v6071_v11  ;;  %v3230_v35 = vadd.f32 %v3592_v43, %v3214_v5  ;;  %687 = vst.msk [vmem:[%s6087_s13 + $0x18] sm:$0xff] %vm683_vm7, %v660_v32  ;;  %3500 = vst.msk [vmem:[%s6087_s13 + $0x58] sm:$0xff] %vm683_vm7, %v1039_v27  ;;  %v665_v37 = vadd.f32 %v6071_v11, %v664_v6  ;;  %v674_v21 = vpop.f32.mrf.mxu0  ;;  %v1053_v12 = vpop.f32.mrf.mxu1  ;;  %p4303_p0 = pneg %p4302_p13 }
 0x14d   : > { %686 = vst.msk [vmem:[%s6087_s13 + $0x10] sm:$0xff] %vm683_vm7, %v655_v3  ;;  %v1044_v38 = vadd.f32 %v6071_v11, %v1043_v19  ;;  %v680_v39 = vadd.f32 %v3846_v0, %v6071_v11  ;;  %3499 = vst.msk [vmem:[%s6087_s13 + $0x50] sm:$0xff] %vm683_vm7, %v1034_v16  ;;  %v675_v51 = vadd.f32 %v6071_v11, %v674_v21 }
 0x14e   : > { %689 = vst.msk [vmem:[%s6087_s13 + $0x28] sm:$0xff] %vm683_vm7, %v670_v54  ;;  %3502 = vst.msk [vmem:[%s6087_s13 + $0x68] sm:$0xff] %vm683_vm7, %v1049_v25  ;;  %4153 = vmatmul.mubr.f32.gmra.mxu1 %v3230_v35  ;;  %v1059_v10 = vadd.f32 %v3890_v40, %v6071_v11  ;;  %v1054_v29 = vadd.f32 %v6071_v11, %v1053_v12  ;;  %p4310_p3 = pnand %p4309_p2, %p4303_p0 }
 0x14f   : > { %688 = vst.msk [vmem:[%s6087_s13 + $0x20] sm:$0xff] %vm683_vm7, %v665_v37  ;;  %3501 = vst.msk [vmem:[%s6087_s13 + $0x60] sm:$0xff] %vm683_vm7, %v1044_v38 }
 0x150   : > { %691 = vst.msk [vmem:[%s6087_s13 + $0x38] sm:$0xff] %vm683_vm7, %v680_v39  ;;  %690 = vst.msk [vmem:[%s6087_s13 + $0x30] sm:$0xff] %vm683_vm7, %v675_v51 }
 0x151   : > { %3504 = vst.msk [vmem:[%s6087_s13 + $0x78] sm:$0xff] %vm683_vm7, %v1059_v10  ;;  %3503 = vst.msk [vmem:[%s6087_s13 + $0x70] sm:$0xff] %vm683_vm7, %v1054_v29 }
 0x156   : > { %v3925_v44 = vpop.f32.mrf.mxu0 }
 0x157   : > { %v1408_v1 = vadd.f32 %v3925_v44, %v6071_v11 }
 0x158   : > { %v1402_v46 = vpop.f32.mrf.mxu0 }
 0x159   : > { %3514 = vst.msk [vmem:[%s6087_s13 + $0x88] sm:$0xff] %vm683_vm7, %v1408_v1  ;;  %v1403_v47 = vadd.f32 %v6071_v11, %v1402_v46 }
 0x15b   : > { %v3969_v34 = vpop.f32.mrf.mxu1  ;;  %3513 = vst.msk [vmem:[%s6087_s13 + $0x80] sm:$0xff] %vm683_vm7, %v1403_v47 }
 0x15c   : > { %v1787_v42 = vadd.f32 %v3969_v34, %v6071_v11 }
 0x15d   : > { %v1781_v50 = vpop.f32.mrf.mxu1 }
 0x15e   : > { %3530 = vst.msk [vmem:[%s6087_s13 + $0xc8] sm:$0xff] %vm683_vm7, %v1787_v42  ;;  %v1782_v56 = vadd.f32 %v6071_v11, %v1781_v50 }
 0x160   : > { %3529 = vst.msk [vmem:[%s6087_s13 + $0xc0] sm:$0xff] %vm683_vm7, %v1782_v56 }
 0x16c   : > { %v3928_v57 = vpop.f32.mrf.mxu0 }
 0x16d   : > { %v1418_v58 = vadd.f32 %v3928_v57, %v6071_v11 }
 0x16e   : > { %v3972_v17 = vpop.f32.mrf.mxu1  ;;  %v1412_v45 = vpop.f32.mrf.mxu0 }
 0x16f   : > { %v1797_v59 = vadd.f32 %v3972_v17, %v6071_v11  ;;  %3516 = vst.msk [vmem:[%s6087_s13 + $0x98] sm:$0xff] %vm683_vm7, %v1418_v58  ;;  %v1413_v41 = vadd.f32 %v6071_v11, %v1412_v45 }
 0x170   : > { %v1791_v60 = vpop.f32.mrf.mxu1 }
 0x171   : > { %3532 = vst.msk [vmem:[%s6087_s13 + $0xd8] sm:$0xff] %vm683_vm7, %v1797_v59  ;;  %v1792_v2 = vadd.f32 %v6071_v11, %v1791_v60  ;;  %3515 = vst.msk [vmem:[%s6087_s13 + $0x90] sm:$0xff] %vm683_vm7, %v1413_v41 }
 0x173   : > { %3531 = vst.msk [vmem:[%s6087_s13 + $0xd0] sm:$0xff] %vm683_vm7, %v1792_v2 }
 0x178   : > { %v3931_v61 = vpop.f32.mrf.mxu0 }
 0x179   : > { %v1428_v62 = vadd.f32 %v3931_v61, %v6071_v11 }
 0x17a   : > { %v1422_v48 = vpop.f32.mrf.mxu0 }
 0x17b   : > { %3518 = vst.msk [vmem:[%s6087_s13 + $0xa8] sm:$0xff] %vm683_vm7, %v1428_v62  ;;  %v1423_v33 = vadd.f32 %v6071_v11, %v1422_v48 }
 0x17d   : > { %3517 = vst.msk [vmem:[%s6087_s13 + $0xa0] sm:$0xff] %vm683_vm7, %v1423_v33 }
 0x17e   : > { %v3975_v63 = vpop.f32.mrf.mxu1 }
 0x17f   : > { %v1807_v7 = vadd.f32 %v3975_v63, %v6071_v11 }
 0x180   : > { %v1801_v52 = vpop.f32.mrf.mxu1 }
 0x181   : > { %3534 = vst.msk [vmem:[%s6087_s13 + $0xe8] sm:$0xff] %vm683_vm7, %v1807_v7  ;;  %v1802_v8 = vadd.f32 %v6071_v11, %v1801_v52 }
 0x183   : > { %3533 = vst.msk [vmem:[%s6087_s13 + $0xe0] sm:$0xff] %vm683_vm7, %v1802_v8 }
 0x189   : > { %v3934_v13 = vpop.f32.mrf.mxu0 }
 0x18a   : > { %v1438_v30 = vadd.f32 %v3934_v13, %v6071_v11 }
 0x18b   : > { %v1432_v18 = vpop.f32.mrf.mxu0 }
 0x18c   : > { %3520 = vst.msk [vmem:[%s6087_s13 + $0xb8] sm:$0xff] %vm683_vm7, %v1438_v30  ;;  %v1433_v20 = vadd.f32 %v6071_v11, %v1432_v18 }
 0x18d   : > { %v3978_v9 = vpop.f32.mrf.mxu1 }
 0x18e   : > { %v1817_v53 = vadd.f32 %v3978_v9, %v6071_v11  ;;  %3519 = vst.msk [vmem:[%s6087_s13 + $0xb0] sm:$0xff] %vm683_vm7, %v1433_v20 }
 0x18f   : > { %v1811_v23 = vpop.f32.mrf.mxu1 }
 0x190   : > { %3536 = vst.msk [vmem:[%s6087_s13 + $0xf8] sm:$0xff] %vm683_vm7, %v1817_v53  ;;  %v1812_v24 = vadd.f32 %v6071_v11, %v1811_v23 }
 0x192   : > { %3535 = vst.msk [vmem:[%s6087_s13 + $0xf0] sm:$0xff] %vm683_vm7, %v1812_v24 }
 0x199   : > { %v4013_v14 = vpop.f32.mrf.mxu0 }
 0x19a   : > { %v2166_v55 = vadd.f32 %v4013_v14, %v6071_v11 }
 0x19b   : > { %v2160_v6 = vpop.f32.mrf.mxu0 }
 0x19c   : > { %3546 = vst.msk [vmem:[%s6087_s13 + $0x108] sm:$0xff] %vm683_vm7, %v2166_v55  ;;  %v2161_v26 = vadd.f32 %v6071_v11, %v2160_v6 }
 0x19d   : > { %v4057_v36 = vpop.f32.mrf.mxu1 }
 0x19e   : > { %v2545_v4 = vadd.f32 %v4057_v36, %v6071_v11  ;;  %3545 = vst.msk [vmem:[%s6087_s13 + $0x100] sm:$0xff] %vm683_vm7, %v2161_v26 }
 0x19f   : > { %v2539_v28 = vpop.f32.mrf.mxu1 }
 0x1a0   : > { %3562 = vst.msk [vmem:[%s6087_s13 + $0x148] sm:$0xff] %vm683_vm7, %v2545_v4  ;;  %v2540_v43 = vadd.f32 %v6071_v11, %v2539_v28 }
 0x1a2   : > { %3561 = vst.msk [vmem:[%s6087_s13 + $0x140] sm:$0xff] %vm683_vm7, %v2540_v43 }
 0x1ad   : > { %v4016_v22 = vpop.f32.mrf.mxu0 }
 0x1ae   : > { %v2176_v15 = vadd.f32 %v4016_v22, %v6071_v11 }
 0x1af   : > { %v4060_v49 = vpop.f32.mrf.mxu1  ;;  %v2170_v19 = vpop.f32.mrf.mxu0 }
 0x1b0   : > { %3548 = vst.msk [vmem:[%s6087_s13 + $0x118] sm:$0xff] %vm683_vm7, %v2176_v15  ;;  %v2555_v31 = vadd.f32 %v4060_v49, %v6071_v11  ;;  %v2171_v32 = vadd.f32 %v6071_v11, %v2170_v19 }
 0x1b1   : > { %v2549_v27 = vpop.f32.mrf.mxu1 }
 0x1b2   : > { %3564 = vst.msk [vmem:[%s6087_s13 + $0x158] sm:$0xff] %vm683_vm7, %v2555_v31  ;;  %3547 = vst.msk [vmem:[%s6087_s13 + $0x110] sm:$0xff] %vm683_vm7, %v2171_v32  ;;  %v2550_v3 = vadd.f32 %v6071_v11, %v2549_v27 }
 0x1b4   : > { %3563 = vst.msk [vmem:[%s6087_s13 + $0x150] sm:$0xff] %vm683_vm7, %v2550_v3 }
 0x1ba   : > { %v4019_v5 = vpop.f32.mrf.mxu0 }
 0x1bb   : > { %v2186_v16 = vadd.f32 %v4019_v5, %v6071_v11 }
 0x1bc   : > { %v2180_v54 = vpop.f32.mrf.mxu0 }
 0x1bd   : > { %3550 = vst.msk [vmem:[%s6087_s13 + $0x128] sm:$0xff] %vm683_vm7, %v2186_v16  ;;  %v2181_v25 = vadd.f32 %v6071_v11, %v2180_v54 }
 0x1be   : > { %v4063_v0 = vpop.f32.mrf.mxu1 }
 0x1bf   : > { %v2565_v35 = vadd.f32 %v4063_v0, %v6071_v11  ;;  %3549 = vst.msk [vmem:[%s6087_s13 + $0x120] sm:$0xff] %vm683_vm7, %v2181_v25 }
 0x1c0   : > { %v2559_v37 = vpop.f32.mrf.mxu1 }
 0x1c1   : > { %3566 = vst.msk [vmem:[%s6087_s13 + $0x168] sm:$0xff] %vm683_vm7, %v2565_v35  ;;  %v2560_v38 = vadd.f32 %v6071_v11, %v2559_v37 }
 0x1c3   : > { %3565 = vst.msk [vmem:[%s6087_s13 + $0x160] sm:$0xff] %vm683_vm7, %v2560_v38 }
 0x1c9   : > { %v4022_v39 = vpop.f32.mrf.mxu0 }
 0x1ca   : > { %v2196_v21 = vadd.f32 %v4022_v39, %v6071_v11 }
 0x1cb   : > { %v2190_v40 = vpop.f32.mrf.mxu0 }
 0x1cc   : > { %3552 = vst.msk [vmem:[%s6087_s13 + $0x138] sm:$0xff] %vm683_vm7, %v2196_v21  ;;  %v2191_v51 = vadd.f32 %v6071_v11, %v2190_v40 }
 0x1ce   : > { %v4066_v10 = vpop.f32.mrf.mxu1  ;;  %3551 = vst.msk [vmem:[%s6087_s13 + $0x130] sm:$0xff] %vm683_vm7, %v2191_v51 }
 0x1cf   : > { %v2575_v12 = vadd.f32 %v4066_v10, %v6071_v11 }
 0x1d0   : > { %v2569_v29 = vpop.f32.mrf.mxu1 }
 0x1d1   : > { %3568 = vst.msk [vmem:[%s6087_s13 + $0x178] sm:$0xff] %vm683_vm7, %v2575_v12  ;;  %v2570_v44 = vadd.f32 %v6071_v11, %v2569_v29 }
 0x1d3   : > { %3567 = vst.msk [vmem:[%s6087_s13 + $0x170] sm:$0xff] %vm683_vm7, %v2570_v44 }
 0x1da   : > { %v4101_v1 = vpop.f32.mrf.mxu0 }
 0x1db   : > { %v2924_v46 = vadd.f32 %v4101_v1, %v6071_v11 }
 0x1dc   : > { %v2918_v47 = vpop.f32.mrf.mxu0 }
 0x1dd   : > { %3578 = vst.msk [vmem:[%s6087_s13 + $0x188] sm:$0xff] %vm683_vm7, %v2924_v46  ;;  %v2919_v42 = vadd.f32 %v6071_v11, %v2918_v47 }
 0x1de   : > { %v4145_v34 = vpop.f32.mrf.mxu1 }
 0x1df   : > { %v3303_v50 = vadd.f32 %v4145_v34, %v6071_v11  ;;  %3577 = vst.msk [vmem:[%s6087_s13 + $0x180] sm:$0xff] %vm683_vm7, %v2919_v42 }
 0x1e0   : > { %v3297_v56 = vpop.f32.mrf.mxu1 }
 0x1e1   : > { %3594 = vst.msk [vmem:[%s6087_s13 + $0x1c8] sm:$0xff] %vm683_vm7, %v3303_v50  ;;  %v3298_v57 = vadd.f32 %v6071_v11, %v3297_v56 }
 0x1e3   : > { %3593 = vst.msk [vmem:[%s6087_s13 + $0x1c0] sm:$0xff] %vm683_vm7, %v3298_v57 }
 0x1eb   : > { %v4104_v58 = vpop.f32.mrf.mxu0 }
 0x1ec   : > { %v2934_v17 = vadd.f32 %v4104_v58, %v6071_v11 }
 0x1ed   : > { %v2928_v59 = vpop.f32.mrf.mxu0 }
 0x1ee   : > { %3580 = vst.msk [vmem:[%s6087_s13 + $0x198] sm:$0xff] %vm683_vm7, %v2934_v17  ;;  %v2929_v45 = vadd.f32 %v6071_v11, %v2928_v59 }
 0x1ef   : > { %v4148_v41 = vpop.f32.mrf.mxu1 }
 0x1f0   : > { %v3313_v60 = vadd.f32 %v4148_v41, %v6071_v11  ;;  %3579 = vst.msk [vmem:[%s6087_s13 + $0x190] sm:$0xff] %vm683_vm7, %v2929_v45 }
 0x1f1   : > { %v3307_v2 = vpop.f32.mrf.mxu1 }
 0x1f2   : > { %3596 = vst.msk [vmem:[%s6087_s13 + $0x1d8] sm:$0xff] %vm683_vm7, %v3313_v60  ;;  %v3308_v61 = vadd.f32 %v6071_v11, %v3307_v2 }
 0x1f4   : > { %3595 = vst.msk [vmem:[%s6087_s13 + $0x1d0] sm:$0xff] %vm683_vm7, %v3308_v61 }
 0x1fa   : > { %v4107_v62 = vpop.f32.mrf.mxu0 }
 0x1fb   : > { %v2944_v48 = vadd.f32 %v4107_v62, %v6071_v11 }
 0x1fc   : > { %v2938_v63 = vpop.f32.mrf.mxu0 }
 0x1fd   : > { %3582 = vst.msk [vmem:[%s6087_s13 + $0x1a8] sm:$0xff] %vm683_vm7, %v2944_v48  ;;  %v2939_v33 = vadd.f32 %v6071_v11, %v2938_v63 }
 0x1fe   : > { %v4151_v7 = vpop.f32.mrf.mxu1 }
 0x1ff   : > { %v3323_v52 = vadd.f32 %v4151_v7, %v6071_v11  ;;  %3581 = vst.msk [vmem:[%s6087_s13 + $0x1a0] sm:$0xff] %vm683_vm7, %v2939_v33 }
 0x200   : > { %v3317_v8 = vpop.f32.mrf.mxu1 }
 0x201   : > { %3598 = vst.msk [vmem:[%s6087_s13 + $0x1e8] sm:$0xff] %vm683_vm7, %v3323_v52  ;;  %v3318_v13 = vadd.f32 %v6071_v11, %v3317_v8 }
 0x203   : > { %3597 = vst.msk [vmem:[%s6087_s13 + $0x1e0] sm:$0xff] %vm683_vm7, %v3318_v13 }
 0x20b   : > { %v4110_v30 = vpop.f32.mrf.mxu0 }
 0x20c   : > { %v2954_v18 = vadd.f32 %v4110_v30, %v6071_v11 }
 0x20d   : > { %v2948_v20 = vpop.f32.mrf.mxu0 }
 0x20e   : > { %3584 = vst.msk [vmem:[%s6087_s13 + $0x1b8] sm:$0xff] %vm683_vm7, %v2954_v18  ;;  %v4154_v9 = vpop.f32.mrf.mxu1  ;;  %v2949_v53 = vadd.f32 %v6071_v11, %v2948_v20 }
 0x20f   : > { %v3333_v23 = vadd.f32 %v4154_v9, %v6071_v11 }
 0x210   : > { %3583 = vst.msk [vmem:[%s6087_s13 + $0x1b0] sm:$0xff] %vm683_vm7, %v2949_v53  ;;  %v3327_v24 = vpop.f32.mrf.mxu1 }
 0x211   : > { %3600 = vst.msk [vmem:[%s6087_s13 + $0x1f8] sm:$0xff] %vm683_vm7, %v3333_v23  ;;  %v3328_v14 = vadd.f32 %v6071_v11, %v3327_v24 }
 0x213   : > { %3599 = vst.msk [vmem:[%s6087_s13 + $0x1f0] sm:$0xff] %vm683_vm7, %v3328_v14 }
 0x214   : > { %4313 = shalt.err (!%p4310_p3)
}
 0x215   : > { %s4314_s22 = scalar_lea.hbm %s6286_s25, 8192  ;;  %s4318_s6 = scalar_lea.hbm %s6344_s4, 65536 }
 0x216   : > { %p4315_p5 = scmp.ne.s32.totalorder %s6286_s25, %s4314_s22  ;;  %p4319_p7 = scmp.lt.s32.totalorder %s6286_s25, %s6344_s4 }
 0x217   : > { %p4320_p10 = scmp.lt.s32.totalorder %s4318_s6, %s4314_s22 }
 0x218   : > { %p4316_p4 = pnand %p4315_p5, %p4470_p9 }
 0x219   : > { %p4321_p8 = por %p4320_p10, %p4319_p7 }
 0x21a   : > { %p4317_p6 = pneg %p4316_p4 }
 0x21c   : > { %p4322_p13 = pnand %p4321_p8, %p4317_p6 }
 0x21e   : > { %4325 = shalt.err (!%p4322_p13)
}
 0x21f   : > { %s4392_s14 = smov 128   ;;  %s4393_s13 = smov 8  }
 0x220   : > { %4159 = dma.vmem_to_hbm [thread:$0]  (%p4470_p9), %s6288_s11, 8192, %s6286_s25, %s3346_s18, %s4392_s14, %s4392_s14, %s4393_s13  }
 0x221 PF: > { %p4173_p0 = scmp.ge.s32.totalorder %s4384_s20, 2  ;;  %s3377_s8 = sand.u32 1, %s4364_s15  }
 0x222   : > { %s3378_s23 = scalar_lea.sflag [#allocation4], %s3377_s8 }
 0x223   : > { %p4169_p12 = pnand %p4173_p0, %p4477_p11 }
 0x225   : > { %p4170_p1 = pneg %p4169_p12 }
 0x227   : > { %4359 = dma.done.wait (%p4170_p1), %s3378_s23, 8192  }
 0x228   : > { %4361 = vsyncadd (%p4170_p1), %s3378_s23, 4294959104  ;;  %s23_s20 = sadd.s32 1, %s4384_s20   ;;  %s6355_s28 = sld [smem:[#allocation11_spill]] }
 0x229   : > { %p20_p2 = scmp.ge.s32.totalorder %s23_s20, 10   ;;  %s6356_s15 = smov %s4368_s16 }
 0x22a   : > { %s6357_s16 = smov %s4372_s17  ;;  %s6358_s17 = smov %s4475_s29 }
 0x22b   : > { %s6359_s18 = smov %s4380_s19  ;;  %22 = sbr.rel (!%p20_p2) target bundleno = 10 (0xa), region = 108 }
 0x22e   : > { %s6360_s19 = smov %s6355_s28 }
 0x230   :  { %3383 = vsyncpa [#allocation3], 1 }
 0x231   :  { %3385 = vsyncpa [#allocation3 + $0x1], 1 }
 0x232   :  { %3386 = vsyncpa [#allocation6], 1 }
 0x233   :  { %3388 = vsyncpa [#allocation6 + $0x1], 1 }
 0x234   :  { %3389 = vsyncpa [#allocation4], 1 }
 0x235   :  { %3391 = vsyncpa [#allocation4 + $0x1], 1 }

// kernel: _forward_split.1
= control target key start
LH: loop header
LB: loop body
LE: loop exit
PB: predicated region body
PF: predicated region fallthrough
CT: control target
= control target key end

     0   :  { %8 = vsyncpa [#allocation3], 0  ;;  %s4287_s0 = inlined_call_operand.hbm [shape: f32[4096,128], index: 0, kind: input, shape index: {}]   ;;  %s4288_s1 = inlined_call_operand.vmem [shape: f32[128,64], index: 1, kind: input, shape index: {}]   ;;  %s4289_s2 = inlined_call_operand.hbm [shape: f32[1,64], index: 2, kind: input, shape index: {}]   ;;  %s4290_s3 = inlined_call_operand.vmem [shape: f32[4096,64], index: 3, kind: output, shape index: {}]  }
   0x1   :  { %10 = vsyncpa [#allocation3 + $0x1], 0 }
   0x2   :  { %11 = vsyncpa [#allocation5], 0  ;;  %s3072_s12 = smov 0   ;;  %s3074_s13 = smov 0  }
   0x3   :  { %s3076_s14 = smov 0   ;;  %s3078_s15 = smov 0  }
   0x4 LB: > { %s2164_s16 = sadd.s32 4294967295, %s3046_s15   ;;  %s3092_s17 = sadd.s32 1, %s3046_s15   ;;  %s3046_s15 = sphi %s3078_s15, %s4307_s15   ;;  %s3042_s14 = sphi %s3076_s14, %s4306_s14   ;;  %s3038_s13 = sphi %s3074_s13, %s4305_s13   ;;  %s3034_s12 = sphi %s3072_s12, %s4304_s12  }
   0x5   : > { %s21_s18 = ssub.s32 %s3046_s15, %s3092_s17  ;;  %s24_s19 = sadd.s32 1, %s3042_s14 }
   0x6   : > { %p22_p0 = scmp.eq.s32.totalorder %s21_s18, 0  ;;  %p31_p1 = scmp.ne.s32.totalorder %s3042_s14, %s3038_s13 }
   0x7   : > { %p32_p2 = scmp.eq.s32.totalorder %s3046_s15, 0  ;;  %p37_p3 = scmp.ne.s32.totalorder %s3038_s13, %s3034_s12 }
   0x8   : > { %s3102_s20 = scalar_select %p22_p0, %s3042_s14, %s24_s19  }
   0x9   : > { %p3104_p4 = por %p32_p2, %p31_p1  ;;  %p3110_p5 = scmp.eq.s32.totalorder %s2164_s16, 0 }
   0xa   : > { %p2166_p6 = scmp.ge.s32.totalorder %s3046_s15, 1  ;;  %p116_p7 = scmp.lt.s32.totalorder %s3046_s15, 3 }
   0xb   : > { %s4296_s22 = scalar_select %p3110_p5, 1, 0 }
   0xc   : > { %p3118_p8 = por %p3110_p5, %p37_p3  ;;  %p3122_p9 = pnand %p2166_p6, %p116_p7 }
   0xd   : > { %s3048_s25 = smov [#allocation4]   ;;  %p2916_p11 = scmp.lt.s32.totalorder %s3046_s15, 2 }
   0xe   : > { %s4297_s23 = scalar_select %p3118_p8, 1, 0 }
   0xf   : > { %s4298_s24 = scalar_select %p3122_p9, 1, 0 }
  0x10   : > { %s132_s26 = sshll.u32 %s3048_s25, 4  ;;  %p2907_p10 = pneg %p3122_p9  ;;  %s133_s26 = int_to_ptr.vmem [resolvable:$true] %s132_s26 }
  0x11   : > { %s143_s27 = sand.u32 1, %s3042_s14   ;;  %p3138_p13 = pnand %p2916_p11, %p3104_p4 }
  0x12   : > { %p3132_p12 = pnand %p2907_p10, %p3110_p5  ;;  %s2169_s30 = sshll.u32 %s143_s27, 11 }
  0x13   : > { %s2965_s4 = scalar_lea.vmem %s133_s26, 16  ;;  %s2972_s5 = scalar_lea.vmem %s133_s26, 32 }
  0x14   : > { %p2956_p0 = pneg %p3132_p12  ;;  %p2966_p1 = scmp.ne.s32.totalorder %s133_s26, %s2965_s4 }
  0x15   : > { %p2973_p6 = scmp.lt.s32.totalorder %s133_s26, %s133_s26  ;;  %p2974_p7 = scmp.lt.s32.totalorder %s2972_s5, %s2965_s4 }
  0x16   : > { %p2968_p2 = pnand %p2966_p1, %p2956_p0 }
  0x17   : > { %p2975_p10 = por %p2974_p7, %p2973_p6 }
  0x18   : > { %p2969_p3 = pneg %p2968_p2 }
  0x1a   : > { %p2976_p5 = pnand %p2975_p10, %p2969_p3 }
  0x1c   : > { %2979 = shalt.err (!%p2976_p5)
}
  0x1d   : > { %2910 = dma.hbm_to_vmem [thread:$0]  (!%p3132_p12), %s4289_s2, 16, %s133_s26, [#allocation5]  }
  0x1e   : > { %s2180_s8 = sshll.u32 %s3046_s15, 15  ;;  %s147_s12 = scalar_lea.vmem [#allocation2], %s2169_s30 }
  0x1f   : > { %s3153_s11 = scalar_lea.hbm %s4287_s0, %s2180_s8  ;;  %s154_s18 = sshll.u32 %s147_s12, 4  ;;  %s3155_s18 = int_to_ptr.vmem [resolvable:$true] %s154_s18 }
  0x20   : > { %s3157_s19 = scalar_lea.sflag [#allocation3], %s143_s27  ;;  %s2980_s21 = scalar_lea.hbm %s3153_s11, 32768 }
  0x21   : > { %p2981_p4 = scmp.ne.s32.totalorder %s3153_s11, %s2980_s21  ;;  %p2982_p5 = pneg %p3138_p13 }
  0x22   : > { %s2985_s28 = scalar_lea.hbm %s4287_s0, 65536  ;;  %p2986_p0 = scmp.lt.s32.totalorder %s3153_s11, %s4287_s0 }
  0x23   : > { %p2983_p11 = pnand %p2982_p5, %p2981_p4  ;;  %p2987_p1 = scmp.lt.s32.totalorder %s2985_s28, %s2980_s21 }
  0x25   : > { %p2984_p12 = pneg %p2983_p11  ;;  %p2988_p2 = por %p2987_p1, %p2986_p0 }
  0x27   : > { %p2989_p3 = pnand %p2988_p2, %p2984_p12 }
  0x29   : > { %2992 = shalt.err (!%p2989_p3)
}
  0x2a   : > { %s2993_s27 = scalar_lea.vmem %s3155_s18, 32768  ;;  %s3049_s30 = smov [#allocation2]  }
  0x2b   : > { %p2994_p6 = scmp.ne.s32.totalorder %s3155_s18, %s2993_s27  ;;  %s2998_s6 = sshll.u32 %s3049_s30, 4  ;;  %s2999_s6 = int_to_ptr.vmem [resolvable:$false] %s2998_s6 }
  0x2c   : > { %s3000_s7 = scalar_lea.vmem %s2999_s6, 65536  ;;  %p3001_p4 = scmp.lt.s32.totalorder %s3155_s18, %s2999_s6 }
  0x2d   : > { %p2996_p7 = pnand %p2994_p6, %p2982_p5  ;;  %p3002_p11 = scmp.lt.s32.totalorder %s3000_s7, %s2993_s27 }
  0x2f   : > { %p2997_p10 = pneg %p2996_p7  ;;  %p3003_p8 = por %p3002_p11, %p3001_p4 }
  0x31   : > { %p3004_p9 = pnand %p3003_p8, %p2997_p10 }
  0x33   : > { %3007 = shalt.err (!%p3004_p9)
}
  0x34   : > { %s3050_s8 = smov 128   ;;  %s3051_s9 = smov 8  }
  0x35   : > { %2914 = dma.hbm_to_vmem [thread:$0]  (!%p3138_p13), %s3153_s11, 32768, %s3155_s18, %s3157_s19, %s3050_s8, %s3050_s8, %s3051_s9  }
  0x36   : > { %p4301_p5 = scmp.ne.s32.totalorder %s4298_s24, 0 }
  0x37   : > { %s168_s10 = sand.u32 (!%p4301_p5), 1, %s3038_s13   ;;  %p4302_p8 = scmp.ne.s32.totalorder (!%p4301_p5), %s4297_s23, 0 }
  0x38   : > { %166 = sbr.rel (%p4301_p5) target bundleno = 549 (0x225), region = 32  ;;  %s2173_s12 = sshll.u32 (!%p4301_p5), %s168_s10, 11 }
  0x39   : > { %s169_s21 = scalar_lea.sflag (!%p4301_p5), [#allocation3], %s168_s10  ;;  %s3181_s25 = scalar_lea.vmem (!%p4301_p5), [#allocation2], %s2173_s12 }
  0x3d   : > { %3025 = dma.done.wait (%p4302_p8), %s169_s21, 32768  }
  0x3e   : > { %3027 = vsyncadd (%p4302_p8), %s169_s21, 4294934528  ;;  %p4303_p9 = scmp.ne.s32.totalorder %s4296_s22, 0 }
  0x40   : > { %3029 = dma.done.wait (%p4303_p9), [#allocation5], 16  }
  0x41   : > { %3031 = vsyncadd (%p4303_p9), [#allocation5], 4294967280  ;;  %v477_v0 = vld [vmem:[%s4288_s1 + $0x78] sm:$0xff]  ;;  %v476_v1 = vld [vmem:[%s4288_s1 + $0x70] sm:$0xff]  ;;  %s2175_s30 = sshll.u32 %s2164_s16, 8  ;;  %vm1830_vm0 = vcmask 523264  }
  0x42   : > { %2453 = vmatprep.subr.mxu0 %v477_v0  ;;  %2869 = vmatprep.subr.mxu1 %v477_v0  ;;  %v475_v2 = vld [vmem:[%s4288_s1 + $0x68] sm:$0xff]  ;;  %v474_v3 = vld [vmem:[%s4288_s1 + $0x60] sm:$0xff]  ;;  %v473_v4 = vld [vmem:[%s4288_s1 + $0x58] sm:$0xff]  ;;  %p201_p13 = scmp.lt.s32.totalorder %s2175_s30, 511 }
  0x43   : > { %2454 = vmatpush3.msra.mxu0 %v477_v0  ;;  %2885 = vmatpush3.msra.mxu1 %v477_v0  ;;  %v472_v5 = vld [vmem:[%s4288_s1 + $0x50] sm:$0xff]  ;;  %v471_v6 = vld [vmem:[%s4288_s1 + $0x48] sm:$0xff]  ;;  %v470_v7 = vld [vmem:[%s4288_s1 + $0x40] sm:$0xff] }
  0x44   : > { %2455 = vmatprep.subr.mxu0 %v476_v1  ;;  %2870 = vmatprep.subr.mxu1 %v476_v1  ;;  %v469_v8 = vld [vmem:[%s4288_s1 + $0x38] sm:$0xff]  ;;  %v468_v9 = vld [vmem:[%s4288_s1 + $0x30] sm:$0xff]  ;;  %v467_v10 = vld [vmem:[%s4288_s1 + $0x28] sm:$0xff]  ;;  %s4309_s30 = smov (!%p201_p13, %s2175_s30), 511 }
  0x45   : > { %2456 = vmatpush3.msra.mxu0 %v476_v1  ;;  %2886 = vmatpush3.msra.mxu1 %v476_v1  ;;  %v466_v11 = vld [vmem:[%s4288_s1 + $0x20] sm:$0xff]  ;;  %v465_v12 = vld [vmem:[%s4288_s1 + $0x18] sm:$0xff]  ;;  %v464_v13 = vld [vmem:[%s4288_s1 + $0x10] sm:$0xff]  ;;  %s2176_s15 = sshll.u32 %s4309_s30, 3 }
  0x46   : > { %2457 = vmatprep.subr.mxu0 %v475_v2  ;;  %2871 = vmatprep.subr.mxu1 %v475_v2  ;;  %v463_v14 = vld [vmem:[%s4288_s1 + $0x8] sm:$0xff]  ;;  %v462_v15 = vld [vmem:[%s4288_s1] sm:$0xff]  ;;  %v208_v20 = vld [vmem:[%s3181_s25 + $0x10] sm:$0xff]  ;;  %s3444_s7 = scalar_lea.vmem %s4290_s3, %s2176_s15 }
  0x47   : > { %2458 = vmatpush3.msra.mxu0 %v475_v2  ;;  %2887 = vmatpush3.msra.mxu1 %v475_v2  ;;  %v206_v16 = vld [vmem:[%s3181_s25] sm:$0xff]  ;;  %v207_v18 = vld [vmem:[%s3181_s25 + $0x8] sm:$0xff]  ;;  %v336_v21 = vld [vmem:[%s3181_s25 + $0x410] sm:$0xff] }
  0x48   : > { %2459 = vmatprep.subr.mxu0 %v474_v3  ;;  %2872 = vmatprep.subr.mxu1 %v474_v3  ;;  %v334_v17 = vld [vmem:[%s3181_s25 + $0x400] sm:$0xff]  ;;  %v335_v19 = vld [vmem:[%s3181_s25 + $0x408] sm:$0xff]  ;;  %v209_v22 = vld [vmem:[%s3181_s25 + $0x18] sm:$0xff] }
  0x49   : > { %2460 = vmatpush3.msra.mxu0 %v474_v3  ;;  %2888 = vmatpush3.msra.mxu1 %v474_v3  ;;  %v337_v23 = vld [vmem:[%s3181_s25 + $0x418] sm:$0xff]  ;;  %v210_v24 = vld [vmem:[%s3181_s25 + $0x20] sm:$0xff]  ;;  %v211_v26 = vld [vmem:[%s3181_s25 + $0x28] sm:$0xff] }
  0x4a   : > { %2461 = vmatprep.subr.mxu0 %v473_v4  ;;  %2873 = vmatprep.subr.mxu1 %v473_v4  ;;  %v338_v25 = vld [vmem:[%s3181_s25 + $0x420] sm:$0xff]  ;;  %v339_v27 = vld [vmem:[%s3181_s25 + $0x428] sm:$0xff]  ;;  %v212_v28 = vld [vmem:[%s3181_s25 + $0x30] sm:$0xff] }
  0x4b   : > { %2462 = vmatpush3.msra.mxu0 %v473_v4  ;;  %2889 = vmatpush3.msra.mxu1 %v473_v4  ;;  %v340_v29 = vld [vmem:[%s3181_s25 + $0x430] sm:$0xff]  ;;  %v213_v30 = vld [vmem:[%s3181_s25 + $0x38] sm:$0xff]  ;;  %v214_v32 = vld [vmem:[%s3181_s25 + $0x40] sm:$0xff] }
  0x4c   : > { %2463 = vmatprep.subr.mxu0 %v472_v5  ;;  %2874 = vmatprep.subr.mxu1 %v472_v5  ;;  %v341_v31 = vld [vmem:[%s3181_s25 + $0x438] sm:$0xff]  ;;  %v342_v33 = vld [vmem:[%s3181_s25 + $0x440] sm:$0xff]  ;;  %v215_v34 = vld [vmem:[%s3181_s25 + $0x48] sm:$0xff] }
  0x4d   : > { %2464 = vmatpush3.msra.mxu0 %v472_v5  ;;  %2890 = vmatpush3.msra.mxu1 %v472_v5  ;;  %v343_v35 = vld [vmem:[%s3181_s25 + $0x448] sm:$0xff]  ;;  %v216_v36 = vld [vmem:[%s3181_s25 + $0x50] sm:$0xff]  ;;  %v217_v38 = vld [vmem:[%s3181_s25 + $0x58] sm:$0xff] }
  0x4e   : > { %2465 = vmatprep.subr.mxu0 %v471_v6  ;;  %2875 = vmatprep.subr.mxu1 %v471_v6  ;;  %v344_v37 = vld [vmem:[%s3181_s25 + $0x450] sm:$0xff]  ;;  %v345_v39 = vld [vmem:[%s3181_s25 + $0x458] sm:$0xff]  ;;  %v218_v40 = vld [vmem:[%s3181_s25 + $0x60] sm:$0xff] }
  0x4f   : > { %2466 = vmatpush3.msra.mxu0 %v471_v6  ;;  %2891 = vmatpush3.msra.mxu1 %v471_v6  ;;  %v346_v41 = vld [vmem:[%s3181_s25 + $0x460] sm:$0xff]  ;;  %v219_v42 = vld [vmem:[%s3181_s25 + $0x68] sm:$0xff]  ;;  %v220_v44 = vld [vmem:[%s3181_s25 + $0x70] sm:$0xff] }
  0x50   : > { %2467 = vmatprep.subr.mxu0 %v470_v7  ;;  %2876 = vmatprep.subr.mxu1 %v470_v7  ;;  %v347_v43 = vld [vmem:[%s3181_s25 + $0x468] sm:$0xff]  ;;  %v348_v45 = vld [vmem:[%s3181_s25 + $0x470] sm:$0xff]  ;;  %v221_v46 = vld [vmem:[%s3181_s25 + $0x78] sm:$0xff] }
  0x51   : > { %2468 = vmatpush3.msra.mxu0 %v470_v7  ;;  %2892 = vmatpush3.msra.mxu1 %v470_v7  ;;  %v349_v47 = vld [vmem:[%s3181_s25 + $0x478] sm:$0xff]  ;;  %v222_v48 = vld [vmem:[%s3181_s25 + $0x80] sm:$0xff]  ;;  %v223_v50 = vld [vmem:[%s3181_s25 + $0x88] sm:$0xff] }
  0x52   : > { %2469 = vmatprep.subr.mxu0 %v469_v8  ;;  %2877 = vmatprep.subr.mxu1 %v469_v8  ;;  %v350_v49 = vld [vmem:[%s3181_s25 + $0x480] sm:$0xff]  ;;  %v351_v51 = vld [vmem:[%s3181_s25 + $0x488] sm:$0xff]  ;;  %v224_v52 = vld [vmem:[%s3181_s25 + $0x90] sm:$0xff] }
  0x53   : > { %2470 = vmatpush3.msra.mxu0 %v469_v8  ;;  %2893 = vmatpush3.msra.mxu1 %v469_v8  ;;  %v352_v53 = vld [vmem:[%s3181_s25 + $0x490] sm:$0xff]  ;;  %v225_v54 = vld [vmem:[%s3181_s25 + $0x98] sm:$0xff]  ;;  %v226_v56 = vld [vmem:[%s3181_s25 + $0xa0] sm:$0xff] }
  0x54   : > { %2471 = vmatprep.subr.mxu0 %v468_v9  ;;  %2878 = vmatprep.subr.mxu1 %v468_v9  ;;  %v353_v55 = vld [vmem:[%s3181_s25 + $0x498] sm:$0xff]  ;;  %v354_v57 = vld [vmem:[%s3181_s25 + $0x4a0] sm:$0xff]  ;;  %v227_v58 = vld [vmem:[%s3181_s25 + $0xa8] sm:$0xff] }
  0x55   : > { %2472 = vmatpush3.msra.mxu0 %v468_v9  ;;  %2894 = vmatpush3.msra.mxu1 %v468_v9  ;;  %v355_v59 = vld [vmem:[%s3181_s25 + $0x4a8] sm:$0xff]  ;;  %v228_v60 = vld [vmem:[%s3181_s25 + $0xb0] sm:$0xff]  ;;  %v229_v62 = vld [vmem:[%s3181_s25 + $0xb8] sm:$0xff] }
  0x56   : > { %2473 = vmatprep.subr.mxu0 %v467_v10  ;;  %2879 = vmatprep.subr.mxu1 %v467_v10  ;;  %v356_v61 = vld [vmem:[%s3181_s25 + $0x4b0] sm:$0xff]  ;;  %v357_v63 = vld [vmem:[%s3181_s25 + $0x4b8] sm:$0xff]  ;;  %v230_v0 = vld [vmem:[%s3181_s25 + $0xc0] sm:$0xff] }
  0x57   : > { %2474 = vmatpush3.msra.mxu0 %v467_v10  ;;  %2895 = vmatpush3.msra.mxu1 %v467_v10  ;;  %v358_v1 = vld [vmem:[%s3181_s25 + $0x4c0] sm:$0xff]  ;;  %v231_v2 = vld [vmem:[%s3181_s25 + $0xc8] sm:$0xff]  ;;  %v232_v4 = vld [vmem:[%s3181_s25 + $0xd0] sm:$0xff] }
  0x58   : > { %2475 = vmatprep.subr.mxu0 %v466_v11  ;;  %2880 = vmatprep.subr.mxu1 %v466_v11  ;;  %v359_v3 = vld [vmem:[%s3181_s25 + $0x4c8] sm:$0xff]  ;;  %v360_v5 = vld [vmem:[%s3181_s25 + $0x4d0] sm:$0xff]  ;;  %v233_v6 = vld [vmem:[%s3181_s25 + $0xd8] sm:$0xff] }
  0x59   : > { %2476 = vmatpush3.msra.mxu0 %v466_v11  ;;  %2896 = vmatpush3.msra.mxu1 %v466_v11  ;;  %v361_v7 = vld [vmem:[%s3181_s25 + $0x4d8] sm:$0xff]  ;;  %v234_v8 = vld [vmem:[%s3181_s25 + $0xe0] sm:$0xff]  ;;  %v235_v10 = vld [vmem:[%s3181_s25 + $0xe8] sm:$0xff] }
  0x5a   : > { %2477 = vmatprep.subr.mxu0 %v465_v12  ;;  %2881 = vmatprep.subr.mxu1 %v465_v12  ;;  %v362_v9 = vld [vmem:[%s3181_s25 + $0x4e0] sm:$0xff]  ;;  %v363_v11 = vld [vmem:[%s3181_s25 + $0x4e8] sm:$0xff] }
  0x5b   : > { %2478 = vmatpush3.msra.mxu0 %v465_v12  ;;  %2897 = vmatpush3.msra.mxu1 %v465_v12  ;;  %v236_v12 = vld [vmem:[%s3181_s25 + $0xf0] sm:$0xff] }
  0x5c   : > { %2479 = vmatprep.subr.mxu0 %v464_v13  ;;  %2882 = vmatprep.subr.mxu1 %v464_v13 }
  0x5d   : > { %2480 = vmatpush3.msra.mxu0 %v464_v13  ;;  %2898 = vmatpush3.msra.mxu1 %v464_v13  ;;  %v364_v13 = vld [vmem:[%s3181_s25 + $0x4f0] sm:$0xff] }
  0x5e   : > { %2481 = vmatprep.subr.mxu0 %v463_v14  ;;  %2883 = vmatprep.subr.mxu1 %v463_v14 }
  0x5f   : > { %2482 = vmatpush3.msra.mxu0 %v463_v14  ;;  %2899 = vmatpush3.msra.mxu1 %v463_v14  ;;  %v237_v14 = vld [vmem:[%s3181_s25 + $0xf8] sm:$0xff] }
  0x60   : > { %2483 = vmatprep.subr.mxu0 %v462_v15  ;;  %2884 = vmatprep.subr.mxu1 %v462_v15 }
  0x61   : > { %2484 = vmatpush3.msra.mxu0 %v462_v15  ;;  %2900 = vmatpush3.msra.mxu1 %v462_v15  ;;  %v365_v15 = vld [vmem:[%s3181_s25 + $0x4f8] sm:$0xff] }
  0x62   : > { %2485 = vmatprep.mubr.f32.mxu0 %v206_v16  ;;  %2677 = vmatprep.mubr.f32.mxu1 %v334_v17  ;;  %v238_v16 = vld [vmem:[%s3181_s25 + $0x100] sm:$0xff] }
  0x63   : > { %2486 = vmatmul.mubr.f32.vlgmr.msra.gmra.mxu0 %v207_v18  ;;  %2678 = vmatmul.mubr.f32.vlgmr.msra.gmra.mxu1 %v335_v19  ;;  %v366_v17 = vld [vmem:[%s3181_s25 + $0x500] sm:$0xff]  ;;  %v239_v18 = vld [vmem:[%s3181_s25 + $0x108] sm:$0xff] }
  0x64   : > { %2488 = vmatprep.mubr.f32.mxu0 %v208_v20  ;;  %2680 = vmatprep.mubr.f32.mxu1 %v336_v21  ;;  %v367_v19 = vld [vmem:[%s3181_s25 + $0x508] sm:$0xff]  ;;  %v240_v20 = vld [vmem:[%s3181_s25 + $0x110] sm:$0xff] }
  0x65   : > { %v368_v21 = vld [vmem:[%s3181_s25 + $0x510] sm:$0xff] }
  0x67   : > { %2489 = vmatmul.mubr.f32.gmra.mxu0 %v209_v22  ;;  %2681 = vmatmul.mubr.f32.gmra.mxu1 %v337_v23  ;;  %v241_v22 = vld [vmem:[%s3181_s25 + $0x118] sm:$0xff] }
  0x68   : > { %2491 = vmatprep.mubr.f32.mxu0 %v210_v24  ;;  %2683 = vmatprep.mubr.f32.mxu1 %v338_v25  ;;  %v369_v23 = vld [vmem:[%s3181_s25 + $0x518] sm:$0xff]  ;;  %v242_v24 = vld [vmem:[%s3181_s25 + $0x120] sm:$0xff] }
  0x69   : > { %v370_v25 = vld [vmem:[%s3181_s25 + $0x520] sm:$0xff] }
  0x6b   : > { %2492 = vmatmul.mubr.f32.gmra.mxu0 %v211_v26  ;;  %2684 = vmatmul.mubr.f32.gmra.mxu1 %v339_v27  ;;  %v243_v26 = vld [vmem:[%s3181_s25 + $0x128] sm:$0xff] }
  0x6c   : > { %2494 = vmatprep.mubr.f32.mxu0 %v212_v28  ;;  %2686 = vmatprep.mubr.f32.mxu1 %v340_v29  ;;  %v371_v27 = vld [vmem:[%s3181_s25 + $0x528] sm:$0xff]  ;;  %v244_v28 = vld [vmem:[%s3181_s25 + $0x130] sm:$0xff] }
  0x6d   : > { %v372_v29 = vld [vmem:[%s3181_s25 + $0x530] sm:$0xff] }
  0x6f   : > { %2495 = vmatmul.mubr.f32.gmra.mxu0 %v213_v30  ;;  %2687 = vmatmul.mubr.f32.gmra.mxu1 %v341_v31  ;;  %v245_v30 = vld [vmem:[%s3181_s25 + $0x138] sm:$0xff] }
  0x70   : > { %2497 = vmatprep.mubr.f32.mxu0 %v214_v32  ;;  %2689 = vmatprep.mubr.f32.mxu1 %v342_v33  ;;  %v373_v31 = vld [vmem:[%s3181_s25 + $0x538] sm:$0xff]  ;;  %v246_v32 = vld [vmem:[%s3181_s25 + $0x140] sm:$0xff] }
  0x71   : > { %v374_v33 = vld [vmem:[%s3181_s25 + $0x540] sm:$0xff] }
  0x73   : > { %2498 = vmatmul.mubr.f32.gmra.mxu0 %v215_v34  ;;  %2690 = vmatmul.mubr.f32.gmra.mxu1 %v343_v35  ;;  %v247_v34 = vld [vmem:[%s3181_s25 + $0x148] sm:$0xff] }
  0x74   : > { %2500 = vmatprep.mubr.f32.mxu0 %v216_v36  ;;  %2692 = vmatprep.mubr.f32.mxu1 %v344_v37  ;;  %v375_v35 = vld [vmem:[%s3181_s25 + $0x548] sm:$0xff]  ;;  %v248_v36 = vld [vmem:[%s3181_s25 + $0x150] sm:$0xff] }
  0x75   : > { %v376_v37 = vld [vmem:[%s3181_s25 + $0x550] sm:$0xff] }
  0x77   : > { %2501 = vmatmul.mubr.f32.gmra.mxu0 %v217_v38  ;;  %2693 = vmatmul.mubr.f32.gmra.mxu1 %v345_v39  ;;  %v249_v38 = vld [vmem:[%s3181_s25 + $0x158] sm:$0xff] }
  0x78   : > { %2503 = vmatprep.mubr.f32.mxu0 %v218_v40  ;;  %2695 = vmatprep.mubr.f32.mxu1 %v346_v41  ;;  %v377_v39 = vld [vmem:[%s3181_s25 + $0x558] sm:$0xff]  ;;  %v250_v40 = vld [vmem:[%s3181_s25 + $0x160] sm:$0xff] }
  0x79   : > { %v378_v41 = vld [vmem:[%s3181_s25 + $0x560] sm:$0xff] }
  0x7b   : > { %2504 = vmatmul.mubr.f32.gmra.mxu0 %v219_v42  ;;  %2696 = vmatmul.mubr.f32.gmra.mxu1 %v347_v43  ;;  %v251_v42 = vld [vmem:[%s3181_s25 + $0x168] sm:$0xff] }
  0x7c   : > { %2506 = vmatprep.mubr.f32.mxu0 %v220_v44  ;;  %2698 = vmatprep.mubr.f32.mxu1 %v348_v45  ;;  %v379_v43 = vld [vmem:[%s3181_s25 + $0x568] sm:$0xff]  ;;  %v252_v44 = vld [vmem:[%s3181_s25 + $0x170] sm:$0xff] }
  0x7d   : > { %v380_v45 = vld [vmem:[%s3181_s25 + $0x570] sm:$0xff] }
  0x7f   : > { %2507 = vmatmul.mubr.f32.gmra.mxu0 %v221_v46  ;;  %2699 = vmatmul.mubr.f32.gmra.mxu1 %v349_v47  ;;  %v253_v46 = vld [vmem:[%s3181_s25 + $0x178] sm:$0xff] }
  0x80   : > { %2509 = vmatprep.mubr.f32.mxu0 %v222_v48  ;;  %2701 = vmatprep.mubr.f32.mxu1 %v350_v49  ;;  %v381_v47 = vld [vmem:[%s3181_s25 + $0x578] sm:$0xff]  ;;  %v254_v48 = vld [vmem:[%s3181_s25 + $0x180] sm:$0xff] }
  0x81   : > { %v382_v49 = vld [vmem:[%s3181_s25 + $0x580] sm:$0xff] }
  0x83   : > { %2510 = vmatmul.mubr.f32.gmra.mxu0 %v223_v50  ;;  %2702 = vmatmul.mubr.f32.gmra.mxu1 %v351_v51  ;;  %v255_v50 = vld [vmem:[%s3181_s25 + $0x188] sm:$0xff] }
  0x84   : > { %2512 = vmatprep.mubr.f32.mxu0 %v224_v52  ;;  %2704 = vmatprep.mubr.f32.mxu1 %v352_v53  ;;  %v383_v51 = vld [vmem:[%s3181_s25 + $0x588] sm:$0xff]  ;;  %v256_v52 = vld [vmem:[%s3181_s25 + $0x190] sm:$0xff] }
  0x85   : > { %v384_v53 = vld [vmem:[%s3181_s25 + $0x590] sm:$0xff] }
  0x87   : > { %2513 = vmatmul.mubr.f32.gmra.mxu0 %v225_v54  ;;  %2705 = vmatmul.mubr.f32.gmra.mxu1 %v353_v55  ;;  %v257_v54 = vld [vmem:[%s3181_s25 + $0x198] sm:$0xff] }
  0x88   : > { %2515 = vmatprep.mubr.f32.mxu0 %v226_v56  ;;  %2707 = vmatprep.mubr.f32.mxu1 %v354_v57  ;;  %v385_v55 = vld [vmem:[%s3181_s25 + $0x598] sm:$0xff]  ;;  %v258_v56 = vld [vmem:[%s3181_s25 + $0x1a0] sm:$0xff] }
  0x89   : > { %v386_v57 = vld [vmem:[%s3181_s25 + $0x5a0] sm:$0xff] }
  0x8b   : > { %2516 = vmatmul.mubr.f32.gmra.mxu0 %v227_v58  ;;  %2708 = vmatmul.mubr.f32.gmra.mxu1 %v355_v59  ;;  %v259_v58 = vld [vmem:[%s3181_s25 + $0x1a8] sm:$0xff] }
  0x8c   : > { %2518 = vmatprep.mubr.f32.mxu0 %v228_v60  ;;  %2710 = vmatprep.mubr.f32.mxu1 %v356_v61  ;;  %v387_v59 = vld [vmem:[%s3181_s25 + $0x5a8] sm:$0xff]  ;;  %v260_v60 = vld [vmem:[%s3181_s25 + $0x1b0] sm:$0xff] }
  0x8d   : > { %v388_v61 = vld [vmem:[%s3181_s25 + $0x5b0] sm:$0xff] }
  0x8f   : > { %2519 = vmatmul.mubr.f32.gmra.mxu0 %v229_v62  ;;  %2711 = vmatmul.mubr.f32.gmra.mxu1 %v357_v63  ;;  %v261_v62 = vld [vmem:[%s3181_s25 + $0x1b8] sm:$0xff] }
  0x90   : > { %2521 = vmatprep.mubr.f32.mxu0 %v230_v0  ;;  %2713 = vmatprep.mubr.f32.mxu1 %v358_v1  ;;  %v389_v63 = vld [vmem:[%s3181_s25 + $0x5b8] sm:$0xff]  ;;  %v262_v0 = vld [vmem:[%s3181_s25 + $0x1c0] sm:$0xff] }
  0x91   : > { %v390_v1 = vld [vmem:[%s3181_s25 + $0x5c0] sm:$0xff] }
  0x93   : > { %2522 = vmatmul.mubr.f32.gmra.mxu0 %v231_v2  ;;  %2714 = vmatmul.mubr.f32.gmra.mxu1 %v359_v3  ;;  %v263_v2 = vld [vmem:[%s3181_s25 + $0x1c8] sm:$0xff] }
  0x94   : > { %2524 = vmatprep.mubr.f32.mxu0 %v232_v4  ;;  %2716 = vmatprep.mubr.f32.mxu1 %v360_v5  ;;  %v391_v3 = vld [vmem:[%s3181_s25 + $0x5c8] sm:$0xff]  ;;  %v264_v4 = vld [vmem:[%s3181_s25 + $0x1d0] sm:$0xff] }
  0x95   : > { %v392_v5 = vld [vmem:[%s3181_s25 + $0x5d0] sm:$0xff] }
  0x97   : > { %2525 = vmatmul.mubr.f32.gmra.mxu0 %v233_v6  ;;  %2717 = vmatmul.mubr.f32.gmra.mxu1 %v361_v7  ;;  %v265_v6 = vld [vmem:[%s3181_s25 + $0x1d8] sm:$0xff] }
  0x98   : > { %2527 = vmatprep.mubr.f32.mxu0 %v234_v8  ;;  %2719 = vmatprep.mubr.f32.mxu1 %v362_v9  ;;  %v393_v7 = vld [vmem:[%s3181_s25 + $0x5d8] sm:$0xff]  ;;  %v266_v8 = vld [vmem:[%s3181_s25 + $0x1e0] sm:$0xff] }
  0x99   : > { %v394_v9 = vld [vmem:[%s3181_s25 + $0x5e0] sm:$0xff] }
  0x9b   : > { %2528 = vmatmul.mubr.f32.gmra.mxu0 %v235_v10  ;;  %2720 = vmatmul.mubr.f32.gmra.mxu1 %v363_v11  ;;  %v267_v10 = vld [vmem:[%s3181_s25 + $0x1e8] sm:$0xff] }
  0x9c   : > { %2530 = vmatprep.mubr.f32.mxu0 %v236_v12  ;;  %2722 = vmatprep.mubr.f32.mxu1 %v364_v13  ;;  %v395_v11 = vld [vmem:[%s3181_s25 + $0x5e8] sm:$0xff]  ;;  %v268_v12 = vld [vmem:[%s3181_s25 + $0x1f0] sm:$0xff] }
  0x9d   : > { %v396_v13 = vld [vmem:[%s3181_s25 + $0x5f0] sm:$0xff] }
  0x9f   : > { %2531 = vmatmul.mubr.f32.gmra.mxu0 %v237_v14  ;;  %2723 = vmatmul.mubr.f32.gmra.mxu1 %v365_v15  ;;  %v269_v14 = vld [vmem:[%s3181_s25 + $0x1f8] sm:$0xff] }
  0xa0   : > { %2533 = vmatprep.mubr.f32.mxu0 %v238_v16  ;;  %2725 = vmatprep.mubr.f32.mxu1 %v366_v17  ;;  %v397_v15 = vld [vmem:[%s3181_s25 + $0x5f8] sm:$0xff]  ;;  %v270_v16 = vld [vmem:[%s3181_s25 + $0x200] sm:$0xff] }
  0xa1   : > { %v398_v17 = vld [vmem:[%s3181_s25 + $0x600] sm:$0xff] }
  0xa3   : > { %2534 = vmatmul.mubr.f32.gmra.mxu0 %v239_v18  ;;  %2726 = vmatmul.mubr.f32.gmra.mxu1 %v367_v19  ;;  %v271_v18 = vld [vmem:[%s3181_s25 + $0x208] sm:$0xff] }
  0xa4   : > { %2536 = vmatprep.mubr.f32.mxu0 %v240_v20  ;;  %2728 = vmatprep.mubr.f32.mxu1 %v368_v21  ;;  %v399_v19 = vld [vmem:[%s3181_s25 + $0x608] sm:$0xff]  ;;  %v272_v20 = vld [vmem:[%s3181_s25 + $0x210] sm:$0xff] }
  0xa5   : > { %v400_v21 = vld [vmem:[%s3181_s25 + $0x610] sm:$0xff] }
  0xa7   : > { %2537 = vmatmul.mubr.f32.gmra.mxu0 %v241_v22  ;;  %2729 = vmatmul.mubr.f32.gmra.mxu1 %v369_v23  ;;  %v273_v22 = vld [vmem:[%s3181_s25 + $0x218] sm:$0xff] }
  0xa8   : > { %2539 = vmatprep.mubr.f32.mxu0 %v242_v24  ;;  %2731 = vmatprep.mubr.f32.mxu1 %v370_v25  ;;  %v401_v23 = vld [vmem:[%s3181_s25 + $0x618] sm:$0xff]  ;;  %v274_v24 = vld [vmem:[%s3181_s25 + $0x220] sm:$0xff] }
  0xa9   : > { %v402_v25 = vld [vmem:[%s3181_s25 + $0x620] sm:$0xff] }
  0xab   : > { %2540 = vmatmul.mubr.f32.gmra.mxu0 %v243_v26  ;;  %2732 = vmatmul.mubr.f32.gmra.mxu1 %v371_v27  ;;  %v275_v26 = vld [vmem:[%s3181_s25 + $0x228] sm:$0xff] }
  0xac   : > { %2542 = vmatprep.mubr.f32.mxu0 %v244_v28  ;;  %2734 = vmatprep.mubr.f32.mxu1 %v372_v29  ;;  %v403_v27 = vld [vmem:[%s3181_s25 + $0x628] sm:$0xff]  ;;  %v276_v28 = vld [vmem:[%s3181_s25 + $0x230] sm:$0xff] }
  0xad   : > { %v404_v29 = vld [vmem:[%s3181_s25 + $0x630] sm:$0xff] }
  0xaf   : > { %2543 = vmatmul.mubr.f32.gmra.mxu0 %v245_v30  ;;  %2735 = vmatmul.mubr.f32.gmra.mxu1 %v373_v31  ;;  %v277_v30 = vld [vmem:[%s3181_s25 + $0x238] sm:$0xff] }
  0xb0   : > { %2545 = vmatprep.mubr.f32.mxu0 %v246_v32  ;;  %2737 = vmatprep.mubr.f32.mxu1 %v374_v33  ;;  %v405_v31 = vld [vmem:[%s3181_s25 + $0x638] sm:$0xff]  ;;  %v278_v32 = vld [vmem:[%s3181_s25 + $0x240] sm:$0xff] }
  0xb1   : > { %v406_v33 = vld [vmem:[%s3181_s25 + $0x640] sm:$0xff] }
  0xb3   : > { %2546 = vmatmul.mubr.f32.gmra.mxu0 %v247_v34  ;;  %2738 = vmatmul.mubr.f32.gmra.mxu1 %v375_v35  ;;  %v279_v34 = vld [vmem:[%s3181_s25 + $0x248] sm:$0xff] }
  0xb4   : > { %2548 = vmatprep.mubr.f32.mxu0 %v248_v36  ;;  %2740 = vmatprep.mubr.f32.mxu1 %v376_v37  ;;  %v407_v35 = vld [vmem:[%s3181_s25 + $0x648] sm:$0xff]  ;;  %v280_v36 = vld [vmem:[%s3181_s25 + $0x250] sm:$0xff] }
  0xb5   : > { %v408_v37 = vld [vmem:[%s3181_s25 + $0x650] sm:$0xff] }
  0xb7   : > { %2549 = vmatmul.mubr.f32.gmra.mxu0 %v249_v38  ;;  %2741 = vmatmul.mubr.f32.gmra.mxu1 %v377_v39  ;;  %v281_v38 = vld [vmem:[%s3181_s25 + $0x258] sm:$0xff] }
  0xb8   : > { %2551 = vmatprep.mubr.f32.mxu0 %v250_v40  ;;  %2743 = vmatprep.mubr.f32.mxu1 %v378_v41  ;;  %v409_v39 = vld [vmem:[%s3181_s25 + $0x658] sm:$0xff]  ;;  %v282_v40 = vld [vmem:[%s3181_s25 + $0x260] sm:$0xff] }
  0xb9   : > { %v410_v41 = vld [vmem:[%s3181_s25 + $0x660] sm:$0xff] }
  0xbb   : > { %2552 = vmatmul.mubr.f32.gmra.mxu0 %v251_v42  ;;  %2744 = vmatmul.mubr.f32.gmra.mxu1 %v379_v43  ;;  %v283_v42 = vld [vmem:[%s3181_s25 + $0x268] sm:$0xff] }
  0xbc   : > { %2554 = vmatprep.mubr.f32.mxu0 %v252_v44  ;;  %2746 = vmatprep.mubr.f32.mxu1 %v380_v45  ;;  %v411_v43 = vld [vmem:[%s3181_s25 + $0x668] sm:$0xff]  ;;  %v284_v44 = vld [vmem:[%s3181_s25 + $0x270] sm:$0xff] }
  0xbd   : > { %v412_v45 = vld [vmem:[%s3181_s25 + $0x670] sm:$0xff] }
  0xbf   : > { %2555 = vmatmul.mubr.f32.gmra.mxu0 %v253_v46  ;;  %2747 = vmatmul.mubr.f32.gmra.mxu1 %v381_v47  ;;  %v285_v46 = vld [vmem:[%s3181_s25 + $0x278] sm:$0xff] }
  0xc0   : > { %2557 = vmatprep.mubr.f32.mxu0 %v254_v48  ;;  %2749 = vmatprep.mubr.f32.mxu1 %v382_v49  ;;  %v413_v47 = vld [vmem:[%s3181_s25 + $0x678] sm:$0xff]  ;;  %v286_v48 = vld [vmem:[%s3181_s25 + $0x280] sm:$0xff] }
  0xc1   : > { %v414_v49 = vld [vmem:[%s3181_s25 + $0x680] sm:$0xff] }
  0xc3   : > { %2558 = vmatmul.mubr.f32.gmra.mxu0 %v255_v50  ;;  %2750 = vmatmul.mubr.f32.gmra.mxu1 %v383_v51  ;;  %v287_v50 = vld [vmem:[%s3181_s25 + $0x288] sm:$0xff] }
  0xc4   : > { %2560 = vmatprep.mubr.f32.mxu0 %v256_v52  ;;  %2752 = vmatprep.mubr.f32.mxu1 %v384_v53  ;;  %v415_v51 = vld [vmem:[%s3181_s25 + $0x688] sm:$0xff]  ;;  %v288_v52 = vld [vmem:[%s3181_s25 + $0x290] sm:$0xff] }
  0xc5   : > { %v416_v53 = vld [vmem:[%s3181_s25 + $0x690] sm:$0xff] }
  0xc7   : > { %2561 = vmatmul.mubr.f32.gmra.mxu0 %v257_v54  ;;  %2753 = vmatmul.mubr.f32.gmra.mxu1 %v385_v55  ;;  %v289_v54 = vld [vmem:[%s3181_s25 + $0x298] sm:$0xff] }
  0xc8   : > { %2563 = vmatprep.mubr.f32.mxu0 %v258_v56  ;;  %2755 = vmatprep.mubr.f32.mxu1 %v386_v57  ;;  %v417_v55 = vld [vmem:[%s3181_s25 + $0x698] sm:$0xff]  ;;  %v290_v56 = vld [vmem:[%s3181_s25 + $0x2a0] sm:$0xff] }
  0xc9   : > { %v418_v57 = vld [vmem:[%s3181_s25 + $0x6a0] sm:$0xff] }
  0xcb   : > { %2564 = vmatmul.mubr.f32.gmra.mxu0 %v259_v58  ;;  %2756 = vmatmul.mubr.f32.gmra.mxu1 %v387_v59  ;;  %v291_v58 = vld [vmem:[%s3181_s25 + $0x2a8] sm:$0xff] }
  0xcc   : > { %2566 = vmatprep.mubr.f32.mxu0 %v260_v60  ;;  %2758 = vmatprep.mubr.f32.mxu1 %v388_v61  ;;  %v419_v59 = vld [vmem:[%s3181_s25 + $0x6a8] sm:$0xff]  ;;  %v292_v60 = vld [vmem:[%s3181_s25 + $0x2b0] sm:$0xff] }
  0xcd   : > { %v420_v61 = vld [vmem:[%s3181_s25 + $0x6b0] sm:$0xff] }
  0xcf   : > { %2567 = vmatmul.mubr.f32.gmra.mxu0 %v261_v62  ;;  %2759 = vmatmul.mubr.f32.gmra.mxu1 %v389_v63  ;;  %v293_v62 = vld [vmem:[%s3181_s25 + $0x2b8] sm:$0xff] }
  0xd0   : > { %2569 = vmatprep.mubr.f32.mxu0 %v262_v0  ;;  %2761 = vmatprep.mubr.f32.mxu1 %v390_v1  ;;  %v421_v63 = vld [vmem:[%s3181_s25 + $0x6b8] sm:$0xff]  ;;  %v294_v0 = vld [vmem:[%s3181_s25 + $0x2c0] sm:$0xff] }
  0xd1   : > { %v422_v1 = vld [vmem:[%s3181_s25 + $0x6c0] sm:$0xff] }
  0xd3   : > { %2570 = vmatmul.mubr.f32.gmra.mxu0 %v263_v2  ;;  %2762 = vmatmul.mubr.f32.gmra.mxu1 %v391_v3  ;;  %v295_v2 = vld [vmem:[%s3181_s25 + $0x2c8] sm:$0xff] }
  0xd4   : > { %2572 = vmatprep.mubr.f32.mxu0 %v264_v4  ;;  %2764 = vmatprep.mubr.f32.mxu1 %v392_v5  ;;  %v423_v3 = vld [vmem:[%s3181_s25 + $0x6c8] sm:$0xff]  ;;  %v296_v4 = vld [vmem:[%s3181_s25 + $0x2d0] sm:$0xff] }
  0xd5   : > { %v424_v5 = vld [vmem:[%s3181_s25 + $0x6d0] sm:$0xff] }
  0xd7   : > { %2573 = vmatmul.mubr.f32.gmra.mxu0 %v265_v6  ;;  %2765 = vmatmul.mubr.f32.gmra.mxu1 %v393_v7  ;;  %v297_v6 = vld [vmem:[%s3181_s25 + $0x2d8] sm:$0xff] }
  0xd8   : > { %2575 = vmatprep.mubr.f32.mxu0 %v266_v8  ;;  %2767 = vmatprep.mubr.f32.mxu1 %v394_v9  ;;  %v425_v7 = vld [vmem:[%s3181_s25 + $0x6d8] sm:$0xff]  ;;  %v298_v8 = vld [vmem:[%s3181_s25 + $0x2e0] sm:$0xff] }
  0xd9   : > { %v426_v9 = vld [vmem:[%s3181_s25 + $0x6e0] sm:$0xff] }
  0xdb   : > { %2576 = vmatmul.mubr.f32.gmra.mxu0 %v267_v10  ;;  %2768 = vmatmul.mubr.f32.gmra.mxu1 %v395_v11  ;;  %v299_v10 = vld [vmem:[%s3181_s25 + $0x2e8] sm:$0xff] }
  0xdc   : > { %2578 = vmatprep.mubr.f32.mxu0 %v268_v12  ;;  %2770 = vmatprep.mubr.f32.mxu1 %v396_v13  ;;  %v427_v11 = vld [vmem:[%s3181_s25 + $0x6e8] sm:$0xff]  ;;  %v300_v12 = vld [vmem:[%s3181_s25 + $0x2f0] sm:$0xff] }
  0xdd   : > { %v428_v13 = vld [vmem:[%s3181_s25 + $0x6f0] sm:$0xff] }
  0xdf   : > { %2579 = vmatmul.mubr.f32.gmra.mxu0 %v269_v14  ;;  %2771 = vmatmul.mubr.f32.gmra.mxu1 %v397_v15  ;;  %v301_v14 = vld [vmem:[%s3181_s25 + $0x2f8] sm:$0xff] }
  0xe0   : > { %2581 = vmatprep.mubr.f32.mxu0 %v270_v16  ;;  %2773 = vmatprep.mubr.f32.mxu1 %v398_v17  ;;  %v429_v15 = vld [vmem:[%s3181_s25 + $0x6f8] sm:$0xff]  ;;  %v302_v16 = vld [vmem:[%s3181_s25 + $0x300] sm:$0xff] }
  0xe1   : > { %v430_v17 = vld [vmem:[%s3181_s25 + $0x700] sm:$0xff] }
  0xe3   : > { %2582 = vmatmul.mubr.f32.gmra.mxu0 %v271_v18  ;;  %2774 = vmatmul.mubr.f32.gmra.mxu1 %v399_v19  ;;  %v303_v18 = vld [vmem:[%s3181_s25 + $0x308] sm:$0xff] }
  0xe4   : > { %2584 = vmatprep.mubr.f32.mxu0 %v272_v20  ;;  %2776 = vmatprep.mubr.f32.mxu1 %v400_v21  ;;  %v431_v19 = vld [vmem:[%s3181_s25 + $0x708] sm:$0xff]  ;;  %v3437_v20 = vld [vmem:[#allocation4] ss:$0 sm:$0xff]  ;;  %v304_v21 = vld [vmem:[%s3181_s25 + $0x310] sm:$0xff] }
  0xe7   : > { %2585 = vmatmul.mubr.f32.gmra.mxu0 %v273_v22  ;;  %2777 = vmatmul.mubr.f32.gmra.mxu1 %v401_v23  ;;  %v432_v22 = vld [vmem:[%s3181_s25 + $0x710] sm:$0xff] }
  0xe8   : > { %2587 = vmatprep.mubr.f32.mxu0 %v274_v24  ;;  %2779 = vmatprep.mubr.f32.mxu1 %v402_v25 }
  0xeb   : > { %2588 = vmatmul.mubr.f32.gmra.mxu0 %v275_v26  ;;  %2780 = vmatmul.mubr.f32.gmra.mxu1 %v403_v27  ;;  %v305_v27 = vld [vmem:[%s3181_s25 + $0x318] sm:$0xff] }
  0xec   : > { %2590 = vmatprep.mubr.f32.mxu0 %v276_v28  ;;  %2782 = vmatprep.mubr.f32.mxu1 %v404_v29  ;;  %v433_v28 = vld [vmem:[%s3181_s25 + $0x718] sm:$0xff] }
  0xef   : > { %2591 = vmatmul.mubr.f32.gmra.mxu0 %v277_v30  ;;  %2783 = vmatmul.mubr.f32.gmra.mxu1 %v405_v31  ;;  %v306_v31 = vld [vmem:[%s3181_s25 + $0x320] sm:$0xff] }
  0xf0   : > { %2593 = vmatprep.mubr.f32.mxu0 %v278_v32  ;;  %2785 = vmatprep.mubr.f32.mxu1 %v406_v33  ;;  %v434_v32 = vld [vmem:[%s3181_s25 + $0x720] sm:$0xff] }
  0xf3   : > { %2594 = vmatmul.mubr.f32.gmra.mxu0 %v279_v34  ;;  %2786 = vmatmul.mubr.f32.gmra.mxu1 %v407_v35 }
  0xf4   : > { %2596 = vmatprep.mubr.f32.mxu0 %v280_v36  ;;  %2788 = vmatprep.mubr.f32.mxu1 %v408_v37 }
  0xf7   : > { %2597 = vmatmul.mubr.f32.gmra.mxu0 %v281_v38  ;;  %2789 = vmatmul.mubr.f32.gmra.mxu1 %v409_v39  ;;  %v307_v39 = vld [vmem:[%s3181_s25 + $0x328] sm:$0xff] }
  0xf8   : > { %2599 = vmatprep.mubr.f32.mxu0 %v282_v40  ;;  %2791 = vmatprep.mubr.f32.mxu1 %v410_v41  ;;  %v435_v40 = vld [vmem:[%s3181_s25 + $0x728] sm:$0xff] }
  0xfb   : > { %2600 = vmatmul.mubr.f32.gmra.mxu0 %v283_v42  ;;  %2792 = vmatmul.mubr.f32.gmra.mxu1 %v411_v43  ;;  %v308_v43 = vld [vmem:[%s3181_s25 + $0x330] sm:$0xff] }
  0xfc   : > { %2602 = vmatprep.mubr.f32.mxu0 %v284_v44  ;;  %2794 = vmatprep.mubr.f32.mxu1 %v412_v45  ;;  %v436_v44 = vld [vmem:[%s3181_s25 + $0x730] sm:$0xff] }
  0xff   : > { %2603 = vmatmul.mubr.f32.gmra.mxu0 %v285_v46  ;;  %2795 = vmatmul.mubr.f32.gmra.mxu1 %v413_v47 }
 0x100   : > { %2605 = vmatprep.mubr.f32.mxu0 %v286_v48  ;;  %2797 = vmatprep.mubr.f32.mxu1 %v414_v49 }
 0x103   : > { %2606 = vmatmul.mubr.f32.gmra.mxu0 %v287_v50  ;;  %2798 = vmatmul.mubr.f32.gmra.mxu1 %v415_v51  ;;  %v309_v51 = vld [vmem:[%s3181_s25 + $0x338] sm:$0xff] }
 0x104   : > { %2608 = vmatprep.mubr.f32.mxu0 %v288_v52  ;;  %2800 = vmatprep.mubr.f32.mxu1 %v416_v53  ;;  %v437_v52 = vld [vmem:[%s3181_s25 + $0x738] sm:$0xff] }
 0x107   : > { %2609 = vmatmul.mubr.f32.gmra.mxu0 %v289_v54  ;;  %2801 = vmatmul.mubr.f32.gmra.mxu1 %v417_v55  ;;  %v310_v55 = vld [vmem:[%s3181_s25 + $0x340] sm:$0xff] }
 0x108   : > { %2611 = vmatprep.mubr.f32.mxu0 %v290_v56  ;;  %2803 = vmatprep.mubr.f32.mxu1 %v418_v57  ;;  %v438_v56 = vld [vmem:[%s3181_s25 + $0x740] sm:$0xff] }
 0x10b   : > { %2612 = vmatmul.mubr.f32.gmra.mxu0 %v291_v58  ;;  %2804 = vmatmul.mubr.f32.gmra.mxu1 %v419_v59 }
 0x10c   : > { %2614 = vmatprep.mubr.f32.mxu0 %v292_v60  ;;  %2806 = vmatprep.mubr.f32.mxu1 %v420_v61 }
 0x10f   : > { %2615 = vmatmul.mubr.f32.gmra.mxu0 %v293_v62  ;;  %2807 = vmatmul.mubr.f32.gmra.mxu1 %v421_v63  ;;  %v311_v63 = vld [vmem:[%s3181_s25 + $0x348] sm:$0xff] }
 0x110   : > { %2617 = vmatprep.mubr.f32.mxu0 %v294_v0  ;;  %2809 = vmatprep.mubr.f32.mxu1 %v422_v1  ;;  %v439_v0 = vld [vmem:[%s3181_s25 + $0x748] sm:$0xff] }
 0x113   : > { %2618 = vmatmul.mubr.f32.gmra.mxu0 %v295_v2  ;;  %2810 = vmatmul.mubr.f32.gmra.mxu1 %v423_v3  ;;  %v312_v3 = vld [vmem:[%s3181_s25 + $0x350] sm:$0xff] }
 0x114   : > { %2620 = vmatprep.mubr.f32.mxu0 %v296_v4  ;;  %2812 = vmatprep.mubr.f32.mxu1 %v424_v5  ;;  %v440_v4 = vld [vmem:[%s3181_s25 + $0x750] sm:$0xff] }
 0x117   : > { %2621 = vmatmul.mubr.f32.gmra.mxu0 %v297_v6  ;;  %2813 = vmatmul.mubr.f32.gmra.mxu1 %v425_v7 }
 0x118   : > { %2623 = vmatprep.mubr.f32.mxu0 %v298_v8  ;;  %2815 = vmatprep.mubr.f32.mxu1 %v426_v9 }
 0x11b   : > { %2624 = vmatmul.mubr.f32.gmra.mxu0 %v299_v10  ;;  %2816 = vmatmul.mubr.f32.gmra.mxu1 %v427_v11  ;;  %v313_v11 = vld [vmem:[%s3181_s25 + $0x358] sm:$0xff] }
 0x11c   : > { %2626 = vmatprep.mubr.f32.mxu0 %v300_v12  ;;  %2818 = vmatprep.mubr.f32.mxu1 %v428_v13  ;;  %v441_v12 = vld [vmem:[%s3181_s25 + $0x758] sm:$0xff] }
 0x11f   : > { %2627 = vmatmul.mubr.f32.gmra.mxu0 %v301_v14  ;;  %2819 = vmatmul.mubr.f32.gmra.mxu1 %v429_v15  ;;  %v314_v15 = vld [vmem:[%s3181_s25 + $0x360] sm:$0xff] }
 0x120   : > { %2629 = vmatprep.mubr.f32.mxu0 %v302_v16  ;;  %2821 = vmatprep.mubr.f32.mxu1 %v430_v17  ;;  %v442_v16 = vld [vmem:[%s3181_s25 + $0x760] sm:$0xff] }
 0x123   : > { %v2487_v23 = vpop.f32.mrf.mxu0  ;;  %2630 = vmatmul.mubr.f32.gmra.mxu0 %v303_v18  ;;  %v2679_v24 = vpop.f32.mrf.mxu1  ;;  %2822 = vmatmul.mubr.f32.gmra.mxu1 %v431_v19 }
 0x124   : > { %v557_v25 = vadd.f32 %v2487_v23, %v3437_v20  ;;  %v1197_v26 = vadd.f32 %v2679_v24, %v3437_v20  ;;  %2632 = vmatprep.mubr.f32.mxu0 %v304_v21  ;;  %2824 = vmatprep.mubr.f32.mxu1 %v432_v22  ;;  %v315_v24 = vld [vmem:[%s3181_s25 + $0x368] sm:$0xff] }
 0x125   : > { %v551_v29 = vpop.f32.mrf.mxu0  ;;  %v1191_v30 = vpop.f32.mrf.mxu1 }
 0x126   : > { %1832 = vst.msk [vmem:[%s3444_s7 + $0x8] sm:$0xff] %vm1830_vm0, %v557_v25  ;;  %1960 = vst.msk [vmem:[%s3444_s7 + $0x408] sm:$0xff] %vm1830_vm0, %v1197_v26  ;;  %v552_v33 = vadd.f32 %v3437_v20, %v551_v29  ;;  %v1192_v34 = vadd.f32 %v3437_v20, %v1191_v30  ;;  %v443_v25 = vld [vmem:[%s3181_s25 + $0x768] sm:$0xff]  ;;  %v444_v29 = vld [vmem:[%s3181_s25 + $0x770] sm:$0xff] }
 0x127   : > { %v2490_v35 = vpop.f32.mrf.mxu0  ;;  %2633 = vmatmul.mubr.f32.gmra.mxu0 %v305_v27  ;;  %v2682_v36 = vpop.f32.mrf.mxu1  ;;  %2825 = vmatmul.mubr.f32.gmra.mxu1 %v433_v28  ;;  %v316_v28 = vld [vmem:[%s3181_s25 + $0x370] sm:$0xff] }
 0x128   : > { %1831 = vst.msk [vmem:[%s3444_s7] sm:$0xff] %vm1830_vm0, %v552_v33  ;;  %1959 = vst.msk [vmem:[%s3444_s7 + $0x400] sm:$0xff] %vm1830_vm0, %v1192_v34  ;;  %v567_v37 = vadd.f32 %v2490_v35, %v3437_v20  ;;  %v1207_v38 = vadd.f32 %v2682_v36, %v3437_v20  ;;  %2635 = vmatprep.mubr.f32.mxu0 %v306_v31  ;;  %2827 = vmatprep.mubr.f32.mxu1 %v434_v32  ;;  %v317_v36 = vld [vmem:[%s3181_s25 + $0x378] sm:$0xff] }
 0x129   : > { %v561_v41 = vpop.f32.mrf.mxu0  ;;  %v1201_v42 = vpop.f32.mrf.mxu1 }
 0x12a   : > { %1834 = vst.msk [vmem:[%s3444_s7 + $0x18] sm:$0xff] %vm1830_vm0, %v567_v37  ;;  %1962 = vst.msk [vmem:[%s3444_s7 + $0x418] sm:$0xff] %vm1830_vm0, %v1207_v38  ;;  %v562_v45 = vadd.f32 %v3437_v20, %v561_v41  ;;  %v1202_v46 = vadd.f32 %v3437_v20, %v1201_v42  ;;  %v445_v37 = vld [vmem:[%s3181_s25 + $0x778] sm:$0xff]  ;;  %v446_v41 = vld [vmem:[%s3181_s25 + $0x780] sm:$0xff] }
 0x12b   : > { %v2493_v47 = vpop.f32.mrf.mxu0  ;;  %2636 = vmatmul.mubr.f32.gmra.mxu0 %v307_v39  ;;  %v2685_v48 = vpop.f32.mrf.mxu1  ;;  %2828 = vmatmul.mubr.f32.gmra.mxu1 %v435_v40  ;;  %v318_v40 = vld [vmem:[%s3181_s25 + $0x380] sm:$0xff] }
 0x12c   : > { %1833 = vst.msk [vmem:[%s3444_s7 + $0x10] sm:$0xff] %vm1830_vm0, %v562_v45  ;;  %1961 = vst.msk [vmem:[%s3444_s7 + $0x410] sm:$0xff] %vm1830_vm0, %v1202_v46  ;;  %v577_v49 = vadd.f32 %v2493_v47, %v3437_v20  ;;  %v1217_v50 = vadd.f32 %v2685_v48, %v3437_v20  ;;  %2638 = vmatprep.mubr.f32.mxu0 %v308_v43  ;;  %2830 = vmatprep.mubr.f32.mxu1 %v436_v44  ;;  %v319_v48 = vld [vmem:[%s3181_s25 + $0x388] sm:$0xff] }
 0x12d   : > { %v571_v53 = vpop.f32.mrf.mxu0  ;;  %v1211_v54 = vpop.f32.mrf.mxu1 }
 0x12e   : > { %1836 = vst.msk [vmem:[%s3444_s7 + $0x28] sm:$0xff] %vm1830_vm0, %v577_v49  ;;  %1964 = vst.msk [vmem:[%s3444_s7 + $0x428] sm:$0xff] %vm1830_vm0, %v1217_v50  ;;  %v572_v57 = vadd.f32 %v3437_v20, %v571_v53  ;;  %v1212_v58 = vadd.f32 %v3437_v20, %v1211_v54  ;;  %v447_v49 = vld [vmem:[%s3181_s25 + $0x788] sm:$0xff]  ;;  %v448_v53 = vld [vmem:[%s3181_s25 + $0x790] sm:$0xff] }
 0x12f   : > { %v2496_v59 = vpop.f32.mrf.mxu0  ;;  %2639 = vmatmul.mubr.f32.gmra.mxu0 %v309_v51  ;;  %v2688_v60 = vpop.f32.mrf.mxu1  ;;  %2831 = vmatmul.mubr.f32.gmra.mxu1 %v437_v52  ;;  %v320_v52 = vld [vmem:[%s3181_s25 + $0x390] sm:$0xff] }
 0x130   : > { %1835 = vst.msk [vmem:[%s3444_s7 + $0x20] sm:$0xff] %vm1830_vm0, %v572_v57  ;;  %1963 = vst.msk [vmem:[%s3444_s7 + $0x420] sm:$0xff] %vm1830_vm0, %v1212_v58  ;;  %v587_v61 = vadd.f32 %v2496_v59, %v3437_v20  ;;  %v1227_v62 = vadd.f32 %v2688_v60, %v3437_v20  ;;  %2641 = vmatprep.mubr.f32.mxu0 %v310_v55  ;;  %2833 = vmatprep.mubr.f32.mxu1 %v438_v56  ;;  %v321_v60 = vld [vmem:[%s3181_s25 + $0x398] sm:$0xff] }
 0x131   : > { %v581_v1 = vpop.f32.mrf.mxu0  ;;  %v1221_v2 = vpop.f32.mrf.mxu1 }
 0x132   : > { %1838 = vst.msk [vmem:[%s3444_s7 + $0x38] sm:$0xff] %vm1830_vm0, %v587_v61  ;;  %1966 = vst.msk [vmem:[%s3444_s7 + $0x438] sm:$0xff] %vm1830_vm0, %v1227_v62  ;;  %v582_v5 = vadd.f32 %v3437_v20, %v581_v1  ;;  %v1222_v6 = vadd.f32 %v3437_v20, %v1221_v2  ;;  %v449_v61 = vld [vmem:[%s3181_s25 + $0x798] sm:$0xff]  ;;  %v450_v1 = vld [vmem:[%s3181_s25 + $0x7a0] sm:$0xff] }
 0x133   : > { %v2499_v7 = vpop.f32.mrf.mxu0  ;;  %2642 = vmatmul.mubr.f32.gmra.mxu0 %v311_v63  ;;  %v2691_v8 = vpop.f32.mrf.mxu1  ;;  %2834 = vmatmul.mubr.f32.gmra.mxu1 %v439_v0  ;;  %v322_v0 = vld [vmem:[%s3181_s25 + $0x3a0] sm:$0xff] }
 0x134   : > { %1837 = vst.msk [vmem:[%s3444_s7 + $0x30] sm:$0xff] %vm1830_vm0, %v582_v5  ;;  %1965 = vst.msk [vmem:[%s3444_s7 + $0x430] sm:$0xff] %vm1830_vm0, %v1222_v6  ;;  %v597_v9 = vadd.f32 %v2499_v7, %v3437_v20  ;;  %v1237_v10 = vadd.f32 %v2691_v8, %v3437_v20  ;;  %2644 = vmatprep.mubr.f32.mxu0 %v312_v3  ;;  %2836 = vmatprep.mubr.f32.mxu1 %v440_v4  ;;  %v323_v8 = vld [vmem:[%s3181_s25 + $0x3a8] sm:$0xff] }
 0x135   : > { %v591_v13 = vpop.f32.mrf.mxu0  ;;  %v1231_v14 = vpop.f32.mrf.mxu1 }
 0x136   : > { %1840 = vst.msk [vmem:[%s3444_s7 + $0x48] sm:$0xff] %vm1830_vm0, %v597_v9  ;;  %1968 = vst.msk [vmem:[%s3444_s7 + $0x448] sm:$0xff] %vm1830_vm0, %v1237_v10  ;;  %v592_v17 = vadd.f32 %v3437_v20, %v591_v13  ;;  %v1232_v18 = vadd.f32 %v3437_v20, %v1231_v14  ;;  %v451_v9 = vld [vmem:[%s3181_s25 + $0x7a8] sm:$0xff]  ;;  %v452_v13 = vld [vmem:[%s3181_s25 + $0x7b0] sm:$0xff] }
 0x137   : > { %v2502_v19 = vpop.f32.mrf.mxu0  ;;  %2645 = vmatmul.mubr.f32.gmra.mxu0 %v313_v11  ;;  %v2694_v21 = vpop.f32.mrf.mxu1  ;;  %2837 = vmatmul.mubr.f32.gmra.mxu1 %v441_v12  ;;  %v324_v12 = vld [vmem:[%s3181_s25 + $0x3b0] sm:$0xff] }
 0x138   : > { %1839 = vst.msk [vmem:[%s3444_s7 + $0x40] sm:$0xff] %vm1830_vm0, %v592_v17  ;;  %1967 = vst.msk [vmem:[%s3444_s7 + $0x440] sm:$0xff] %vm1830_vm0, %v1232_v18  ;;  %v607_v22 = vadd.f32 %v2502_v19, %v3437_v20  ;;  %v1247_v23 = vadd.f32 %v2694_v21, %v3437_v20  ;;  %2647 = vmatprep.mubr.f32.mxu0 %v314_v15  ;;  %2839 = vmatprep.mubr.f32.mxu1 %v442_v16  ;;  %v325_v21 = vld [vmem:[%s3181_s25 + $0x3b8] sm:$0xff] }
 0x139   : > { %v601_v26 = vpop.f32.mrf.mxu0  ;;  %v1241_v27 = vpop.f32.mrf.mxu1 }
 0x13a   : > { %1842 = vst.msk [vmem:[%s3444_s7 + $0x58] sm:$0xff] %vm1830_vm0, %v607_v22  ;;  %1970 = vst.msk [vmem:[%s3444_s7 + $0x458] sm:$0xff] %vm1830_vm0, %v1247_v23  ;;  %v602_v30 = vadd.f32 %v3437_v20, %v601_v26  ;;  %v1242_v31 = vadd.f32 %v3437_v20, %v1241_v27  ;;  %v453_v22 = vld [vmem:[%s3181_s25 + $0x7b8] sm:$0xff]  ;;  %v454_v26 = vld [vmem:[%s3181_s25 + $0x7c0] sm:$0xff] }
 0x13b   : > { %v2505_v32 = vpop.f32.mrf.mxu0  ;;  %2648 = vmatmul.mubr.f32.gmra.mxu0 %v315_v24  ;;  %v2697_v33 = vpop.f32.mrf.mxu1  ;;  %2840 = vmatmul.mubr.f32.gmra.mxu1 %v443_v25  ;;  %v326_v25 = vld [vmem:[%s3181_s25 + $0x3c0] sm:$0xff] }
 0x13c   : > { %1841 = vst.msk [vmem:[%s3444_s7 + $0x50] sm:$0xff] %vm1830_vm0, %v602_v30  ;;  %1969 = vst.msk [vmem:[%s3444_s7 + $0x450] sm:$0xff] %vm1830_vm0, %v1242_v31  ;;  %v617_v34 = vadd.f32 %v2505_v32, %v3437_v20  ;;  %v1257_v35 = vadd.f32 %v2697_v33, %v3437_v20  ;;  %2650 = vmatprep.mubr.f32.mxu0 %v316_v28  ;;  %2842 = vmatprep.mubr.f32.mxu1 %v444_v29  ;;  %v327_v33 = vld [vmem:[%s3181_s25 + $0x3c8] sm:$0xff] }
 0x13d   : > { %v611_v38 = vpop.f32.mrf.mxu0  ;;  %v1251_v39 = vpop.f32.mrf.mxu1 }
 0x13e   : > { %1844 = vst.msk [vmem:[%s3444_s7 + $0x68] sm:$0xff] %vm1830_vm0, %v617_v34  ;;  %1972 = vst.msk [vmem:[%s3444_s7 + $0x468] sm:$0xff] %vm1830_vm0, %v1257_v35  ;;  %v612_v42 = vadd.f32 %v3437_v20, %v611_v38  ;;  %v1252_v43 = vadd.f32 %v3437_v20, %v1251_v39  ;;  %v455_v34 = vld [vmem:[%s3181_s25 + $0x7c8] sm:$0xff]  ;;  %v456_v38 = vld [vmem:[%s3181_s25 + $0x7d0] sm:$0xff] }
 0x13f   : > { %v2508_v44 = vpop.f32.mrf.mxu0  ;;  %2651 = vmatmul.mubr.f32.gmra.mxu0 %v317_v36  ;;  %v2700_v45 = vpop.f32.mrf.mxu1  ;;  %2843 = vmatmul.mubr.f32.gmra.mxu1 %v445_v37  ;;  %v328_v37 = vld [vmem:[%s3181_s25 + $0x3d0] sm:$0xff] }
 0x140   : > { %1843 = vst.msk [vmem:[%s3444_s7 + $0x60] sm:$0xff] %vm1830_vm0, %v612_v42  ;;  %1971 = vst.msk [vmem:[%s3444_s7 + $0x460] sm:$0xff] %vm1830_vm0, %v1252_v43  ;;  %v627_v46 = vadd.f32 %v2508_v44, %v3437_v20  ;;  %v1267_v47 = vadd.f32 %v2700_v45, %v3437_v20  ;;  %2653 = vmatprep.mubr.f32.mxu0 %v318_v40  ;;  %2845 = vmatprep.mubr.f32.mxu1 %v446_v41  ;;  %v329_v45 = vld [vmem:[%s3181_s25 + $0x3d8] sm:$0xff] }
 0x141   : > { %v621_v50 = vpop.f32.mrf.mxu0  ;;  %v1261_v51 = vpop.f32.mrf.mxu1 }
 0x142   : > { %1846 = vst.msk [vmem:[%s3444_s7 + $0x78] sm:$0xff] %vm1830_vm0, %v627_v46  ;;  %1974 = vst.msk [vmem:[%s3444_s7 + $0x478] sm:$0xff] %vm1830_vm0, %v1267_v47  ;;  %v622_v54 = vadd.f32 %v3437_v20, %v621_v50  ;;  %v1262_v55 = vadd.f32 %v3437_v20, %v1261_v51  ;;  %v457_v46 = vld [vmem:[%s3181_s25 + $0x7d8] sm:$0xff]  ;;  %v458_v50 = vld [vmem:[%s3181_s25 + $0x7e0] sm:$0xff] }
 0x143   : > { %v2511_v56 = vpop.f32.mrf.mxu0  ;;  %2654 = vmatmul.mubr.f32.gmra.mxu0 %v319_v48  ;;  %v2703_v57 = vpop.f32.mrf.mxu1  ;;  %2846 = vmatmul.mubr.f32.gmra.mxu1 %v447_v49  ;;  %v330_v49 = vld [vmem:[%s3181_s25 + $0x3e0] sm:$0xff] }
 0x144   : > { %1845 = vst.msk [vmem:[%s3444_s7 + $0x70] sm:$0xff] %vm1830_vm0, %v622_v54  ;;  %1973 = vst.msk [vmem:[%s3444_s7 + $0x470] sm:$0xff] %vm1830_vm0, %v1262_v55  ;;  %v637_v58 = vadd.f32 %v2511_v56, %v3437_v20  ;;  %v1277_v59 = vadd.f32 %v2703_v57, %v3437_v20  ;;  %2656 = vmatprep.mubr.f32.mxu0 %v320_v52  ;;  %2848 = vmatprep.mubr.f32.mxu1 %v448_v53  ;;  %v331_v57 = vld [vmem:[%s3181_s25 + $0x3e8] sm:$0xff] }
 0x145   : > { %v631_v62 = vpop.f32.mrf.mxu0  ;;  %v1271_v63 = vpop.f32.mrf.mxu1 }
 0x146   : > { %1848 = vst.msk [vmem:[%s3444_s7 + $0x88] sm:$0xff] %vm1830_vm0, %v637_v58  ;;  %1976 = vst.msk [vmem:[%s3444_s7 + $0x488] sm:$0xff] %vm1830_vm0, %v1277_v59  ;;  %v632_v2 = vadd.f32 %v3437_v20, %v631_v62  ;;  %v1272_v3 = vadd.f32 %v3437_v20, %v1271_v63  ;;  %v459_v58 = vld [vmem:[%s3181_s25 + $0x7e8] sm:$0xff]  ;;  %v460_v62 = vld [vmem:[%s3181_s25 + $0x7f0] sm:$0xff] }
 0x147   : > { %v2514_v4 = vpop.f32.mrf.mxu0  ;;  %2657 = vmatmul.mubr.f32.gmra.mxu0 %v321_v60  ;;  %v2706_v5 = vpop.f32.mrf.mxu1  ;;  %2849 = vmatmul.mubr.f32.gmra.mxu1 %v449_v61  ;;  %v332_v61 = vld [vmem:[%s3181_s25 + $0x3f0] sm:$0xff] }
 0x148   : > { %1847 = vst.msk [vmem:[%s3444_s7 + $0x80] sm:$0xff] %vm1830_vm0, %v632_v2  ;;  %1975 = vst.msk [vmem:[%s3444_s7 + $0x480] sm:$0xff] %vm1830_vm0, %v1272_v3  ;;  %v647_v6 = vadd.f32 %v2514_v4, %v3437_v20  ;;  %v1287_v7 = vadd.f32 %v2706_v5, %v3437_v20  ;;  %2659 = vmatprep.mubr.f32.mxu0 %v322_v0  ;;  %2851 = vmatprep.mubr.f32.mxu1 %v450_v1  ;;  %v333_v5 = vld [vmem:[%s3181_s25 + $0x3f8] sm:$0xff] }
 0x149   : > { %v641_v10 = vpop.f32.mrf.mxu0  ;;  %v1281_v11 = vpop.f32.mrf.mxu1 }
 0x14a   : > { %1850 = vst.msk [vmem:[%s3444_s7 + $0x98] sm:$0xff] %vm1830_vm0, %v647_v6  ;;  %1978 = vst.msk [vmem:[%s3444_s7 + $0x498] sm:$0xff] %vm1830_vm0, %v1287_v7  ;;  %v642_v14 = vadd.f32 %v3437_v20, %v641_v10  ;;  %v1282_v15 = vadd.f32 %v3437_v20, %v1281_v11  ;;  %v461_v6 = vld [vmem:[%s3181_s25 + $0x7f8] sm:$0xff] }
 0x14b   : > { %v2517_v16 = vpop.f32.mrf.mxu0  ;;  %2660 = vmatmul.mubr.f32.gmra.mxu0 %v323_v8  ;;  %v2709_v17 = vpop.f32.mrf.mxu1  ;;  %2852 = vmatmul.mubr.f32.gmra.mxu1 %v451_v9 }
 0x14c   : > { %1849 = vst.msk [vmem:[%s3444_s7 + $0x90] sm:$0xff] %vm1830_vm0, %v642_v14  ;;  %1977 = vst.msk [vmem:[%s3444_s7 + $0x490] sm:$0xff] %vm1830_vm0, %v1282_v15  ;;  %v657_v18 = vadd.f32 %v2517_v16, %v3437_v20  ;;  %v1297_v19 = vadd.f32 %v2709_v17, %v3437_v20  ;;  %2662 = vmatprep.mubr.f32.mxu0 %v324_v12  ;;  %2854 = vmatprep.mubr.f32.mxu1 %v452_v13 }
 0x14d   : > { %v651_v23 = vpop.f32.mrf.mxu0  ;;  %v1291_v24 = vpop.f32.mrf.mxu1 }
 0x14e   : > { %1852 = vst.msk [vmem:[%s3444_s7 + $0xa8] sm:$0xff] %vm1830_vm0, %v657_v18  ;;  %1980 = vst.msk [vmem:[%s3444_s7 + $0x4a8] sm:$0xff] %vm1830_vm0, %v1297_v19  ;;  %v652_v27 = vadd.f32 %v3437_v20, %v651_v23  ;;  %v1292_v28 = vadd.f32 %v3437_v20, %v1291_v24 }
 0x14f   : > { %v2520_v29 = vpop.f32.mrf.mxu0  ;;  %2663 = vmatmul.mubr.f32.gmra.mxu0 %v325_v21  ;;  %v2712_v30 = vpop.f32.mrf.mxu1  ;;  %2855 = vmatmul.mubr.f32.gmra.mxu1 %v453_v22 }
 0x150   : > { %1851 = vst.msk [vmem:[%s3444_s7 + $0xa0] sm:$0xff] %vm1830_vm0, %v652_v27  ;;  %1979 = vst.msk [vmem:[%s3444_s7 + $0x4a0] sm:$0xff] %vm1830_vm0, %v1292_v28  ;;  %v667_v31 = vadd.f32 %v2520_v29, %v3437_v20  ;;  %v1307_v32 = vadd.f32 %v2712_v30, %v3437_v20  ;;  %2665 = vmatprep.mubr.f32.mxu0 %v326_v25  ;;  %2857 = vmatprep.mubr.f32.mxu1 %v454_v26 }
 0x151   : > { %v661_v35 = vpop.f32.mrf.mxu0  ;;  %v1301_v36 = vpop.f32.mrf.mxu1 }
 0x152   : > { %1854 = vst.msk [vmem:[%s3444_s7 + $0xb8] sm:$0xff] %vm1830_vm0, %v667_v31  ;;  %1982 = vst.msk [vmem:[%s3444_s7 + $0x4b8] sm:$0xff] %vm1830_vm0, %v1307_v32  ;;  %v662_v39 = vadd.f32 %v3437_v20, %v661_v35  ;;  %v1302_v40 = vadd.f32 %v3437_v20, %v1301_v36 }
 0x153   : > { %v2523_v41 = vpop.f32.mrf.mxu0  ;;  %2666 = vmatmul.mubr.f32.gmra.mxu0 %v327_v33  ;;  %v2715_v42 = vpop.f32.mrf.mxu1  ;;  %2858 = vmatmul.mubr.f32.gmra.mxu1 %v455_v34 }
 0x154   : > { %1853 = vst.msk [vmem:[%s3444_s7 + $0xb0] sm:$0xff] %vm1830_vm0, %v662_v39  ;;  %1981 = vst.msk [vmem:[%s3444_s7 + $0x4b0] sm:$0xff] %vm1830_vm0, %v1302_v40  ;;  %v677_v43 = vadd.f32 %v2523_v41, %v3437_v20  ;;  %v1317_v44 = vadd.f32 %v2715_v42, %v3437_v20  ;;  %2668 = vmatprep.mubr.f32.mxu0 %v328_v37  ;;  %2860 = vmatprep.mubr.f32.mxu1 %v456_v38 }
 0x155   : > { %v671_v47 = vpop.f32.mrf.mxu0  ;;  %v1311_v48 = vpop.f32.mrf.mxu1 }
 0x156   : > { %1856 = vst.msk [vmem:[%s3444_s7 + $0xc8] sm:$0xff] %vm1830_vm0, %v677_v43  ;;  %1984 = vst.msk [vmem:[%s3444_s7 + $0x4c8] sm:$0xff] %vm1830_vm0, %v1317_v44  ;;  %v672_v51 = vadd.f32 %v3437_v20, %v671_v47  ;;  %v1312_v52 = vadd.f32 %v3437_v20, %v1311_v48 }
 0x157   : > { %v2526_v53 = vpop.f32.mrf.mxu0  ;;  %2669 = vmatmul.mubr.f32.gmra.mxu0 %v329_v45  ;;  %v2718_v54 = vpop.f32.mrf.mxu1  ;;  %2861 = vmatmul.mubr.f32.gmra.mxu1 %v457_v46 }
 0x158   : > { %1855 = vst.msk [vmem:[%s3444_s7 + $0xc0] sm:$0xff] %vm1830_vm0, %v672_v51  ;;  %1983 = vst.msk [vmem:[%s3444_s7 + $0x4c0] sm:$0xff] %vm1830_vm0, %v1312_v52  ;;  %v687_v55 = vadd.f32 %v2526_v53, %v3437_v20  ;;  %v1327_v56 = vadd.f32 %v2718_v54, %v3437_v20  ;;  %2671 = vmatprep.mubr.f32.mxu0 %v330_v49  ;;  %2863 = vmatprep.mubr.f32.mxu1 %v458_v50 }
 0x159   : > { %v681_v59 = vpop.f32.mrf.mxu0  ;;  %v1321_v60 = vpop.f32.mrf.mxu1 }
 0x15a   : > { %1858 = vst.msk [vmem:[%s3444_s7 + $0xd8] sm:$0xff] %vm1830_vm0, %v687_v55  ;;  %1986 = vst.msk [vmem:[%s3444_s7 + $0x4d8] sm:$0xff] %vm1830_vm0, %v1327_v56  ;;  %v682_v63 = vadd.f32 %v3437_v20, %v681_v59  ;;  %v1322_v0 = vadd.f32 %v3437_v20, %v1321_v60 }
 0x15b   : > { %v2529_v1 = vpop.f32.mrf.mxu0  ;;  %2672 = vmatmul.mubr.f32.gmra.mxu0 %v331_v57  ;;  %v2721_v2 = vpop.f32.mrf.mxu1  ;;  %2864 = vmatmul.mubr.f32.gmra.mxu1 %v459_v58 }
 0x15c   : > { %1857 = vst.msk [vmem:[%s3444_s7 + $0xd0] sm:$0xff] %vm1830_vm0, %v682_v63  ;;  %1985 = vst.msk [vmem:[%s3444_s7 + $0x4d0] sm:$0xff] %vm1830_vm0, %v1322_v0  ;;  %v697_v3 = vadd.f32 %v2529_v1, %v3437_v20  ;;  %v1337_v4 = vadd.f32 %v2721_v2, %v3437_v20  ;;  %2674 = vmatprep.mubr.f32.mxu0 %v332_v61  ;;  %2866 = vmatprep.mubr.f32.mxu1 %v460_v62 }
 0x15d   : > { %v691_v7 = vpop.f32.mrf.mxu0  ;;  %v1331_v8 = vpop.f32.mrf.mxu1 }
 0x15e   : > { %1860 = vst.msk [vmem:[%s3444_s7 + $0xe8] sm:$0xff] %vm1830_vm0, %v697_v3  ;;  %1988 = vst.msk [vmem:[%s3444_s7 + $0x4e8] sm:$0xff] %vm1830_vm0, %v1337_v4  ;;  %v692_v9 = vadd.f32 %v3437_v20, %v691_v7  ;;  %v1332_v10 = vadd.f32 %v3437_v20, %v1331_v8 }
 0x15f   : > { %v2532_v11 = vpop.f32.mrf.mxu0  ;;  %2675 = vmatmul.mubr.f32.gmra.mxu0 %v333_v5  ;;  %v2724_v12 = vpop.f32.mrf.mxu1  ;;  %2867 = vmatmul.mubr.f32.gmra.mxu1 %v461_v6 }
 0x160   : > { %1859 = vst.msk [vmem:[%s3444_s7 + $0xe0] sm:$0xff] %vm1830_vm0, %v692_v9  ;;  %1987 = vst.msk [vmem:[%s3444_s7 + $0x4e0] sm:$0xff] %vm1830_vm0, %v1332_v10  ;;  %v707_v13 = vadd.f32 %v2532_v11, %v3437_v20  ;;  %v1347_v14 = vadd.f32 %v2724_v12, %v3437_v20 }
 0x161   : > { %v701_v15 = vpop.f32.mrf.mxu0  ;;  %v1341_v16 = vpop.f32.mrf.mxu1 }
 0x162   : > { %1862 = vst.msk [vmem:[%s3444_s7 + $0xf8] sm:$0xff] %vm1830_vm0, %v707_v13  ;;  %1990 = vst.msk [vmem:[%s3444_s7 + $0x4f8] sm:$0xff] %vm1830_vm0, %v1347_v14  ;;  %v702_v17 = vadd.f32 %v3437_v20, %v701_v15  ;;  %v1342_v18 = vadd.f32 %v3437_v20, %v1341_v16 }
 0x163   : > { %v2535_v19 = vpop.f32.mrf.mxu0  ;;  %v2727_v21 = vpop.f32.mrf.mxu1 }
 0x164   : > { %1861 = vst.msk [vmem:[%s3444_s7 + $0xf0] sm:$0xff] %vm1830_vm0, %v702_v17  ;;  %1989 = vst.msk [vmem:[%s3444_s7 + $0x4f0] sm:$0xff] %vm1830_vm0, %v1342_v18  ;;  %v717_v22 = vadd.f32 %v2535_v19, %v3437_v20  ;;  %v1357_v23 = vadd.f32 %v2727_v21, %v3437_v20 }
 0x165   : > { %v711_v24 = vpop.f32.mrf.mxu0  ;;  %v1351_v25 = vpop.f32.mrf.mxu1 }
 0x166   : > { %1864 = vst.msk [vmem:[%s3444_s7 + $0x108] sm:$0xff] %vm1830_vm0, %v717_v22  ;;  %1992 = vst.msk [vmem:[%s3444_s7 + $0x508] sm:$0xff] %vm1830_vm0, %v1357_v23  ;;  %v712_v26 = vadd.f32 %v3437_v20, %v711_v24  ;;  %v1352_v27 = vadd.f32 %v3437_v20, %v1351_v25 }
 0x167   : > { %v2538_v28 = vpop.f32.mrf.mxu0  ;;  %v2730_v29 = vpop.f32.mrf.mxu1 }
 0x168   : > { %1863 = vst.msk [vmem:[%s3444_s7 + $0x100] sm:$0xff] %vm1830_vm0, %v712_v26  ;;  %1991 = vst.msk [vmem:[%s3444_s7 + $0x500] sm:$0xff] %vm1830_vm0, %v1352_v27  ;;  %v727_v30 = vadd.f32 %v2538_v28, %v3437_v20  ;;  %v1367_v31 = vadd.f32 %v2730_v29, %v3437_v20 }
 0x169   : > { %v721_v32 = vpop.f32.mrf.mxu0  ;;  %v1361_v33 = vpop.f32.mrf.mxu1 }
 0x16a   : > { %1866 = vst.msk [vmem:[%s3444_s7 + $0x118] sm:$0xff] %vm1830_vm0, %v727_v30  ;;  %1994 = vst.msk [vmem:[%s3444_s7 + $0x518] sm:$0xff] %vm1830_vm0, %v1367_v31  ;;  %v722_v34 = vadd.f32 %v3437_v20, %v721_v32  ;;  %v1362_v35 = vadd.f32 %v3437_v20, %v1361_v33 }
 0x16b   : > { %v2541_v36 = vpop.f32.mrf.mxu0  ;;  %v2733_v37 = vpop.f32.mrf.mxu1 }
 0x16c   : > { %1865 = vst.msk [vmem:[%s3444_s7 + $0x110] sm:$0xff] %vm1830_vm0, %v722_v34  ;;  %1993 = vst.msk [vmem:[%s3444_s7 + $0x510] sm:$0xff] %vm1830_vm0, %v1362_v35  ;;  %v737_v38 = vadd.f32 %v2541_v36, %v3437_v20  ;;  %v1377_v39 = vadd.f32 %v2733_v37, %v3437_v20 }
 0x16d   : > { %v731_v40 = vpop.f32.mrf.mxu0  ;;  %v1371_v41 = vpop.f32.mrf.mxu1 }
 0x16e   : > { %1868 = vst.msk [vmem:[%s3444_s7 + $0x128] sm:$0xff] %vm1830_vm0, %v737_v38  ;;  %1996 = vst.msk [vmem:[%s3444_s7 + $0x528] sm:$0xff] %vm1830_vm0, %v1377_v39  ;;  %v732_v42 = vadd.f32 %v3437_v20, %v731_v40  ;;  %v1372_v43 = vadd.f32 %v3437_v20, %v1371_v41 }
 0x16f   : > { %v2544_v44 = vpop.f32.mrf.mxu0  ;;  %v2736_v45 = vpop.f32.mrf.mxu1 }
 0x170   : > { %1867 = vst.msk [vmem:[%s3444_s7 + $0x120] sm:$0xff] %vm1830_vm0, %v732_v42  ;;  %1995 = vst.msk [vmem:[%s3444_s7 + $0x520] sm:$0xff] %vm1830_vm0, %v1372_v43  ;;  %v747_v46 = vadd.f32 %v2544_v44, %v3437_v20  ;;  %v1387_v47 = vadd.f32 %v2736_v45, %v3437_v20 }
 0x171   : > { %v741_v48 = vpop.f32.mrf.mxu0  ;;  %v1381_v49 = vpop.f32.mrf.mxu1 }
 0x172   : > { %1870 = vst.msk [vmem:[%s3444_s7 + $0x138] sm:$0xff] %vm1830_vm0, %v747_v46  ;;  %1998 = vst.msk [vmem:[%s3444_s7 + $0x538] sm:$0xff] %vm1830_vm0, %v1387_v47  ;;  %v742_v50 = vadd.f32 %v3437_v20, %v741_v48  ;;  %v1382_v51 = vadd.f32 %v3437_v20, %v1381_v49 }
 0x173   : > { %v2547_v52 = vpop.f32.mrf.mxu0  ;;  %v2739_v53 = vpop.f32.mrf.mxu1 }
 0x174   : > { %1869 = vst.msk [vmem:[%s3444_s7 + $0x130] sm:$0xff] %vm1830_vm0, %v742_v50  ;;  %1997 = vst.msk [vmem:[%s3444_s7 + $0x530] sm:$0xff] %vm1830_vm0, %v1382_v51  ;;  %v757_v54 = vadd.f32 %v2547_v52, %v3437_v20  ;;  %v1397_v55 = vadd.f32 %v2739_v53, %v3437_v20 }
 0x175   : > { %v751_v56 = vpop.f32.mrf.mxu0  ;;  %v1391_v57 = vpop.f32.mrf.mxu1 }
 0x176   : > { %1872 = vst.msk [vmem:[%s3444_s7 + $0x148] sm:$0xff] %vm1830_vm0, %v757_v54  ;;  %2000 = vst.msk [vmem:[%s3444_s7 + $0x548] sm:$0xff] %vm1830_vm0, %v1397_v55  ;;  %v752_v58 = vadd.f32 %v3437_v20, %v751_v56  ;;  %v1392_v59 = vadd.f32 %v3437_v20, %v1391_v57 }
 0x177   : > { %v2550_v60 = vpop.f32.mrf.mxu0  ;;  %v2742_v61 = vpop.f32.mrf.mxu1 }
 0x178   : > { %1871 = vst.msk [vmem:[%s3444_s7 + $0x140] sm:$0xff] %vm1830_vm0, %v752_v58  ;;  %1999 = vst.msk [vmem:[%s3444_s7 + $0x540] sm:$0xff] %vm1830_vm0, %v1392_v59  ;;  %v767_v62 = vadd.f32 %v2550_v60, %v3437_v20  ;;  %v1407_v63 = vadd.f32 %v2742_v61, %v3437_v20 }
 0x179   : > { %v761_v0 = vpop.f32.mrf.mxu0  ;;  %v1401_v1 = vpop.f32.mrf.mxu1 }
 0x17a   : > { %1874 = vst.msk [vmem:[%s3444_s7 + $0x158] sm:$0xff] %vm1830_vm0, %v767_v62  ;;  %2002 = vst.msk [vmem:[%s3444_s7 + $0x558] sm:$0xff] %vm1830_vm0, %v1407_v63  ;;  %v762_v2 = vadd.f32 %v3437_v20, %v761_v0  ;;  %v1402_v3 = vadd.f32 %v3437_v20, %v1401_v1 }
 0x17b   : > { %v2553_v4 = vpop.f32.mrf.mxu0  ;;  %v2745_v5 = vpop.f32.mrf.mxu1 }
 0x17c   : > { %1873 = vst.msk [vmem:[%s3444_s7 + $0x150] sm:$0xff] %vm1830_vm0, %v762_v2  ;;  %2001 = vst.msk [vmem:[%s3444_s7 + $0x550] sm:$0xff] %vm1830_vm0, %v1402_v3  ;;  %v777_v6 = vadd.f32 %v2553_v4, %v3437_v20  ;;  %v1417_v7 = vadd.f32 %v2745_v5, %v3437_v20 }
 0x17d   : > { %v771_v8 = vpop.f32.mrf.mxu0  ;;  %v1411_v9 = vpop.f32.mrf.mxu1 }
 0x17e   : > { %1876 = vst.msk [vmem:[%s3444_s7 + $0x168] sm:$0xff] %vm1830_vm0, %v777_v6  ;;  %2004 = vst.msk [vmem:[%s3444_s7 + $0x568] sm:$0xff] %vm1830_vm0, %v1417_v7  ;;  %v772_v10 = vadd.f32 %v3437_v20, %v771_v8  ;;  %v1412_v11 = vadd.f32 %v3437_v20, %v1411_v9 }
 0x17f   : > { %v2556_v12 = vpop.f32.mrf.mxu0  ;;  %v2748_v13 = vpop.f32.mrf.mxu1 }
 0x180   : > { %1875 = vst.msk [vmem:[%s3444_s7 + $0x160] sm:$0xff] %vm1830_vm0, %v772_v10  ;;  %2003 = vst.msk [vmem:[%s3444_s7 + $0x560] sm:$0xff] %vm1830_vm0, %v1412_v11  ;;  %v787_v14 = vadd.f32 %v2556_v12, %v3437_v20  ;;  %v1427_v15 = vadd.f32 %v2748_v13, %v3437_v20 }
 0x181   : > { %v781_v16 = vpop.f32.mrf.mxu0  ;;  %v1421_v17 = vpop.f32.mrf.mxu1 }
 0x182   : > { %1878 = vst.msk [vmem:[%s3444_s7 + $0x178] sm:$0xff] %vm1830_vm0, %v787_v14  ;;  %2006 = vst.msk [vmem:[%s3444_s7 + $0x578] sm:$0xff] %vm1830_vm0, %v1427_v15  ;;  %v782_v18 = vadd.f32 %v3437_v20, %v781_v16  ;;  %v1422_v19 = vadd.f32 %v3437_v20, %v1421_v17 }
 0x183   : > { %v2559_v21 = vpop.f32.mrf.mxu0  ;;  %v2751_v22 = vpop.f32.mrf.mxu1 }
 0x184   : > { %1877 = vst.msk [vmem:[%s3444_s7 + $0x170] sm:$0xff] %vm1830_vm0, %v782_v18  ;;  %2005 = vst.msk [vmem:[%s3444_s7 + $0x570] sm:$0xff] %vm1830_vm0, %v1422_v19  ;;  %v797_v23 = vadd.f32 %v2559_v21, %v3437_v20  ;;  %v1437_v24 = vadd.f32 %v2751_v22, %v3437_v20 }
 0x185   : > { %v791_v25 = vpop.f32.mrf.mxu0  ;;  %v1431_v26 = vpop.f32.mrf.mxu1 }
 0x186   : > { %1880 = vst.msk [vmem:[%s3444_s7 + $0x188] sm:$0xff] %vm1830_vm0, %v797_v23  ;;  %2008 = vst.msk [vmem:[%s3444_s7 + $0x588] sm:$0xff] %vm1830_vm0, %v1437_v24  ;;  %v792_v27 = vadd.f32 %v3437_v20, %v791_v25  ;;  %v1432_v28 = vadd.f32 %v3437_v20, %v1431_v26  ;;  %v3889_v25 = vld [vmem:[#allocation4] ss:$0 sm:$0xff] }
 0x187   : > { %v2562_v29 = vpop.f32.mrf.mxu0  ;;  %v2754_v30 = vpop.f32.mrf.mxu1 }
 0x188   : > { %1879 = vst.msk [vmem:[%s3444_s7 + $0x180] sm:$0xff] %vm1830_vm0, %v792_v27  ;;  %2007 = vst.msk [vmem:[%s3444_s7 + $0x580] sm:$0xff] %vm1830_vm0, %v1432_v28  ;;  %v807_v31 = vadd.f32 %v2562_v29, %v3437_v20  ;;  %v1447_v32 = vadd.f32 %v2754_v30, %v3437_v20 }
 0x189   : > { %v801_v33 = vpop.f32.mrf.mxu0  ;;  %v1441_v34 = vpop.f32.mrf.mxu1 }
 0x18a   : > { %1882 = vst.msk [vmem:[%s3444_s7 + $0x198] sm:$0xff] %vm1830_vm0, %v807_v31  ;;  %2010 = vst.msk [vmem:[%s3444_s7 + $0x598] sm:$0xff] %vm1830_vm0, %v1447_v32  ;;  %v802_v35 = vadd.f32 %v3437_v20, %v801_v33  ;;  %v1442_v36 = vadd.f32 %v3437_v20, %v1441_v34 }
 0x18b   : > { %v2565_v37 = vpop.f32.mrf.mxu0  ;;  %v2757_v38 = vpop.f32.mrf.mxu1 }
 0x18c   : > { %1881 = vst.msk [vmem:[%s3444_s7 + $0x190] sm:$0xff] %vm1830_vm0, %v802_v35  ;;  %2009 = vst.msk [vmem:[%s3444_s7 + $0x590] sm:$0xff] %vm1830_vm0, %v1442_v36  ;;  %v817_v39 = vadd.f32 %v2565_v37, %v3437_v20  ;;  %v1457_v40 = vadd.f32 %v2757_v38, %v3437_v20 }
 0x18d   : > { %v811_v41 = vpop.f32.mrf.mxu0  ;;  %v1451_v42 = vpop.f32.mrf.mxu1 }
 0x18e   : > { %1884 = vst.msk [vmem:[%s3444_s7 + $0x1a8] sm:$0xff] %vm1830_vm0, %v817_v39  ;;  %2012 = vst.msk [vmem:[%s3444_s7 + $0x5a8] sm:$0xff] %vm1830_vm0, %v1457_v40  ;;  %v812_v43 = vadd.f32 %v3437_v20, %v811_v41  ;;  %v1452_v44 = vadd.f32 %v3437_v20, %v1451_v42 }
 0x18f   : > { %v2568_v45 = vpop.f32.mrf.mxu0  ;;  %v2760_v46 = vpop.f32.mrf.mxu1 }
 0x190   : > { %1883 = vst.msk [vmem:[%s3444_s7 + $0x1a0] sm:$0xff] %vm1830_vm0, %v812_v43  ;;  %2011 = vst.msk [vmem:[%s3444_s7 + $0x5a0] sm:$0xff] %vm1830_vm0, %v1452_v44  ;;  %v827_v47 = vadd.f32 %v2568_v45, %v3437_v20  ;;  %v1467_v48 = vadd.f32 %v2760_v46, %v3437_v20 }
 0x191   : > { %v821_v49 = vpop.f32.mrf.mxu0  ;;  %v1461_v50 = vpop.f32.mrf.mxu1 }
 0x192   : > { %1886 = vst.msk [vmem:[%s3444_s7 + $0x1b8] sm:$0xff] %vm1830_vm0, %v827_v47  ;;  %2014 = vst.msk [vmem:[%s3444_s7 + $0x5b8] sm:$0xff] %vm1830_vm0, %v1467_v48  ;;  %v822_v51 = vadd.f32 %v3437_v20, %v821_v49  ;;  %v1462_v52 = vadd.f32 %v3437_v20, %v1461_v50 }
 0x193   : > { %v2571_v53 = vpop.f32.mrf.mxu0  ;;  %v2763_v54 = vpop.f32.mrf.mxu1 }
 0x194   : > { %1885 = vst.msk [vmem:[%s3444_s7 + $0x1b0] sm:$0xff] %vm1830_vm0, %v822_v51  ;;  %2013 = vst.msk [vmem:[%s3444_s7 + $0x5b0] sm:$0xff] %vm1830_vm0, %v1462_v52  ;;  %v837_v55 = vadd.f32 %v2571_v53, %v3437_v20  ;;  %v1477_v56 = vadd.f32 %v2763_v54, %v3437_v20 }
 0x195   : > { %v831_v57 = vpop.f32.mrf.mxu0  ;;  %v1471_v58 = vpop.f32.mrf.mxu1 }
 0x196   : > { %1888 = vst.msk [vmem:[%s3444_s7 + $0x1c8] sm:$0xff] %vm1830_vm0, %v837_v55  ;;  %2016 = vst.msk [vmem:[%s3444_s7 + $0x5c8] sm:$0xff] %vm1830_vm0, %v1477_v56  ;;  %v832_v59 = vadd.f32 %v3437_v20, %v831_v57  ;;  %v1472_v60 = vadd.f32 %v3437_v20, %v1471_v58 }
 0x197   : > { %v2574_v61 = vpop.f32.mrf.mxu0  ;;  %v2766_v62 = vpop.f32.mrf.mxu1 }
 0x198   : > { %1887 = vst.msk [vmem:[%s3444_s7 + $0x1c0] sm:$0xff] %vm1830_vm0, %v832_v59  ;;  %2015 = vst.msk [vmem:[%s3444_s7 + $0x5c0] sm:$0xff] %vm1830_vm0, %v1472_v60  ;;  %v847_v63 = vadd.f32 %v2574_v61, %v3437_v20  ;;  %v1487_v0 = vadd.f32 %v2766_v62, %v3437_v20 }
 0x199   : > { %v841_v1 = vpop.f32.mrf.mxu0  ;;  %v1481_v2 = vpop.f32.mrf.mxu1 }
 0x19a   : > { %1890 = vst.msk [vmem:[%s3444_s7 + $0x1d8] sm:$0xff] %vm1830_vm0, %v847_v63  ;;  %2018 = vst.msk [vmem:[%s3444_s7 + $0x5d8] sm:$0xff] %vm1830_vm0, %v1487_v0  ;;  %v842_v3 = vadd.f32 %v3437_v20, %v841_v1  ;;  %v1482_v4 = vadd.f32 %v3437_v20, %v1481_v2 }
 0x19b   : > { %v2577_v5 = vpop.f32.mrf.mxu0  ;;  %v2769_v6 = vpop.f32.mrf.mxu1 }
 0x19c   : > { %1889 = vst.msk [vmem:[%s3444_s7 + $0x1d0] sm:$0xff] %vm1830_vm0, %v842_v3  ;;  %2017 = vst.msk [vmem:[%s3444_s7 + $0x5d0] sm:$0xff] %vm1830_vm0, %v1482_v4  ;;  %v857_v7 = vadd.f32 %v2577_v5, %v3437_v20  ;;  %v1497_v8 = vadd.f32 %v2769_v6, %v3437_v20 }
 0x19d   : > { %v851_v9 = vpop.f32.mrf.mxu0  ;;  %v1491_v10 = vpop.f32.mrf.mxu1 }
 0x19e   : > { %1892 = vst.msk [vmem:[%s3444_s7 + $0x1e8] sm:$0xff] %vm1830_vm0, %v857_v7  ;;  %2020 = vst.msk [vmem:[%s3444_s7 + $0x5e8] sm:$0xff] %vm1830_vm0, %v1497_v8  ;;  %v852_v11 = vadd.f32 %v3437_v20, %v851_v9  ;;  %v1492_v12 = vadd.f32 %v3437_v20, %v1491_v10 }
 0x19f   : > { %v2580_v13 = vpop.f32.mrf.mxu0  ;;  %v2772_v14 = vpop.f32.mrf.mxu1 }
 0x1a0   : > { %1891 = vst.msk [vmem:[%s3444_s7 + $0x1e0] sm:$0xff] %vm1830_vm0, %v852_v11  ;;  %2019 = vst.msk [vmem:[%s3444_s7 + $0x5e0] sm:$0xff] %vm1830_vm0, %v1492_v12  ;;  %v867_v15 = vadd.f32 %v2580_v13, %v3437_v20  ;;  %v1507_v16 = vadd.f32 %v2772_v14, %v3437_v20 }
 0x1a1   : > { %v861_v17 = vpop.f32.mrf.mxu0  ;;  %v1501_v18 = vpop.f32.mrf.mxu1 }
 0x1a2   : > { %1894 = vst.msk [vmem:[%s3444_s7 + $0x1f8] sm:$0xff] %vm1830_vm0, %v867_v15  ;;  %2022 = vst.msk [vmem:[%s3444_s7 + $0x5f8] sm:$0xff] %vm1830_vm0, %v1507_v16  ;;  %v862_v19 = vadd.f32 %v3437_v20, %v861_v17  ;;  %v1502_v21 = vadd.f32 %v3437_v20, %v1501_v18 }
 0x1a3   : > { %v2583_v22 = vpop.f32.mrf.mxu0  ;;  %v2775_v23 = vpop.f32.mrf.mxu1 }
 0x1a4   : > { %1893 = vst.msk [vmem:[%s3444_s7 + $0x1f0] sm:$0xff] %vm1830_vm0, %v862_v19  ;;  %2021 = vst.msk [vmem:[%s3444_s7 + $0x5f0] sm:$0xff] %vm1830_vm0, %v1502_v21  ;;  %v877_v24 = vadd.f32 %v2583_v22, %v3437_v20  ;;  %v1517_v26 = vadd.f32 %v3889_v25, %v2775_v23 }
 0x1a5   : > { %v871_v27 = vpop.f32.mrf.mxu0  ;;  %v1511_v28 = vpop.f32.mrf.mxu1 }
 0x1a6   : > { %1896 = vst.msk [vmem:[%s3444_s7 + $0x208] sm:$0xff] %vm1830_vm0, %v877_v24  ;;  %2024 = vst.msk [vmem:[%s3444_s7 + $0x608] sm:$0xff] %vm1830_vm0, %v1517_v26  ;;  %v872_v29 = vadd.f32 %v3889_v25, %v871_v27  ;;  %v1512_v30 = vadd.f32 %v3889_v25, %v1511_v28 }
 0x1a7   : > { %v2586_v31 = vpop.f32.mrf.mxu0  ;;  %v2778_v20 = vpop.f32.mrf.mxu1 }
 0x1a8   : > { %1895 = vst.msk [vmem:[%s3444_s7 + $0x200] sm:$0xff] %vm1830_vm0, %v872_v29  ;;  %2023 = vst.msk [vmem:[%s3444_s7 + $0x600] sm:$0xff] %vm1830_vm0, %v1512_v30  ;;  %v887_v32 = vadd.f32 %v3889_v25, %v2586_v31  ;;  %v1527_v33 = vadd.f32 %v3889_v25, %v2778_v20 }
 0x1a9   : > { %v881_v34 = vpop.f32.mrf.mxu0  ;;  %v1521_v35 = vpop.f32.mrf.mxu1 }
 0x1aa   : > { %1898 = vst.msk [vmem:[%s3444_s7 + $0x218] sm:$0xff] %vm1830_vm0, %v887_v32  ;;  %2026 = vst.msk [vmem:[%s3444_s7 + $0x618] sm:$0xff] %vm1830_vm0, %v1527_v33  ;;  %v882_v36 = vadd.f32 %v3889_v25, %v881_v34  ;;  %v1522_v37 = vadd.f32 %v3889_v25, %v1521_v35 }
 0x1ab   : > { %v2589_v38 = vpop.f32.mrf.mxu0  ;;  %v2781_v39 = vpop.f32.mrf.mxu1 }
 0x1ac   : > { %1897 = vst.msk [vmem:[%s3444_s7 + $0x210] sm:$0xff] %vm1830_vm0, %v882_v36  ;;  %2025 = vst.msk [vmem:[%s3444_s7 + $0x610] sm:$0xff] %vm1830_vm0, %v1522_v37  ;;  %v897_v40 = vadd.f32 %v3889_v25, %v2589_v38  ;;  %v1537_v41 = vadd.f32 %v3889_v25, %v2781_v39 }
 0x1ad   : > { %v891_v42 = vpop.f32.mrf.mxu0  ;;  %v1531_v43 = vpop.f32.mrf.mxu1 }
 0x1ae   : > { %1900 = vst.msk [vmem:[%s3444_s7 + $0x228] sm:$0xff] %vm1830_vm0, %v897_v40  ;;  %2028 = vst.msk [vmem:[%s3444_s7 + $0x628] sm:$0xff] %vm1830_vm0, %v1537_v41  ;;  %v892_v44 = vadd.f32 %v3889_v25, %v891_v42  ;;  %v1532_v45 = vadd.f32 %v3889_v25, %v1531_v43 }
 0x1af   : > { %v2592_v46 = vpop.f32.mrf.mxu0  ;;  %v2784_v47 = vpop.f32.mrf.mxu1 }
 0x1b0   : > { %1899 = vst.msk [vmem:[%s3444_s7 + $0x220] sm:$0xff] %vm1830_vm0, %v892_v44  ;;  %2027 = vst.msk [vmem:[%s3444_s7 + $0x620] sm:$0xff] %vm1830_vm0, %v1532_v45  ;;  %v907_v48 = vadd.f32 %v3889_v25, %v2592_v46  ;;  %v1547_v49 = vadd.f32 %v3889_v25, %v2784_v47 }
 0x1b1   : > { %v901_v50 = vpop.f32.mrf.mxu0  ;;  %v1541_v51 = vpop.f32.mrf.mxu1 }
 0x1b2   : > { %1902 = vst.msk [vmem:[%s3444_s7 + $0x238] sm:$0xff] %vm1830_vm0, %v907_v48  ;;  %2030 = vst.msk [vmem:[%s3444_s7 + $0x638] sm:$0xff] %vm1830_vm0, %v1547_v49  ;;  %v902_v52 = vadd.f32 %v3889_v25, %v901_v50  ;;  %v1542_v53 = vadd.f32 %v3889_v25, %v1541_v51 }
 0x1b3   : > { %v2595_v54 = vpop.f32.mrf.mxu0  ;;  %v2787_v55 = vpop.f32.mrf.mxu1 }
 0x1b4   : > { %1901 = vst.msk [vmem:[%s3444_s7 + $0x230] sm:$0xff] %vm1830_vm0, %v902_v52  ;;  %2029 = vst.msk [vmem:[%s3444_s7 + $0x630] sm:$0xff] %vm1830_vm0, %v1542_v53  ;;  %v917_v56 = vadd.f32 %v3889_v25, %v2595_v54  ;;  %v1557_v57 = vadd.f32 %v3889_v25, %v2787_v55 }
 0x1b5   : > { %v911_v58 = vpop.f32.mrf.mxu0  ;;  %v1551_v59 = vpop.f32.mrf.mxu1 }
 0x1b6   : > { %1904 = vst.msk [vmem:[%s3444_s7 + $0x248] sm:$0xff] %vm1830_vm0, %v917_v56  ;;  %2032 = vst.msk [vmem:[%s3444_s7 + $0x648] sm:$0xff] %vm1830_vm0, %v1557_v57  ;;  %v912_v60 = vadd.f32 %v3889_v25, %v911_v58  ;;  %v1552_v61 = vadd.f32 %v3889_v25, %v1551_v59 }
 0x1b7   : > { %v2598_v62 = vpop.f32.mrf.mxu0  ;;  %v2790_v63 = vpop.f32.mrf.mxu1 }
 0x1b8   : > { %1903 = vst.msk [vmem:[%s3444_s7 + $0x240] sm:$0xff] %vm1830_vm0, %v912_v60  ;;  %2031 = vst.msk [vmem:[%s3444_s7 + $0x640] sm:$0xff] %vm1830_vm0, %v1552_v61  ;;  %v927_v0 = vadd.f32 %v3889_v25, %v2598_v62  ;;  %v1567_v1 = vadd.f32 %v3889_v25, %v2790_v63 }
 0x1b9   : > { %v921_v2 = vpop.f32.mrf.mxu0  ;;  %v1561_v3 = vpop.f32.mrf.mxu1 }
 0x1ba   : > { %1906 = vst.msk [vmem:[%s3444_s7 + $0x258] sm:$0xff] %vm1830_vm0, %v927_v0  ;;  %2034 = vst.msk [vmem:[%s3444_s7 + $0x658] sm:$0xff] %vm1830_vm0, %v1567_v1  ;;  %v922_v4 = vadd.f32 %v3889_v25, %v921_v2  ;;  %v1562_v5 = vadd.f32 %v3889_v25, %v1561_v3 }
 0x1bb   : > { %v2601_v6 = vpop.f32.mrf.mxu0  ;;  %v2793_v7 = vpop.f32.mrf.mxu1 }
 0x1bc   : > { %1905 = vst.msk [vmem:[%s3444_s7 + $0x250] sm:$0xff] %vm1830_vm0, %v922_v4  ;;  %2033 = vst.msk [vmem:[%s3444_s7 + $0x650] sm:$0xff] %vm1830_vm0, %v1562_v5  ;;  %v937_v8 = vadd.f32 %v3889_v25, %v2601_v6  ;;  %v1577_v9 = vadd.f32 %v3889_v25, %v2793_v7 }
 0x1bd   : > { %v931_v10 = vpop.f32.mrf.mxu0  ;;  %v1571_v11 = vpop.f32.mrf.mxu1 }
 0x1be   : > { %1908 = vst.msk [vmem:[%s3444_s7 + $0x268] sm:$0xff] %vm1830_vm0, %v937_v8  ;;  %2036 = vst.msk [vmem:[%s3444_s7 + $0x668] sm:$0xff] %vm1830_vm0, %v1577_v9  ;;  %v932_v12 = vadd.f32 %v3889_v25, %v931_v10  ;;  %v1572_v13 = vadd.f32 %v3889_v25, %v1571_v11 }
 0x1bf   : > { %v2604_v14 = vpop.f32.mrf.mxu0  ;;  %v2796_v15 = vpop.f32.mrf.mxu1 }
 0x1c0   : > { %1907 = vst.msk [vmem:[%s3444_s7 + $0x260] sm:$0xff] %vm1830_vm0, %v932_v12  ;;  %2035 = vst.msk [vmem:[%s3444_s7 + $0x660] sm:$0xff] %vm1830_vm0, %v1572_v13  ;;  %v947_v16 = vadd.f32 %v3889_v25, %v2604_v14  ;;  %v1587_v17 = vadd.f32 %v3889_v25, %v2796_v15 }
 0x1c1   : > { %v941_v18 = vpop.f32.mrf.mxu0  ;;  %v1581_v19 = vpop.f32.mrf.mxu1 }
 0x1c2   : > { %1910 = vst.msk [vmem:[%s3444_s7 + $0x278] sm:$0xff] %vm1830_vm0, %v947_v16  ;;  %2038 = vst.msk [vmem:[%s3444_s7 + $0x678] sm:$0xff] %vm1830_vm0, %v1587_v17  ;;  %v942_v21 = vadd.f32 %v3889_v25, %v941_v18  ;;  %v1582_v22 = vadd.f32 %v3889_v25, %v1581_v19 }
 0x1c3   : > { %v2607_v23 = vpop.f32.mrf.mxu0  ;;  %v2799_v24 = vpop.f32.mrf.mxu1 }
 0x1c4   : > { %1909 = vst.msk [vmem:[%s3444_s7 + $0x270] sm:$0xff] %vm1830_vm0, %v942_v21  ;;  %2037 = vst.msk [vmem:[%s3444_s7 + $0x670] sm:$0xff] %vm1830_vm0, %v1582_v22  ;;  %v957_v26 = vadd.f32 %v3889_v25, %v2607_v23  ;;  %v1597_v27 = vadd.f32 %v3889_v25, %v2799_v24 }
 0x1c5   : > { %v951_v28 = vpop.f32.mrf.mxu0  ;;  %v1591_v29 = vpop.f32.mrf.mxu1 }
 0x1c6   : > { %1912 = vst.msk [vmem:[%s3444_s7 + $0x288] sm:$0xff] %vm1830_vm0, %v957_v26  ;;  %2040 = vst.msk [vmem:[%s3444_s7 + $0x688] sm:$0xff] %vm1830_vm0, %v1597_v27  ;;  %v952_v30 = vadd.f32 %v3889_v25, %v951_v28  ;;  %v1592_v31 = vadd.f32 %v3889_v25, %v1591_v29 }
 0x1c7   : > { %v2610_v20 = vpop.f32.mrf.mxu0  ;;  %v2802_v32 = vpop.f32.mrf.mxu1 }
 0x1c8   : > { %1911 = vst.msk [vmem:[%s3444_s7 + $0x280] sm:$0xff] %vm1830_vm0, %v952_v30  ;;  %2039 = vst.msk [vmem:[%s3444_s7 + $0x680] sm:$0xff] %vm1830_vm0, %v1592_v31  ;;  %v967_v33 = vadd.f32 %v3889_v25, %v2610_v20  ;;  %v1607_v34 = vadd.f32 %v3889_v25, %v2802_v32 }
 0x1c9   : > { %v961_v35 = vpop.f32.mrf.mxu0  ;;  %v1601_v36 = vpop.f32.mrf.mxu1 }
 0x1ca   : > { %1914 = vst.msk [vmem:[%s3444_s7 + $0x298] sm:$0xff] %vm1830_vm0, %v967_v33  ;;  %2042 = vst.msk [vmem:[%s3444_s7 + $0x698] sm:$0xff] %vm1830_vm0, %v1607_v34  ;;  %v962_v37 = vadd.f32 %v3889_v25, %v961_v35  ;;  %v1602_v38 = vadd.f32 %v3889_v25, %v1601_v36 }
 0x1cb   : > { %v2613_v39 = vpop.f32.mrf.mxu0  ;;  %v2805_v40 = vpop.f32.mrf.mxu1 }
 0x1cc   : > { %1913 = vst.msk [vmem:[%s3444_s7 + $0x290] sm:$0xff] %vm1830_vm0, %v962_v37  ;;  %2041 = vst.msk [vmem:[%s3444_s7 + $0x690] sm:$0xff] %vm1830_vm0, %v1602_v38  ;;  %v977_v41 = vadd.f32 %v3889_v25, %v2613_v39  ;;  %v1617_v42 = vadd.f32 %v3889_v25, %v2805_v40 }
 0x1cd   : > { %v971_v43 = vpop.f32.mrf.mxu0  ;;  %v1611_v44 = vpop.f32.mrf.mxu1 }
 0x1ce   : > { %1916 = vst.msk [vmem:[%s3444_s7 + $0x2a8] sm:$0xff] %vm1830_vm0, %v977_v41  ;;  %2044 = vst.msk [vmem:[%s3444_s7 + $0x6a8] sm:$0xff] %vm1830_vm0, %v1617_v42  ;;  %v972_v45 = vadd.f32 %v3889_v25, %v971_v43  ;;  %v1612_v46 = vadd.f32 %v3889_v25, %v1611_v44 }
 0x1cf   : > { %v2616_v47 = vpop.f32.mrf.mxu0  ;;  %v2808_v48 = vpop.f32.mrf.mxu1 }
 0x1d0   : > { %1915 = vst.msk [vmem:[%s3444_s7 + $0x2a0] sm:$0xff] %vm1830_vm0, %v972_v45  ;;  %2043 = vst.msk [vmem:[%s3444_s7 + $0x6a0] sm:$0xff] %vm1830_vm0, %v1612_v46  ;;  %v987_v49 = vadd.f32 %v3889_v25, %v2616_v47  ;;  %v1627_v50 = vadd.f32 %v3889_v25, %v2808_v48 }
 0x1d1   : > { %v981_v51 = vpop.f32.mrf.mxu0  ;;  %v1621_v52 = vpop.f32.mrf.mxu1 }
 0x1d2   : > { %1918 = vst.msk [vmem:[%s3444_s7 + $0x2b8] sm:$0xff] %vm1830_vm0, %v987_v49  ;;  %2046 = vst.msk [vmem:[%s3444_s7 + $0x6b8] sm:$0xff] %vm1830_vm0, %v1627_v50  ;;  %v982_v53 = vadd.f32 %v3889_v25, %v981_v51  ;;  %v1622_v54 = vadd.f32 %v3889_v25, %v1621_v52 }
 0x1d3   : > { %v2619_v55 = vpop.f32.mrf.mxu0  ;;  %v2811_v56 = vpop.f32.mrf.mxu1 }
 0x1d4   : > { %1917 = vst.msk [vmem:[%s3444_s7 + $0x2b0] sm:$0xff] %vm1830_vm0, %v982_v53  ;;  %2045 = vst.msk [vmem:[%s3444_s7 + $0x6b0] sm:$0xff] %vm1830_vm0, %v1622_v54  ;;  %v997_v57 = vadd.f32 %v3889_v25, %v2619_v55  ;;  %v1637_v58 = vadd.f32 %v3889_v25, %v2811_v56 }
 0x1d5   : > { %v991_v59 = vpop.f32.mrf.mxu0  ;;  %v1631_v60 = vpop.f32.mrf.mxu1 }
 0x1d6   : > { %1920 = vst.msk [vmem:[%s3444_s7 + $0x2c8] sm:$0xff] %vm1830_vm0, %v997_v57  ;;  %2048 = vst.msk [vmem:[%s3444_s7 + $0x6c8] sm:$0xff] %vm1830_vm0, %v1637_v58  ;;  %v992_v61 = vadd.f32 %v3889_v25, %v991_v59  ;;  %v1632_v62 = vadd.f32 %v3889_v25, %v1631_v60 }
 0x1d7   : > { %v2622_v63 = vpop.f32.mrf.mxu0  ;;  %v2814_v0 = vpop.f32.mrf.mxu1 }
 0x1d8   : > { %1919 = vst.msk [vmem:[%s3444_s7 + $0x2c0] sm:$0xff] %vm1830_vm0, %v992_v61  ;;  %2047 = vst.msk [vmem:[%s3444_s7 + $0x6c0] sm:$0xff] %vm1830_vm0, %v1632_v62  ;;  %v1007_v1 = vadd.f32 %v3889_v25, %v2622_v63  ;;  %v1647_v2 = vadd.f32 %v3889_v25, %v2814_v0 }
 0x1d9   : > { %v1001_v3 = vpop.f32.mrf.mxu0  ;;  %v1641_v4 = vpop.f32.mrf.mxu1 }
 0x1da   : > { %1922 = vst.msk [vmem:[%s3444_s7 + $0x2d8] sm:$0xff] %vm1830_vm0, %v1007_v1  ;;  %2050 = vst.msk [vmem:[%s3444_s7 + $0x6d8] sm:$0xff] %vm1830_vm0, %v1647_v2  ;;  %v1002_v5 = vadd.f32 %v3889_v25, %v1001_v3  ;;  %v1642_v6 = vadd.f32 %v3889_v25, %v1641_v4 }
 0x1db   : > { %v2625_v7 = vpop.f32.mrf.mxu0  ;;  %v2817_v8 = vpop.f32.mrf.mxu1 }
 0x1dc   : > { %1921 = vst.msk [vmem:[%s3444_s7 + $0x2d0] sm:$0xff] %vm1830_vm0, %v1002_v5  ;;  %2049 = vst.msk [vmem:[%s3444_s7 + $0x6d0] sm:$0xff] %vm1830_vm0, %v1642_v6  ;;  %v1017_v9 = vadd.f32 %v3889_v25, %v2625_v7  ;;  %v1657_v10 = vadd.f32 %v3889_v25, %v2817_v8 }
 0x1dd   : > { %v1011_v11 = vpop.f32.mrf.mxu0  ;;  %v1651_v12 = vpop.f32.mrf.mxu1 }
 0x1de   : > { %1924 = vst.msk [vmem:[%s3444_s7 + $0x2e8] sm:$0xff] %vm1830_vm0, %v1017_v9  ;;  %2052 = vst.msk [vmem:[%s3444_s7 + $0x6e8] sm:$0xff] %vm1830_vm0, %v1657_v10  ;;  %v1012_v13 = vadd.f32 %v3889_v25, %v1011_v11  ;;  %v1652_v14 = vadd.f32 %v3889_v25, %v1651_v12 }
 0x1df   : > { %v2628_v15 = vpop.f32.mrf.mxu0  ;;  %v2820_v16 = vpop.f32.mrf.mxu1 }
 0x1e0   : > { %1923 = vst.msk [vmem:[%s3444_s7 + $0x2e0] sm:$0xff] %vm1830_vm0, %v1012_v13  ;;  %2051 = vst.msk [vmem:[%s3444_s7 + $0x6e0] sm:$0xff] %vm1830_vm0, %v1652_v14  ;;  %v1027_v17 = vadd.f32 %v3889_v25, %v2628_v15  ;;  %v1667_v18 = vadd.f32 %v3889_v25, %v2820_v16 }
 0x1e1   : > { %v1021_v19 = vpop.f32.mrf.mxu0  ;;  %v1661_v21 = vpop.f32.mrf.mxu1 }
 0x1e2   : > { %1926 = vst.msk [vmem:[%s3444_s7 + $0x2f8] sm:$0xff] %vm1830_vm0, %v1027_v17  ;;  %2054 = vst.msk [vmem:[%s3444_s7 + $0x6f8] sm:$0xff] %vm1830_vm0, %v1667_v18  ;;  %v1022_v22 = vadd.f32 %v3889_v25, %v1021_v19  ;;  %v1662_v23 = vadd.f32 %v3889_v25, %v1661_v21 }
 0x1e3   : > { %v2631_v24 = vpop.f32.mrf.mxu0  ;;  %v2823_v26 = vpop.f32.mrf.mxu1 }
 0x1e4   : > { %1925 = vst.msk [vmem:[%s3444_s7 + $0x2f0] sm:$0xff] %vm1830_vm0, %v1022_v22  ;;  %2053 = vst.msk [vmem:[%s3444_s7 + $0x6f0] sm:$0xff] %vm1830_vm0, %v1662_v23  ;;  %v1037_v27 = vadd.f32 %v3889_v25, %v2631_v24  ;;  %v1677_v28 = vadd.f32 %v3889_v25, %v2823_v26 }
 0x1e5   : > { %v1031_v29 = vpop.f32.mrf.mxu0  ;;  %v1671_v30 = vpop.f32.mrf.mxu1 }
 0x1e6   : > { %1928 = vst.msk [vmem:[%s3444_s7 + $0x308] sm:$0xff] %vm1830_vm0, %v1037_v27  ;;  %2056 = vst.msk [vmem:[%s3444_s7 + $0x708] sm:$0xff] %vm1830_vm0, %v1677_v28  ;;  %v1032_v31 = vadd.f32 %v3889_v25, %v1031_v29  ;;  %v1672_v20 = vadd.f32 %v3889_v25, %v1671_v30 }
 0x1e7   : > { %v2634_v32 = vpop.f32.mrf.mxu0  ;;  %v2826_v33 = vpop.f32.mrf.mxu1 }
 0x1e8   : > { %1927 = vst.msk [vmem:[%s3444_s7 + $0x300] sm:$0xff] %vm1830_vm0, %v1032_v31  ;;  %2055 = vst.msk [vmem:[%s3444_s7 + $0x700] sm:$0xff] %vm1830_vm0, %v1672_v20  ;;  %v1047_v34 = vadd.f32 %v3889_v25, %v2634_v32  ;;  %v1687_v35 = vadd.f32 %v3889_v25, %v2826_v33 }
 0x1e9   : > { %v1041_v36 = vpop.f32.mrf.mxu0  ;;  %v1681_v37 = vpop.f32.mrf.mxu1 }
 0x1ea   : > { %1930 = vst.msk [vmem:[%s3444_s7 + $0x318] sm:$0xff] %vm1830_vm0, %v1047_v34  ;;  %2058 = vst.msk [vmem:[%s3444_s7 + $0x718] sm:$0xff] %vm1830_vm0, %v1687_v35  ;;  %v1042_v38 = vadd.f32 %v3889_v25, %v1041_v36  ;;  %v1682_v39 = vadd.f32 %v3889_v25, %v1681_v37 }
 0x1eb   : > { %v2637_v40 = vpop.f32.mrf.mxu0  ;;  %v2829_v41 = vpop.f32.mrf.mxu1 }
 0x1ec   : > { %1929 = vst.msk [vmem:[%s3444_s7 + $0x310] sm:$0xff] %vm1830_vm0, %v1042_v38  ;;  %2057 = vst.msk [vmem:[%s3444_s7 + $0x710] sm:$0xff] %vm1830_vm0, %v1682_v39  ;;  %v1057_v42 = vadd.f32 %v3889_v25, %v2637_v40  ;;  %v1697_v43 = vadd.f32 %v3889_v25, %v2829_v41 }
 0x1ed   : > { %v1051_v44 = vpop.f32.mrf.mxu0  ;;  %v1691_v45 = vpop.f32.mrf.mxu1 }
 0x1ee   : > { %1932 = vst.msk [vmem:[%s3444_s7 + $0x328] sm:$0xff] %vm1830_vm0, %v1057_v42  ;;  %2060 = vst.msk [vmem:[%s3444_s7 + $0x728] sm:$0xff] %vm1830_vm0, %v1697_v43  ;;  %v1052_v46 = vadd.f32 %v3889_v25, %v1051_v44  ;;  %v1692_v47 = vadd.f32 %v3889_v25, %v1691_v45 }
 0x1ef   : > { %v2640_v48 = vpop.f32.mrf.mxu0  ;;  %v2832_v49 = vpop.f32.mrf.mxu1 }
 0x1f0   : > { %1931 = vst.msk [vmem:[%s3444_s7 + $0x320] sm:$0xff] %vm1830_vm0, %v1052_v46  ;;  %2059 = vst.msk [vmem:[%s3444_s7 + $0x720] sm:$0xff] %vm1830_vm0, %v1692_v47  ;;  %v1067_v50 = vadd.f32 %v3889_v25, %v2640_v48  ;;  %v1707_v51 = vadd.f32 %v3889_v25, %v2832_v49 }
 0x1f1   : > { %v1061_v52 = vpop.f32.mrf.mxu0  ;;  %v1701_v53 = vpop.f32.mrf.mxu1 }
 0x1f2   : > { %1934 = vst.msk [vmem:[%s3444_s7 + $0x338] sm:$0xff] %vm1830_vm0, %v1067_v50  ;;  %2062 = vst.msk [vmem:[%s3444_s7 + $0x738] sm:$0xff] %vm1830_vm0, %v1707_v51  ;;  %v1062_v54 = vadd.f32 %v3889_v25, %v1061_v52  ;;  %v1702_v55 = vadd.f32 %v3889_v25, %v1701_v53 }
 0x1f3   : > { %v2643_v56 = vpop.f32.mrf.mxu0  ;;  %v2835_v57 = vpop.f32.mrf.mxu1 }
 0x1f4   : > { %1933 = vst.msk [vmem:[%s3444_s7 + $0x330] sm:$0xff] %vm1830_vm0, %v1062_v54  ;;  %2061 = vst.msk [vmem:[%s3444_s7 + $0x730] sm:$0xff] %vm1830_vm0, %v1702_v55  ;;  %v1077_v58 = vadd.f32 %v3889_v25, %v2643_v56  ;;  %v1717_v59 = vadd.f32 %v3889_v25, %v2835_v57 }
 0x1f5   : > { %v1071_v60 = vpop.f32.mrf.mxu0  ;;  %v1711_v61 = vpop.f32.mrf.mxu1 }
 0x1f6   : > { %1936 = vst.msk [vmem:[%s3444_s7 + $0x348] sm:$0xff] %vm1830_vm0, %v1077_v58  ;;  %2064 = vst.msk [vmem:[%s3444_s7 + $0x748] sm:$0xff] %vm1830_vm0, %v1717_v59  ;;  %v1072_v62 = vadd.f32 %v3889_v25, %v1071_v60  ;;  %v1712_v63 = vadd.f32 %v3889_v25, %v1711_v61 }
 0x1f7   : > { %v2646_v0 = vpop.f32.mrf.mxu0  ;;  %v2838_v1 = vpop.f32.mrf.mxu1 }
 0x1f8   : > { %1935 = vst.msk [vmem:[%s3444_s7 + $0x340] sm:$0xff] %vm1830_vm0, %v1072_v62  ;;  %2063 = vst.msk [vmem:[%s3444_s7 + $0x740] sm:$0xff] %vm1830_vm0, %v1712_v63  ;;  %v1087_v2 = vadd.f32 %v3889_v25, %v2646_v0  ;;  %v1727_v3 = vadd.f32 %v3889_v25, %v2838_v1 }
 0x1f9   : > { %v1081_v4 = vpop.f32.mrf.mxu0  ;;  %v1721_v5 = vpop.f32.mrf.mxu1 }
 0x1fa   : > { %1938 = vst.msk [vmem:[%s3444_s7 + $0x358] sm:$0xff] %vm1830_vm0, %v1087_v2  ;;  %2066 = vst.msk [vmem:[%s3444_s7 + $0x758] sm:$0xff] %vm1830_vm0, %v1727_v3  ;;  %v1082_v6 = vadd.f32 %v3889_v25, %v1081_v4  ;;  %v1722_v7 = vadd.f32 %v3889_v25, %v1721_v5 }
 0x1fb   : > { %v2649_v8 = vpop.f32.mrf.mxu0  ;;  %v2841_v9 = vpop.f32.mrf.mxu1 }
 0x1fc   : > { %1937 = vst.msk [vmem:[%s3444_s7 + $0x350] sm:$0xff] %vm1830_vm0, %v1082_v6  ;;  %2065 = vst.msk [vmem:[%s3444_s7 + $0x750] sm:$0xff] %vm1830_vm0, %v1722_v7  ;;  %v1097_v10 = vadd.f32 %v3889_v25, %v2649_v8  ;;  %v1737_v11 = vadd.f32 %v3889_v25, %v2841_v9 }
 0x1fd   : > { %v1091_v12 = vpop.f32.mrf.mxu0  ;;  %v1731_v13 = vpop.f32.mrf.mxu1 }
 0x1fe   : > { %1940 = vst.msk [vmem:[%s3444_s7 + $0x368] sm:$0xff] %vm1830_vm0, %v1097_v10  ;;  %2068 = vst.msk [vmem:[%s3444_s7 + $0x768] sm:$0xff] %vm1830_vm0, %v1737_v11  ;;  %v1092_v14 = vadd.f32 %v3889_v25, %v1091_v12  ;;  %v1732_v15 = vadd.f32 %v3889_v25, %v1731_v13 }
 0x1ff   : > { %v2652_v16 = vpop.f32.mrf.mxu0  ;;  %v2844_v17 = vpop.f32.mrf.mxu1 }
 0x200   : > { %1939 = vst.msk [vmem:[%s3444_s7 + $0x360] sm:$0xff] %vm1830_vm0, %v1092_v14  ;;  %2067 = vst.msk [vmem:[%s3444_s7 + $0x760] sm:$0xff] %vm1830_vm0, %v1732_v15  ;;  %v1107_v18 = vadd.f32 %v3889_v25, %v2652_v16  ;;  %v1747_v19 = vadd.f32 %v3889_v25, %v2844_v17 }
 0x201   : > { %v1101_v21 = vpop.f32.mrf.mxu0  ;;  %v1741_v22 = vpop.f32.mrf.mxu1 }
 0x202   : > { %1942 = vst.msk [vmem:[%s3444_s7 + $0x378] sm:$0xff] %vm1830_vm0, %v1107_v18  ;;  %2070 = vst.msk [vmem:[%s3444_s7 + $0x778] sm:$0xff] %vm1830_vm0, %v1747_v19  ;;  %v1102_v23 = vadd.f32 %v3889_v25, %v1101_v21  ;;  %v1742_v24 = vadd.f32 %v3889_v25, %v1741_v22 }
 0x203   : > { %v2655_v26 = vpop.f32.mrf.mxu0  ;;  %v2847_v27 = vpop.f32.mrf.mxu1 }
 0x204   : > { %1941 = vst.msk [vmem:[%s3444_s7 + $0x370] sm:$0xff] %vm1830_vm0, %v1102_v23  ;;  %2069 = vst.msk [vmem:[%s3444_s7 + $0x770] sm:$0xff] %vm1830_vm0, %v1742_v24  ;;  %v1117_v28 = vadd.f32 %v3889_v25, %v2655_v26  ;;  %v1757_v29 = vadd.f32 %v3889_v25, %v2847_v27 }
 0x205   : > { %v1111_v30 = vpop.f32.mrf.mxu0  ;;  %v1751_v31 = vpop.f32.mrf.mxu1 }
 0x206   : > { %1944 = vst.msk [vmem:[%s3444_s7 + $0x388] sm:$0xff] %vm1830_vm0, %v1117_v28  ;;  %2072 = vst.msk [vmem:[%s3444_s7 + $0x788] sm:$0xff] %vm1830_vm0, %v1757_v29  ;;  %v1112_v20 = vadd.f32 %v3889_v25, %v1111_v30  ;;  %v1752_v32 = vadd.f32 %v3889_v25, %v1751_v31 }
 0x207   : > { %v2658_v33 = vpop.f32.mrf.mxu0  ;;  %v2850_v34 = vpop.f32.mrf.mxu1 }
 0x208   : > { %1943 = vst.msk [vmem:[%s3444_s7 + $0x380] sm:$0xff] %vm1830_vm0, %v1112_v20  ;;  %2071 = vst.msk [vmem:[%s3444_s7 + $0x780] sm:$0xff] %vm1830_vm0, %v1752_v32  ;;  %v1127_v35 = vadd.f32 %v3889_v25, %v2658_v33  ;;  %v1767_v36 = vadd.f32 %v3889_v25, %v2850_v34 }
 0x209   : > { %v1121_v37 = vpop.f32.mrf.mxu0  ;;  %v1761_v38 = vpop.f32.mrf.mxu1 }
 0x20a   : > { %1946 = vst.msk [vmem:[%s3444_s7 + $0x398] sm:$0xff] %vm1830_vm0, %v1127_v35  ;;  %2074 = vst.msk [vmem:[%s3444_s7 + $0x798] sm:$0xff] %vm1830_vm0, %v1767_v36  ;;  %v1122_v39 = vadd.f32 %v3889_v25, %v1121_v37  ;;  %v1762_v40 = vadd.f32 %v3889_v25, %v1761_v38 }
 0x20b   : > { %v2661_v41 = vpop.f32.mrf.mxu0  ;;  %v2853_v42 = vpop.f32.mrf.mxu1 }
 0x20c   : > { %1945 = vst.msk [vmem:[%s3444_s7 + $0x390] sm:$0xff] %vm1830_vm0, %v1122_v39  ;;  %2073 = vst.msk [vmem:[%s3444_s7 + $0x790] sm:$0xff] %vm1830_vm0, %v1762_v40  ;;  %v1137_v43 = vadd.f32 %v3889_v25, %v2661_v41  ;;  %v1777_v44 = vadd.f32 %v3889_v25, %v2853_v42 }
 0x20d   : > { %v1131_v45 = vpop.f32.mrf.mxu0  ;;  %v1771_v46 = vpop.f32.mrf.mxu1 }
 0x20e   : > { %1948 = vst.msk [vmem:[%s3444_s7 + $0x3a8] sm:$0xff] %vm1830_vm0, %v1137_v43  ;;  %2076 = vst.msk [vmem:[%s3444_s7 + $0x7a8] sm:$0xff] %vm1830_vm0, %v1777_v44  ;;  %v1132_v47 = vadd.f32 %v3889_v25, %v1131_v45  ;;  %v1772_v48 = vadd.f32 %v3889_v25, %v1771_v46 }
 0x20f   : > { %v2664_v49 = vpop.f32.mrf.mxu0  ;;  %v2856_v50 = vpop.f32.mrf.mxu1 }
 0x210   : > { %1947 = vst.msk [vmem:[%s3444_s7 + $0x3a0] sm:$0xff] %vm1830_vm0, %v1132_v47  ;;  %2075 = vst.msk [vmem:[%s3444_s7 + $0x7a0] sm:$0xff] %vm1830_vm0, %v1772_v48  ;;  %v1147_v51 = vadd.f32 %v3889_v25, %v2664_v49  ;;  %v1787_v52 = vadd.f32 %v3889_v25, %v2856_v50 }
 0x211   : > { %v1141_v53 = vpop.f32.mrf.mxu0  ;;  %v1781_v54 = vpop.f32.mrf.mxu1 }
 0x212   : > { %1950 = vst.msk [vmem:[%s3444_s7 + $0x3b8] sm:$0xff] %vm1830_vm0, %v1147_v51  ;;  %2078 = vst.msk [vmem:[%s3444_s7 + $0x7b8] sm:$0xff] %vm1830_vm0, %v1787_v52  ;;  %v1142_v55 = vadd.f32 %v3889_v25, %v1141_v53  ;;  %v1782_v56 = vadd.f32 %v3889_v25, %v1781_v54 }
 0x213   : > { %v2667_v57 = vpop.f32.mrf.mxu0  ;;  %v2859_v58 = vpop.f32.mrf.mxu1 }
 0x214   : > { %1949 = vst.msk [vmem:[%s3444_s7 + $0x3b0] sm:$0xff] %vm1830_vm0, %v1142_v55  ;;  %2077 = vst.msk [vmem:[%s3444_s7 + $0x7b0] sm:$0xff] %vm1830_vm0, %v1782_v56  ;;  %v1157_v59 = vadd.f32 %v3889_v25, %v2667_v57  ;;  %v1797_v60 = vadd.f32 %v3889_v25, %v2859_v58 }
 0x215   : > { %v1151_v61 = vpop.f32.mrf.mxu0  ;;  %v1791_v62 = vpop.f32.mrf.mxu1 }
 0x216   : > { %1952 = vst.msk [vmem:[%s3444_s7 + $0x3c8] sm:$0xff] %vm1830_vm0, %v1157_v59  ;;  %2080 = vst.msk [vmem:[%s3444_s7 + $0x7c8] sm:$0xff] %vm1830_vm0, %v1797_v60  ;;  %v1152_v63 = vadd.f32 %v3889_v25, %v1151_v61  ;;  %v1792_v0 = vadd.f32 %v3889_v25, %v1791_v62 }
 0x217   : > { %v2670_v1 = vpop.f32.mrf.mxu0  ;;  %v2862_v2 = vpop.f32.mrf.mxu1 }
 0x218   : > { %1951 = vst.msk [vmem:[%s3444_s7 + $0x3c0] sm:$0xff] %vm1830_vm0, %v1152_v63  ;;  %2079 = vst.msk [vmem:[%s3444_s7 + $0x7c0] sm:$0xff] %vm1830_vm0, %v1792_v0  ;;  %v1167_v3 = vadd.f32 %v3889_v25, %v2670_v1  ;;  %v1807_v4 = vadd.f32 %v3889_v25, %v2862_v2 }
 0x219   : > { %v1161_v5 = vpop.f32.mrf.mxu0  ;;  %v1801_v6 = vpop.f32.mrf.mxu1 }
 0x21a   : > { %1954 = vst.msk [vmem:[%s3444_s7 + $0x3d8] sm:$0xff] %vm1830_vm0, %v1167_v3  ;;  %2082 = vst.msk [vmem:[%s3444_s7 + $0x7d8] sm:$0xff] %vm1830_vm0, %v1807_v4  ;;  %v1162_v7 = vadd.f32 %v3889_v25, %v1161_v5  ;;  %v1802_v8 = vadd.f32 %v3889_v25, %v1801_v6 }
 0x21b   : > { %v2673_v9 = vpop.f32.mrf.mxu0  ;;  %v2865_v10 = vpop.f32.mrf.mxu1 }
 0x21c   : > { %1953 = vst.msk [vmem:[%s3444_s7 + $0x3d0] sm:$0xff] %vm1830_vm0, %v1162_v7  ;;  %2081 = vst.msk [vmem:[%s3444_s7 + $0x7d0] sm:$0xff] %vm1830_vm0, %v1802_v8  ;;  %v1177_v11 = vadd.f32 %v3889_v25, %v2673_v9  ;;  %v1817_v12 = vadd.f32 %v3889_v25, %v2865_v10 }
 0x21d   : > { %v1171_v13 = vpop.f32.mrf.mxu0  ;;  %v1811_v14 = vpop.f32.mrf.mxu1 }
 0x21e   : > { %1956 = vst.msk [vmem:[%s3444_s7 + $0x3e8] sm:$0xff] %vm1830_vm0, %v1177_v11  ;;  %2084 = vst.msk [vmem:[%s3444_s7 + $0x7e8] sm:$0xff] %vm1830_vm0, %v1817_v12  ;;  %v1172_v15 = vadd.f32 %v3889_v25, %v1171_v13  ;;  %v1812_v16 = vadd.f32 %v3889_v25, %v1811_v14 }
 0x21f   : > { %v2676_v17 = vpop.f32.mrf.mxu0  ;;  %v2868_v18 = vpop.f32.mrf.mxu1 }
 0x220   : > { %1955 = vst.msk [vmem:[%s3444_s7 + $0x3e0] sm:$0xff] %vm1830_vm0, %v1172_v15  ;;  %2083 = vst.msk [vmem:[%s3444_s7 + $0x7e0] sm:$0xff] %vm1830_vm0, %v1812_v16  ;;  %v1187_v19 = vadd.f32 %v3889_v25, %v2676_v17  ;;  %v1827_v21 = vadd.f32 %v3889_v25, %v2868_v18 }
 0x221   : > { %v1181_v22 = vpop.f32.mrf.mxu0  ;;  %v1821_v23 = vpop.f32.mrf.mxu1 }
 0x222   : > { %1958 = vst.msk [vmem:[%s3444_s7 + $0x3f8] sm:$0xff] %vm1830_vm0, %v1187_v19  ;;  %2086 = vst.msk [vmem:[%s3444_s7 + $0x7f8] sm:$0xff] %vm1830_vm0, %v1827_v21  ;;  %v1182_v24 = vadd.f32 %v3889_v25, %v1181_v22  ;;  %v1822_v26 = vadd.f32 %v3889_v25, %v1821_v23 }
 0x224   : > { %1957 = vst.msk [vmem:[%s3444_s7 + $0x3f0] sm:$0xff] %vm1830_vm0, %v1182_v24  ;;  %2085 = vst.msk [vmem:[%s3444_s7 + $0x7f0] sm:$0xff] %vm1830_vm0, %v1822_v26 }
 0x225 PF: > { %p14_p12 = scmp.ge.s32.totalorder %s3092_s17, 4   ;;  %s4304_s12 = smov %s3038_s13 }
 0x226   : > { %s4305_s13 = smov %s3042_s14  ;;  %s4306_s14 = smov %s3102_s20 }
 0x227   : > { %s4307_s15 = smov %s3092_s17  ;;  %16 = sbr.rel (!%p14_p12) target bundleno = 4 (0x4), region = 76 }
 0x22c   :  { %2109 = vsyncpa [#allocation3], 1 }
 0x22d   :  { %2111 = vsyncpa [#allocation3 + $0x1], 1 }
 0x22e   :  { %2112 = vsyncpa [#allocation5], 1 }

</bundles_post_ra>
